<compile_context>
chip_gen: v7x
topology: tpu7x:2x2x1
jax: 0.10.0
libtpu: 0.0.40
codegen_flags: <defaults>
</compile_context>

<pallas_src>
import functools

import jax
import jax.numpy as jnp
from jax import lax
from jax.experimental import pallas as pl
from jax.experimental.pallas import tpu as pltpu

CP = 128          # lane width used for activations / output channels
NEG_SLOPE = 0.2   # LeakyReLU slope
BN_EPS = 1e-5     # nn.BatchNorm2d default eps


# --------------------------------------------------------------------------- #
# kernel-side helpers
# --------------------------------------------------------------------------- #
def _matmul_bias_lrelu(cols_bf16, w_bf16, b_row):
    """(M,K)bf16 x (K,CP)bf16 -> f32, + bias row, + LeakyReLU(0.2)."""
    y = jnp.dot(cols_bf16, w_bf16, preferred_element_type=jnp.float32) + b_row
    return jnp.maximum(y, NEG_SLOPE * y)          # 2 VPU ops, no select


def _conv3x3_packed(x_hwc, w_flat, b_row, c_pack):
    """3x3 'SAME' conv as one matmul with a packed-tap im2col.

    x_hwc:  (H, W, CP) f32, real channels in lanes [0, c_real) with EXACT zeros
            above (c_real <= c_pack, c_pack divides CP).
    w_flat: (n_grp*CP, CP) bf16, rows laid out to match the tap packing.
    The 9 spatial taps are packed CP//c_pack per 128-lane K group using
    pltpu.roll (XLU), so K = ceil(9 / (CP//c_pack)) * 128 instead of 9*128.
    """
    H, W, C = x_hwc.shape
    tpg = C // c_pack                              # taps per 128-lane K group
    n_grp = -(-9 // tpg)
    # spatial zero pad by 1 as an in-register value
    zrow = jnp.zeros((1, W, C), jnp.float32)
    zcol = jnp.zeros((H + 2, 1, C), jnp.float32)
    xp = jnp.concatenate([zrow, x_hwc, zrow], axis=0)
    xp = jnp.concatenate([zcol, xp, zcol], axis=1)             # (H+2, W+2, C)
    groups = []
    for g in range(n_grp):
        acc = None
        for s in range(tpg):
            t = g * tpg + s
            if t >= 9:
                break
            dy, dx = divmod(t, 3)
            tap = xp[dy:dy + H, dx:dx + W, :].reshape(H * W, C)
            if s:
                # real lanes [0, c_pack) -> lanes [s*c_pack, (s+1)*c_pack);
                # wrapped lanes are exact zeros, so '+' packs without overlap.
                tap = pltpu.roll(tap, shift=s * c_pack, axis=1)
            acc = tap if acc is None else acc + tap
        groups.append(acc)
    cols = groups[0] if n_grp == 1 else jnp.concatenate(groups, axis=1)
    return _matmul_bias_lrelu(cols.astype(jnp.bfloat16), w_flat, b_row)


def _maxpool2x2(y_hwc, buf_ref):
    """2x2/stride-2 max pool. Returns (H//2 * W//2, C), row-major over (h, w).

    H direction uses free leading-dim slices; W direction uses a stride-2 row
    load from a VMEM scratch (avoids sublane->lane relayout reshapes).
    """
    H, W, C = y_hwc.shape
    yh = y_hwc.reshape(H // 2, 2, W, C)                         # leading split
    ph = jnp.maximum(yh[:, 0], yh[:, 1]).reshape(H // 2 * W, C)
    rows = H // 2 * W
    buf_ref[pl.ds(0, rows), :] = ph
    ev = buf_ref[pl.ds(0, rows // 2, 2), :]                     # even W rows
    od = buf_ref[pl.ds(1, rows // 2, 2), :]                     # odd  W rows
    return jnp.maximum(ev, od)


def _conv_ex_kernel(x_ref, w1_ref, w2_ref, w3_ref, w4_ref, b_ref, o_ref,
                    pool_buf, *, c_packs):
    # x_ref:  (1, H, W, K1) bf16   precomputed layer-1 im2col (lane-dense)
    # w*_ref: (K_l, CP)     bf16   BN-folded, branch-combined, tap-packed
    # b_ref:  (4, 1, CP)    f32    BN-folded biases (both branches in lanes)
    # o_ref:  (1, H//4 * W//4, CP) f32
    _, H, W, K1 = x_ref.shape
    cp2, cp3, cp4 = c_packs

    # layer 1: im2col was built in the wrapper -> a single matmul
    cols1 = x_ref[0].reshape(H * W, K1)
    y = _matmul_bias_lrelu(cols1, w1_ref[...], b_ref[0])        # (H*W, CP)

    # layer 2 at full resolution, then 2x2 max-pool
    y = _conv3x3_packed(y.reshape(H, W, CP), w2_ref[...], b_ref[1], cp2)
    y = _maxpool2x2(y.reshape(H, W, CP), pool_buf)              # (H//2*W//2, CP)

    H2, W2 = H // 2, W // 2
    # layers 3, 4 at half resolution, then 2x2 max-pool
    y = _conv3x3_packed(y.reshape(H2, W2, CP), w3_ref[...], b_ref[2], cp3)
    y = _conv3x3_packed(y.reshape(H2, W2, CP), w4_ref[...], b_ref[3], cp4)
    o_ref[0] = _maxpool2x2(y.reshape(H2, W2, CP), pool_buf)     # (H2//2*W2//2, CP)


# --------------------------------------------------------------------------- #
# wrapper: BN folding, branch combining, weight packing, pallas_call
# --------------------------------------------------------------------------- #
def _fold_bn(p):
    scale = p["gamma"] / jnp.sqrt(p["var"] + BN_EPS)
    w = p["w"].astype(jnp.float32) * scale[None, None, None, :]
    b = (p["b"].astype(jnp.float32) - p["mean"]) * scale + p["beta"]
    return w, b


def _next_pow2(n):
    p = 1
    while p < n:
        p *= 2
    return p


def _pack_weight_l1(w_hwio):
    """Layer-1 weight -> (K1, CP) bf16, rows = tap*cin + ci (tight K)."""
    _, _, ci, co = w_hwio.shape
    k_real = 9 * ci
    K = -(-k_real // CP) * CP
    wp = jnp.zeros((K, CP), jnp.float32)
    for t in range(9):
        dy, dx = divmod(t, 3)
        wp = wp.at[t * ci:(t + 1) * ci, :co].set(w_hwio[dy, dx])
    return wp.astype(jnp.bfloat16)


def _pack_weight(w_hwio, c_pack):
    """3x3 HWIO weight -> (n_grp*CP, CP) bf16 matching the packed-tap im2col."""
    _, _, ci, co = w_hwio.shape
    tpg = CP // c_pack
    n_grp = -(-9 // tpg)
    wp = jnp.zeros((n_grp * CP, CP), jnp.float32)
    for t in range(9):
        dy, dx = divmod(t, 3)
        g, s = divmod(t, tpg)
        r0 = g * CP + s * c_pack
        wp = wp.at[r0:r0 + ci, :co].set(w_hwio[dy, dx])
    return wp.astype(jnp.bfloat16)


def _pad_bias(b):
    return jnp.zeros((1, CP), jnp.float32).at[0, :b.shape[0]].set(b)


def _im2col_l1(x_nhwc, K):
    """Layer-1 im2col in the wrapper (pure layout plumbing, zero FLOPs)."""
    _, H, W, ci = x_nhwc.shape
    xp = jnp.pad(x_nhwc, ((0, 0), (1, 1), (1, 1), (0, 0)))
    taps = [xp[:, dy:dy + H, dx:dx + W, :] for dy in range(3) for dx in range(3)]
    cols = jnp.concatenate(taps, axis=-1)                       # (N,H,W,9*ci)
    cols = jnp.pad(cols, ((0, 0), (0, 0), (0, 0), (0, K - 9 * ci)))
    return cols.astype(jnp.bfloat16)


def conv_ex_forward(x1, x2, params):
    """Forward of Conv_ex. x1/x2: NCHW. Returns (conv_1_1m, conv_2_1m) NCHW.

    params[branch] is a list of 4 layer dicts with keys
    w (3,3,Cin,Cout) HWIO, b, gamma, beta, mean, var.
    x2 is accepted but unused - exactly matching the PyTorch forward().
    """
    del x2  # unused by the original forward (both branches consume x1)
    N, cin, H, W = x1.shape
    assert H % 4 == 0 and W % 16 == 0, "H must be /4, W must be /16"
    co_final = params[0][3]["w"].shape[-1]                      # 2 * out_dim
    assert 2 * co_final <= CP, "combined branch channels must fit in 128 lanes"

    # fold BN and combine the two branches into the channel (lane) axis
    combined = []
    for layer in range(4):
        w0, b0 = _fold_bn(params[0][layer])
        w1, b1 = _fold_bn(params[1][layer])
        kh, kw, ci, co = w0.shape
        if layer == 0:
            w = jnp.concatenate([w0, w1], axis=3)               # shared input
        else:
            w = jnp.zeros((kh, kw, 2 * ci, 2 * co), jnp.float32)
            w = w.at[:, :, :ci, :co].set(w0).at[:, :, ci:, co:].set(w1)
        combined.append((w, jnp.concatenate([b0, b1], axis=0)))

    # pack weights (tap-packed K) + stack biases
    w1p = _pack_weight_l1(combined[0][0])
    c_packs = tuple(_next_pow2(combined[l][0].shape[2]) for l in (1, 2, 3))
    assert all(CP % c <= 0 or CP % c == 0 for c in c_packs)
    w2p = _pack_weight(combined[1][0], c_packs[0])
    w3p = _pack_weight(combined[2][0], c_packs[1])
    w4p = _pack_weight(combined[3][0], c_packs[2])
    bias = jnp.stack([_pad_bias(combined[l][1]) for l in range(4)])  # (4,1,CP)

    # layer-1 im2col built once in the wrapper (shared by both branches)
    x_nhwc = jnp.transpose(x1, (0, 2, 3, 1)).astype(jnp.float32)
    cols1 = _im2col_l1(x_nhwc, w1p.shape[0])                    # (N,H,W,K1) bf16

    Hq, Wq = H // 4, W // 4
    kernel = functools.partial(_conv_ex_kernel, c_packs=c_packs)

    out = pl.pallas_call(
        kernel,
        out_shape=jax.ShapeDtypeStruct((N, Hq * Wq, CP), jnp.float32),
        grid_spec=pltpu.PrefetchScalarGridSpec(
            num_scalar_prefetch=0,
            grid=(N,),                                          # >=2 parallel steps
            in_specs=[
                pl.BlockSpec((1, H, W, w1p.shape[0]), lambda n: (n, 0, 0, 0)),
                pl.BlockSpec(w1p.shape, lambda n: (0, 0)),
                pl.BlockSpec(w2p.shape, lambda n: (0, 0)),
                pl.BlockSpec(w3p.shape, lambda n: (0, 0)),
                pl.BlockSpec(w4p.shape, lambda n: (0, 0)),
                pl.BlockSpec(bias.shape, lambda n: (0, 0, 0)),
            ],
            out_specs=pl.BlockSpec((1, Hq * Wq, CP), lambda n: (n, 0, 0)),
            scratch_shapes=[pltpu.VMEM((H // 2 * W, CP), jnp.float32)],
        ),
        compiler_params=pltpu.CompilerParams(
            dimension_semantics=("parallel",)),
    )(cols1, w1p, w2p, w3p, w4p, bias)

    # (N, Hq*Wq, CP) -> two NCHW tensors with the true per-branch channel count
    out = out.reshape(N, Hq, Wq, CP)
    out1 = jnp.transpose(out[..., :co_final], (0, 3, 1, 2))
    out2 = jnp.transpose(out[..., co_final:2 * co_final], (0, 3, 1, 2))
    return out1, out2


# --------------------------------------------------------------------------- #
# plain-JAX reference matching the PyTorch module (inference-mode BN)
# --------------------------------------------------------------------------- #
def _reference_branch(x_nhwc, layers):
    y = x_nhwc
    for i, p in enumerate(layers):
        dn = lax.conv_dimension_numbers(y.shape, p["w"].shape,
                                        ('NHWC', 'HWIO', 'NHWC'))
        y = lax.conv_general_dilated(y, p["w"], (1, 1), 'SAME',
                                     dimension_numbers=dn,
                                     precision=lax.Precision.HIGHEST) + p["b"]
        y = (y - p["mean"]) / jnp.sqrt(p["var"] + BN_EPS) * p["gamma"] + p["beta"]
        y = jnp.where(y >= 0.0, y, NEG_SLOPE * y)
        if i in (1, 3):
            y = lax.reduce_window(y, -jnp.inf, lax.max,
                                  (1, 2, 2, 1), (1, 2, 2, 1), 'VALID')
    return y


def reference(x1, x2, params):
    del x2
    x = jnp.transpose(x1, (0, 2, 3, 1)).astype(jnp.float32)
    outs = []
    for br in range(2):
        y = _reference_branch(x, params[br])
        outs.append(jnp.transpose(y, (0, 3, 1, 2)))
    return outs[0], outs[1]


# --------------------------------------------------------------------------- #
if __name__ == "__main__":
    N, IN_DIM, OUT_DIM, H, W = 2, 1, 16, 16, 16

    def make_layer(key, cin, cout):
        kw_, kb_, kg_, kbt_, km_, kv_ = jax.random.split(key, 6)
        return {
            "w": 0.2 * jax.random.normal(kw_, (3, 3, cin, cout), jnp.float32),
            "b": 0.1 * jax.random.normal(kb_, (cout,), jnp.float32),
            "gamma": 1.0 + 0.1 * jax.random.normal(kg_, (cout,), jnp.float32),
            "beta": 0.1 * jax.random.normal(kbt_, (cout,), jnp.float32),
            "mean": 0.1 * jax.random.normal(km_, (cout,), jnp.float32),
            "var": jax.random.uniform(kv_, (cout,), jnp.float32, 0.5, 1.5),
        }

    key = jax.random.PRNGKey(0)
    dims = [(IN_DIM, OUT_DIM), (OUT_DIM, OUT_DIM),
            (OUT_DIM, 2 * OUT_DIM), (2 * OUT_DIM, 2 * OUT_DIM)]
    params = []
    for _ in range(2):
        layers = []
        for (ci, co) in dims:
            key, sub = jax.random.split(key)
            layers.append(make_layer(sub, ci, co))
        params.append(layers)

    key, kx = jax.random.split(key)
    x1 = jax.random.normal(kx, (N, IN_DIM, H, W), dtype=jnp.float32)
    x2 = jax.random.normal(jax.random.PRNGKey(1), (N, IN_DIM, H, W),
                           dtype=jnp.float32)

    out1, out2 = conv_ex_forward(x1, x2, params)
    out1 = jax.block_until_ready(out1)
    out2 = jax.block_until_ready(out2)

    ref1, ref2 = reference(x1, x2, params)
    assert out1.shape == (N, 2 * OUT_DIM, H // 4, W // 4)
    assert out2.shape == (N, 2 * OUT_DIM, H // 4, W // 4)

    def rel_err(a, b):
        return float(jnp.max(jnp.abs(a - b))) / (float(jnp.max(jnp.abs(b))) + 1e-6)

    e1, e2 = rel_err(out1, ref1), rel_err(out2, ref2)
    # bf16 matmul operands -> relative-to-max tolerance (accumulation is f32)
    assert e1 < 5e-2, f"branch1 relative max error {e1}"
    assert e2 < 5e-2, f"branch2 relative max error {e2}"

    print("KERNEL_OK")
</pallas_src>

<mosaic_0001>
module attributes {stable_mosaic.version = 11 : i64} {
  func.func @_conv_ex_kernel(%arg0: i32, %arg1: memref<1x16x16x128xbf16, #tpu.memory_space<vmem>>, %arg2: memref<128x128xbf16, #tpu.memory_space<vmem>>, %arg3: memref<384x128xbf16, #tpu.memory_space<vmem>>, %arg4: memref<384x128xbf16, #tpu.memory_space<vmem>>, %arg5: memref<640x128xbf16, #tpu.memory_space<vmem>>, %arg6: memref<4x1x128xf32, #tpu.memory_space<vmem>>, %arg7: memref<1x16x128xf32, #tpu.memory_space<vmem>>, %arg8: memref<128x128xf32, #tpu.memory_space<vmem>>) attributes {dimension_semantics = [#tpu.dimension_semantics<parallel>], iteration_bounds = array<i64: 2>, scalar_prefetch = 0 : i64, scratch_operands = 1 : i64, tpu.core_type = #tpu.core_type<tc>, window_params = [{transform_indices = @transform_0, window_bounds = array<i64: 1, 16, 16, 128>}, {pipeline_mode = #tpu.pipeline_mode<synchronous>, transform_indices = @transform_1, window_bounds = array<i64: 128, 128>}, {pipeline_mode = #tpu.pipeline_mode<synchronous>, transform_indices = @transform_2, window_bounds = array<i64: 384, 128>}, {pipeline_mode = #tpu.pipeline_mode<synchronous>, transform_indices = @transform_3, window_bounds = array<i64: 384, 128>}, {pipeline_mode = #tpu.pipeline_mode<synchronous>, transform_indices = @transform_4, window_bounds = array<i64: 640, 128>}, {pipeline_mode = #tpu.pipeline_mode<synchronous>, transform_indices = @transform_5, window_bounds = array<i64: 4, 1, 128>}, {transform_indices = @transform_6, window_bounds = array<i64: 1, 16, 128>}]} {
    %c0 = arith.constant 0 : index
    %c0_0 = arith.constant 0 : index
    %c0_1 = arith.constant 0 : index
    %c0_2 = arith.constant 0 : index
    %0 = vector.load %arg1[%c0, %c0_0, %c0_1, %c0_2] : memref<1x16x16x128xbf16, #tpu.memory_space<vmem>>, vector<1x16x16x128xbf16>
    %1 = vector.shape_cast %0 : vector<1x16x16x128xbf16> to vector<16x16x128xbf16>
    %2 = vector.shape_cast %1 : vector<16x16x128xbf16> to vector<256x128xbf16>
    %c0_3 = arith.constant 0 : index
    %c0_4 = arith.constant 0 : index
    %3 = vector.load %arg2[%c0_3, %c0_4] : memref<128x128xbf16, #tpu.memory_space<vmem>>, vector<128x128xbf16>
    %c0_5 = arith.constant 0 : index
    %c0_6 = arith.constant 0 : index
    %c0_7 = arith.constant 0 : index
    %4 = vector.load %arg6[%c0_5, %c0_6, %c0_7] : memref<4x1x128xf32, #tpu.memory_space<vmem>>, vector<1x1x128xf32>
    %5 = vector.shape_cast %4 : vector<1x1x128xf32> to vector<1x128xf32>
    %cst = arith.constant dense<0.000000e+00> : vector<256x128xf32>
    %6 = tpu.matmul %2, %3, %cst {dimension_numbers = #tpu.dot_dimension_numbers<[1], [0], [0], [1], [0, 0, 1, 1], [], []>} : vector<256x128xbf16>, vector<128x128xbf16>, vector<256x128xf32> -> vector<256x128xf32>
    %7 = vector.broadcast %5 : vector<1x128xf32> to vector<256x128xf32>
    %8 = arith.addf %6, %7 : vector<256x128xf32>
    %cst_8 = arith.constant 2.000000e-01 : f32
    %9 = vector.broadcast %cst_8 : f32 to vector<256x128xf32>
    %10 = arith.mulf %9, %8 : vector<256x128xf32>
    %11 = arith.maximumf %8, %10 : vector<256x128xf32>
    %12 = vector.shape_cast %11 : vector<256x128xf32> to vector<16x16x128xf32>
    %c0_9 = arith.constant 0 : index
    %c0_10 = arith.constant 0 : index
    %13 = vector.load %arg3[%c0_9, %c0_10] : memref<384x128xbf16, #tpu.memory_space<vmem>>, vector<384x128xbf16>
    %c1 = arith.constant 1 : index
    %c0_11 = arith.constant 0 : index
    %c0_12 = arith.constant 0 : index
    %14 = vector.load %arg6[%c1, %c0_11, %c0_12] : memref<4x1x128xf32, #tpu.memory_space<vmem>>, vector<1x1x128xf32>
    %15 = vector.shape_cast %14 : vector<1x1x128xf32> to vector<1x128xf32>
    %cst_13 = arith.constant 0.000000e+00 : f32
    %16 = vector.broadcast %cst_13 : f32 to vector<1x16x128xf32>
    %cst_14 = arith.constant 0.000000e+00 : f32
    %17 = vector.broadcast %cst_14 : f32 to vector<18x1x128xf32>
    %18 = tpu.concatenate %16, %12, %16 in 0 : vector<1x16x128xf32>, vector<16x16x128xf32>, vector<1x16x128xf32> -> vector<18x16x128xf32>
    %19 = tpu.concatenate %17, %18, %17 in 1 : vector<18x1x128xf32>, vector<18x16x128xf32>, vector<18x1x128xf32> -> vector<18x18x128xf32>
    %20 = vector.extract_strided_slice %19 {offsets = [0, 0, 0], sizes = [16, 16, 128], strides = [1, 1, 1]} : vector<18x18x128xf32> to vector<16x16x128xf32>
    %21 = vector.shape_cast %20 : vector<16x16x128xf32> to vector<256x128xf32>
    %22 = vector.extract_strided_slice %19 {offsets = [0, 1, 0], sizes = [16, 16, 128], strides = [1, 1, 1]} : vector<18x18x128xf32> to vector<16x16x128xf32>
    %23 = vector.shape_cast %22 : vector<16x16x128xf32> to vector<256x128xf32>
    %c32_i32 = arith.constant 32 : i32
    %24 = tpu.dynamic_rotate %23 by %c32_i32 dim 1 : vector<256x128xf32>, i32 -> vector<256x128xf32>
    %25 = arith.addf %21, %24 : vector<256x128xf32>
    %26 = vector.extract_strided_slice %19 {offsets = [0, 2, 0], sizes = [16, 16, 128], strides = [1, 1, 1]} : vector<18x18x128xf32> to vector<16x16x128xf32>
    %27 = vector.shape_cast %26 : vector<16x16x128xf32> to vector<256x128xf32>
    %c64_i32 = arith.constant 64 : i32
    %28 = tpu.dynamic_rotate %27 by %c64_i32 dim 1 : vector<256x128xf32>, i32 -> vector<256x128xf32>
    %29 = arith.addf %25, %28 : vector<256x128xf32>
    %30 = vector.extract_strided_slice %19 {offsets = [1, 0, 0], sizes = [16, 16, 128], strides = [1, 1, 1]} : vector<18x18x128xf32> to vector<16x16x128xf32>
    %31 = vector.shape_cast %30 : vector<16x16x128xf32> to vector<256x128xf32>
    %c96_i32 = arith.constant 96 : i32
    %32 = tpu.dynamic_rotate %31 by %c96_i32 dim 1 : vector<256x128xf32>, i32 -> vector<256x128xf32>
    %33 = arith.addf %29, %32 : vector<256x128xf32>
    %34 = vector.extract_strided_slice %19 {offsets = [1, 1, 0], sizes = [16, 16, 128], strides = [1, 1, 1]} : vector<18x18x128xf32> to vector<16x16x128xf32>
    %35 = vector.shape_cast %34 : vector<16x16x128xf32> to vector<256x128xf32>
    %36 = vector.extract_strided_slice %19 {offsets = [1, 2, 0], sizes = [16, 16, 128], strides = [1, 1, 1]} : vector<18x18x128xf32> to vector<16x16x128xf32>
    %37 = vector.shape_cast %36 : vector<16x16x128xf32> to vector<256x128xf32>
    %c32_i32_15 = arith.constant 32 : i32
    %38 = tpu.dynamic_rotate %37 by %c32_i32_15 dim 1 : vector<256x128xf32>, i32 -> vector<256x128xf32>
    %39 = arith.addf %35, %38 : vector<256x128xf32>
    %40 = vector.extract_strided_slice %19 {offsets = [2, 0, 0], sizes = [16, 16, 128], strides = [1, 1, 1]} : vector<18x18x128xf32> to vector<16x16x128xf32>
    %41 = vector.shape_cast %40 : vector<16x16x128xf32> to vector<256x128xf32>
    %c64_i32_16 = arith.constant 64 : i32
    %42 = tpu.dynamic_rotate %41 by %c64_i32_16 dim 1 : vector<256x128xf32>, i32 -> vector<256x128xf32>
    %43 = arith.addf %39, %42 : vector<256x128xf32>
    %44 = vector.extract_strided_slice %19 {offsets = [2, 1, 0], sizes = [16, 16, 128], strides = [1, 1, 1]} : vector<18x18x128xf32> to vector<16x16x128xf32>
    %45 = vector.shape_cast %44 : vector<16x16x128xf32> to vector<256x128xf32>
    %c96_i32_17 = arith.constant 96 : i32
    %46 = tpu.dynamic_rotate %45 by %c96_i32_17 dim 1 : vector<256x128xf32>, i32 -> vector<256x128xf32>
    %47 = arith.addf %43, %46 : vector<256x128xf32>
    %48 = vector.extract_strided_slice %19 {offsets = [2, 2, 0], sizes = [16, 16, 128], strides = [1, 1, 1]} : vector<18x18x128xf32> to vector<16x16x128xf32>
    %49 = vector.shape_cast %48 : vector<16x16x128xf32> to vector<256x128xf32>
    %50 = tpu.concatenate %33, %47, %49 in 1 : vector<256x128xf32>, vector<256x128xf32>, vector<256x128xf32> -> vector<256x384xf32>
    %51 = arith.truncf %50 : vector<256x384xf32> to vector<256x384xbf16>
    %cst_18 = arith.constant dense<0.000000e+00> : vector<256x128xf32>
    %52 = tpu.matmul %51, %13, %cst_18 {dimension_numbers = #tpu.dot_dimension_numbers<[1], [0], [0], [1], [0, 0, 1, 1], [], []>} : vector<256x384xbf16>, vector<384x128xbf16>, vector<256x128xf32> -> vector<256x128xf32>
    %53 = vector.broadcast %15 : vector<1x128xf32> to vector<256x128xf32>
    %54 = arith.addf %52, %53 : vector<256x128xf32>
    %cst_19 = arith.constant 2.000000e-01 : f32
    %55 = vector.broadcast %cst_19 : f32 to vector<256x128xf32>
    %56 = arith.mulf %55, %54 : vector<256x128xf32>
    %57 = arith.maximumf %54, %56 : vector<256x128xf32>
    %58 = vector.shape_cast %57 : vector<256x128xf32> to vector<16x16x128xf32>
    %59 = vector.shape_cast %58 : vector<16x16x128xf32> to vector<8x2x16x128xf32>
    %60 = vector.extract_strided_slice %59 {offsets = [0, 0, 0, 0], sizes = [8, 1, 16, 128], strides = [1, 1, 1, 1]} : vector<8x2x16x128xf32> to vector<8x1x16x128xf32>
    %61 = vector.shape_cast %60 : vector<8x1x16x128xf32> to vector<8x16x128xf32>
    %62 = vector.extract_strided_slice %59 {offsets = [0, 1, 0, 0], sizes = [8, 1, 16, 128], strides = [1, 1, 1, 1]} : vector<8x2x16x128xf32> to vector<8x1x16x128xf32>
    %63 = vector.shape_cast %62 : vector<8x1x16x128xf32> to vector<8x16x128xf32>
    %64 = arith.maximumf %61, %63 : vector<8x16x128xf32>
    %65 = vector.shape_cast %64 : vector<8x16x128xf32> to vector<128x128xf32>
    %c0_20 = arith.constant 0 : index
    %c0_21 = arith.constant 0 : index
    %66 = vector.load %arg8[%c0_20, %c0_21] : memref<128x128xf32, #tpu.memory_space<vmem>>, vector<128x128xf32>
    tpu.vector_store %arg8[%c0_20, %c0_21], %65 {strides = array<i32>} : memref<128x128xf32, #tpu.memory_space<vmem>>, vector<128x128xf32>,
    %c0_22 = arith.constant 0 : index
    %c0_23 = arith.constant 0 : index
    %67 = tpu.strided_load %arg8[%c0_22, %c0_23] {strides = array<i32: 2, 1>} : memref<128x128xf32, #tpu.memory_space<vmem>>, vector<64x128xf32>
    %c1_24 = arith.constant 1 : index
    %c0_25 = arith.constant 0 : index
    %68 = tpu.strided_load %arg8[%c1_24, %c0_25] {strides = array<i32: 2, 1>} : memref<128x128xf32, #tpu.memory_space<vmem>>, vector<64x128xf32>
    %69 = arith.maximumf %67, %68 : vector<64x128xf32>
    %70 = vector.shape_cast %69 : vector<64x128xf32> to vector<8x8x128xf32>
    %c0_26 = arith.constant 0 : index
    %c0_27 = arith.constant 0 : index
    %71 = vector.load %arg4[%c0_26, %c0_27] : memref<384x128xbf16, #tpu.memory_space<vmem>>, vector<384x128xbf16>
    %c2 = arith.constant 2 : index
    %c0_28 = arith.constant 0 : index
    %c0_29 = arith.constant 0 : index
    %72 = vector.load %arg6[%c2, %c0_28, %c0_29] : memref<4x1x128xf32, #tpu.memory_space<vmem>>, vector<1x1x128xf32>
    %73 = vector.shape_cast %72 : vector<1x1x128xf32> to vector<1x128xf32>
    %cst_30 = arith.constant 0.000000e+00 : f32
    %74 = vector.broadcast %cst_30 : f32 to vector<1x8x128xf32>
    %cst_31 = arith.constant 0.000000e+00 : f32
    %75 = vector.broadcast %cst_31 : f32 to vector<10x1x128xf32>
    %76 = tpu.concatenate %74, %70, %74 in 0 : vector<1x8x128xf32>, vector<8x8x128xf32>, vector<1x8x128xf32> -> vector<10x8x128xf32>
    %77 = tpu.concatenate %75, %76, %75 in 1 : vector<10x1x128xf32>, vector<10x8x128xf32>, vector<10x1x128xf32> -> vector<10x10x128xf32>
    %78 = vector.extract_strided_slice %77 {offsets = [0, 0, 0], sizes = [8, 8, 128], strides = [1, 1, 1]} : vector<10x10x128xf32> to vector<8x8x128xf32>
    %79 = vector.shape_cast %78 : vector<8x8x128xf32> to vector<64x128xf32>
    %80 = vector.extract_strided_slice %77 {offsets = [0, 1, 0], sizes = [8, 8, 128], strides = [1, 1, 1]} : vector<10x10x128xf32> to vector<8x8x128xf32>
    %81 = vector.shape_cast %80 : vector<8x8x128xf32> to vector<64x128xf32>
    %c32_i32_32 = arith.constant 32 : i32
    %82 = tpu.dynamic_rotate %81 by %c32_i32_32 dim 1 : vector<64x128xf32>, i32 -> vector<64x128xf32>
    %83 = arith.addf %79, %82 : vector<64x128xf32>
    %84 = vector.extract_strided_slice %77 {offsets = [0, 2, 0], sizes = [8, 8, 128], strides = [1, 1, 1]} : vector<10x10x128xf32> to vector<8x8x128xf32>
    %85 = vector.shape_cast %84 : vector<8x8x128xf32> to vector<64x128xf32>
    %c64_i32_33 = arith.constant 64 : i32
    %86 = tpu.dynamic_rotate %85 by %c64_i32_33 dim 1 : vector<64x128xf32>, i32 -> vector<64x128xf32>
    %87 = arith.addf %83, %86 : vector<64x128xf32>
    %88 = vector.extract_strided_slice %77 {offsets = [1, 0, 0], sizes = [8, 8, 128], strides = [1, 1, 1]} : vector<10x10x128xf32> to vector<8x8x128xf32>
    %89 = vector.shape_cast %88 : vector<8x8x128xf32> to vector<64x128xf32>
    %c96_i32_34 = arith.constant 96 : i32
    %90 = tpu.dynamic_rotate %89 by %c96_i32_34 dim 1 : vector<64x128xf32>, i32 -> vector<64x128xf32>
    %91 = arith.addf %87, %90 : vector<64x128xf32>
    %92 = vector.extract_strided_slice %77 {offsets = [1, 1, 0], sizes = [8, 8, 128], strides = [1, 1, 1]} : vector<10x10x128xf32> to vector<8x8x128xf32>
    %93 = vector.shape_cast %92 : vector<8x8x128xf32> to vector<64x128xf32>
    %94 = vector.extract_strided_slice %77 {offsets = [1, 2, 0], sizes = [8, 8, 128], strides = [1, 1, 1]} : vector<10x10x128xf32> to vector<8x8x128xf32>
    %95 = vector.shape_cast %94 : vector<8x8x128xf32> to vector<64x128xf32>
    %c32_i32_35 = arith.constant 32 : i32
    %96 = tpu.dynamic_rotate %95 by %c32_i32_35 dim 1 : vector<64x128xf32>, i32 -> vector<64x128xf32>
    %97 = arith.addf %93, %96 : vector<64x128xf32>
    %98 = vector.extract_strided_slice %77 {offsets = [2, 0, 0], sizes = [8, 8, 128], strides = [1, 1, 1]} : vector<10x10x128xf32> to vector<8x8x128xf32>
    %99 = vector.shape_cast %98 : vector<8x8x128xf32> to vector<64x128xf32>
    %c64_i32_36 = arith.constant 64 : i32
    %100 = tpu.dynamic_rotate %99 by %c64_i32_36 dim 1 : vector<64x128xf32>, i32 -> vector<64x128xf32>
    %101 = arith.addf %97, %100 : vector<64x128xf32>
    %102 = vector.extract_strided_slice %77 {offsets = [2, 1, 0], sizes = [8, 8, 128], strides = [1, 1, 1]} : vector<10x10x128xf32> to vector<8x8x128xf32>
    %103 = vector.shape_cast %102 : vector<8x8x128xf32> to vector<64x128xf32>
    %c96_i32_37 = arith.constant 96 : i32
    %104 = tpu.dynamic_rotate %103 by %c96_i32_37 dim 1 : vector<64x128xf32>, i32 -> vector<64x128xf32>
    %105 = arith.addf %101, %104 : vector<64x128xf32>
    %106 = vector.extract_strided_slice %77 {offsets = [2, 2, 0], sizes = [8, 8, 128], strides = [1, 1, 1]} : vector<10x10x128xf32> to vector<8x8x128xf32>
    %107 = vector.shape_cast %106 : vector<8x8x128xf32> to vector<64x128xf32>
    %108 = tpu.concatenate %91, %105, %107 in 1 : vector<64x128xf32>, vector<64x128xf32>, vector<64x128xf32> -> vector<64x384xf32>
    %109 = arith.truncf %108 : vector<64x384xf32> to vector<64x384xbf16>
    %cst_38 = arith.constant dense<0.000000e+00> : vector<64x128xf32>
    %110 = tpu.matmul %109, %71, %cst_38 {dimension_numbers = #tpu.dot_dimension_numbers<[1], [0], [0], [1], [0, 0, 1, 1], [], []>} : vector<64x384xbf16>, vector<384x128xbf16>, vector<64x128xf32> -> vector<64x128xf32>
    %111 = vector.broadcast %73 : vector<1x128xf32> to vector<64x128xf32>
    %112 = arith.addf %110, %111 : vector<64x128xf32>
    %cst_39 = arith.constant 2.000000e-01 : f32
    %113 = vector.broadcast %cst_39 : f32 to vector<64x128xf32>
    %114 = arith.mulf %113, %112 : vector<64x128xf32>
    %115 = arith.maximumf %112, %114 : vector<64x128xf32>
    %116 = vector.shape_cast %115 : vector<64x128xf32> to vector<8x8x128xf32>
    %c0_40 = arith.constant 0 : index
    %c0_41 = arith.constant 0 : index
    %117 = vector.load %arg5[%c0_40, %c0_41] : memref<640x128xbf16, #tpu.memory_space<vmem>>, vector<640x128xbf16>
    %c3 = arith.constant 3 : index
    %c0_42 = arith.constant 0 : index
    %c0_43 = arith.constant 0 : index
    %118 = vector.load %arg6[%c3, %c0_42, %c0_43] : memref<4x1x128xf32, #tpu.memory_space<vmem>>, vector<1x1x128xf32>
    %119 = vector.shape_cast %118 : vector<1x1x128xf32> to vector<1x128xf32>
    %cst_44 = arith.constant 0.000000e+00 : f32
    %120 = vector.broadcast %cst_44 : f32 to vector<1x8x128xf32>
    %cst_45 = arith.constant 0.000000e+00 : f32
    %121 = vector.broadcast %cst_45 : f32 to vector<10x1x128xf32>
    %122 = tpu.concatenate %120, %116, %120 in 0 : vector<1x8x128xf32>, vector<8x8x128xf32>, vector<1x8x128xf32> -> vector<10x8x128xf32>
    %123 = tpu.concatenate %121, %122, %121 in 1 : vector<10x1x128xf32>, vector<10x8x128xf32>, vector<10x1x128xf32> -> vector<10x10x128xf32>
    %124 = vector.extract_strided_slice %123 {offsets = [0, 0, 0], sizes = [8, 8, 128], strides = [1, 1, 1]} : vector<10x10x128xf32> to vector<8x8x128xf32>
    %125 = vector.shape_cast %124 : vector<8x8x128xf32> to vector<64x128xf32>
    %126 = vector.extract_strided_slice %123 {offsets = [0, 1, 0], sizes = [8, 8, 128], strides = [1, 1, 1]} : vector<10x10x128xf32> to vector<8x8x128xf32>
    %127 = vector.shape_cast %126 : vector<8x8x128xf32> to vector<64x128xf32>
    %c64_i32_46 = arith.constant 64 : i32
    %128 = tpu.dynamic_rotate %127 by %c64_i32_46 dim 1 : vector<64x128xf32>, i32 -> vector<64x128xf32>
    %129 = arith.addf %125, %128 : vector<64x128xf32>
    %130 = vector.extract_strided_slice %123 {offsets = [0, 2, 0], sizes = [8, 8, 128], strides = [1, 1, 1]} : vector<10x10x128xf32> to vector<8x8x128xf32>
    %131 = vector.shape_cast %130 : vector<8x8x128xf32> to vector<64x128xf32>
    %132 = vector.extract_strided_slice %123 {offsets = [1, 0, 0], sizes = [8, 8, 128], strides = [1, 1, 1]} : vector<10x10x128xf32> to vector<8x8x128xf32>
    %133 = vector.shape_cast %132 : vector<8x8x128xf32> to vector<64x128xf32>
    %c64_i32_47 = arith.constant 64 : i32
    %134 = tpu.dynamic_rotate %133 by %c64_i32_47 dim 1 : vector<64x128xf32>, i32 -> vector<64x128xf32>
    %135 = arith.addf %131, %134 : vector<64x128xf32>
    %136 = vector.extract_strided_slice %123 {offsets = [1, 1, 0], sizes = [8, 8, 128], strides = [1, 1, 1]} : vector<10x10x128xf32> to vector<8x8x128xf32>
    %137 = vector.shape_cast %136 : vector<8x8x128xf32> to vector<64x128xf32>
    %138 = vector.extract_strided_slice %123 {offsets = [1, 2, 0], sizes = [8, 8, 128], strides = [1, 1, 1]} : vector<10x10x128xf32> to vector<8x8x128xf32>
    %139 = vector.shape_cast %138 : vector<8x8x128xf32> to vector<64x128xf32>
    %c64_i32_48 = arith.constant 64 : i32
    %140 = tpu.dynamic_rotate %139 by %c64_i32_48 dim 1 : vector<64x128xf32>, i32 -> vector<64x128xf32>
    %141 = arith.addf %137, %140 : vector<64x128xf32>
    %142 = vector.extract_strided_slice %123 {offsets = [2, 0, 0], sizes = [8, 8, 128], strides = [1, 1, 1]} : vector<10x10x128xf32> to vector<8x8x128xf32>
    %143 = vector.shape_cast %142 : vector<8x8x128xf32> to vector<64x128xf32>
    %144 = vector.extract_strided_slice %123 {offsets = [2, 1, 0], sizes = [8, 8, 128], strides = [1, 1, 1]} : vector<10x10x128xf32> to vector<8x8x128xf32>
    %145 = vector.shape_cast %144 : vector<8x8x128xf32> to vector<64x128xf32>
    %c64_i32_49 = arith.constant 64 : i32
    %146 = tpu.dynamic_rotate %145 by %c64_i32_49 dim 1 : vector<64x128xf32>, i32 -> vector<64x128xf32>
    %147 = arith.addf %143, %146 : vector<64x128xf32>
    %148 = vector.extract_strided_slice %123 {offsets = [2, 2, 0], sizes = [8, 8, 128], strides = [1, 1, 1]} : vector<10x10x128xf32> to vector<8x8x128xf32>
    %149 = vector.shape_cast %148 : vector<8x8x128xf32> to vector<64x128xf32>
    %150 = tpu.concatenate %129, %135, %141, %147, %149 in 1 : vector<64x128xf32>, vector<64x128xf32>, vector<64x128xf32>, vector<64x128xf32>, vector<64x128xf32> -> vector<64x640xf32>
    %151 = arith.truncf %150 : vector<64x640xf32> to vector<64x640xbf16>
    %cst_50 = arith.constant dense<0.000000e+00> : vector<64x128xf32>
    %152 = tpu.matmul %151, %117, %cst_50 {dimension_numbers = #tpu.dot_dimension_numbers<[1], [0], [0], [1], [0, 0, 1, 1], [], []>} : vector<64x640xbf16>, vector<640x128xbf16>, vector<64x128xf32> -> vector<64x128xf32>
    %153 = vector.broadcast %119 : vector<1x128xf32> to vector<64x128xf32>
    %154 = arith.addf %152, %153 : vector<64x128xf32>
    %cst_51 = arith.constant 2.000000e-01 : f32
    %155 = vector.broadcast %cst_51 : f32 to vector<64x128xf32>
    %156 = arith.mulf %155, %154 : vector<64x128xf32>
    %157 = arith.maximumf %154, %156 : vector<64x128xf32>
    %158 = vector.shape_cast %157 : vector<64x128xf32> to vector<8x8x128xf32>
    %159 = vector.shape_cast %158 : vector<8x8x128xf32> to vector<4x2x8x128xf32>
    %160 = vector.extract_strided_slice %159 {offsets = [0, 0, 0, 0], sizes = [4, 1, 8, 128], strides = [1, 1, 1, 1]} : vector<4x2x8x128xf32> to vector<4x1x8x128xf32>
    %161 = vector.shape_cast %160 : vector<4x1x8x128xf32> to vector<4x8x128xf32>
    %162 = vector.extract_strided_slice %159 {offsets = [0, 1, 0, 0], sizes = [4, 1, 8, 128], strides = [1, 1, 1, 1]} : vector<4x2x8x128xf32> to vector<4x1x8x128xf32>
    %163 = vector.shape_cast %162 : vector<4x1x8x128xf32> to vector<4x8x128xf32>
    %164 = arith.maximumf %161, %163 : vector<4x8x128xf32>
    %165 = vector.shape_cast %164 : vector<4x8x128xf32> to vector<32x128xf32>
    %c0_52 = arith.constant 0 : index
    %c0_53 = arith.constant 0 : index
    %166 = vector.load %arg8[%c0_52, %c0_53] : memref<128x128xf32, #tpu.memory_space<vmem>>, vector<32x128xf32>
    tpu.vector_store %arg8[%c0_52, %c0_53], %165 {strides = array<i32>} : memref<128x128xf32, #tpu.memory_space<vmem>>, vector<32x128xf32>,
    %c0_54 = arith.constant 0 : index
    %c0_55 = arith.constant 0 : index
    %167 = tpu.strided_load %arg8[%c0_54, %c0_55] {strides = array<i32: 2, 1>} : memref<128x128xf32, #tpu.memory_space<vmem>>, vector<16x128xf32>
    %c1_56 = arith.constant 1 : index
    %c0_57 = arith.constant 0 : index
    %168 = tpu.strided_load %arg8[%c1_56, %c0_57] {strides = array<i32: 2, 1>} : memref<128x128xf32, #tpu.memory_space<vmem>>, vector<16x128xf32>
    %169 = arith.maximumf %167, %168 : vector<16x128xf32>
    %c0_58 = arith.constant 0 : index
    %c0_59 = arith.constant 0 : index
    %c0_60 = arith.constant 0 : index
    %170 = vector.load %arg7[%c0_58, %c0_59, %c0_60] : memref<1x16x128xf32, #tpu.memory_space<vmem>>, vector<1x16x128xf32>
    %171 = vector.shape_cast %170 : vector<1x16x128xf32> to vector<16x128xf32>
    %172 = vector.shape_cast %169 : vector<16x128xf32> to vector<1x16x128xf32>
    tpu.vector_store %arg7[%c0_58, %c0_59, %c0_60], %172 {strides = array<i32>} : memref<1x16x128xf32, #tpu.memory_space<vmem>>, vector<1x16x128xf32>,
    return
  }
  func.func @transform_0(%arg0: i32) -> (i32, i32, i32, i32) {
    %c0_i32 = arith.constant 0 : i32
    %c0_i32_0 = arith.constant 0 : i32
    %c0_i32_1 = arith.constant 0 : i32
    %c0_i32_2 = arith.constant 0 : i32
    return %arg0, %c0_i32, %c0_i32_0, %c0_i32_1 : i32, i32, i32, i32
  }
  func.func @transform_1(%arg0: i32) -> (i32, i32) {
    %c0_i32 = arith.constant 0 : i32
    %c0_i32_0 = arith.constant 0 : i32
    %c0_i32_1 = arith.constant 0 : i32
    return %c0_i32, %c0_i32_0 : i32, i32
  }
  func.func @transform_2(%arg0: i32) -> (i32, i32) {
    %c0_i32 = arith.constant 0 : i32
    %c0_i32_0 = arith.constant 0 : i32
    %c0_i32_1 = arith.constant 0 : i32
    return %c0_i32, %c0_i32_0 : i32, i32
  }
  func.func @transform_3(%arg0: i32) -> (i32, i32) {
    %c0_i32 = arith.constant 0 : i32
    %c0_i32_0 = arith.constant 0 : i32
    %c0_i32_1 = arith.constant 0 : i32
    return %c0_i32, %c0_i32_0 : i32, i32
  }
  func.func @transform_4(%arg0: i32) -> (i32, i32) {
    %c0_i32 = arith.constant 0 : i32
    %c0_i32_0 = arith.constant 0 : i32
    %c0_i32_1 = arith.constant 0 : i32
    return %c0_i32, %c0_i32_0 : i32, i32
  }
  func.func @transform_5(%arg0: i32) -> (i32, i32, i32) {
    %c0_i32 = arith.constant 0 : i32
    %c0_i32_0 = arith.constant 0 : i32
    %c0_i32_1 = arith.constant 0 : i32
    %c0_i32_2 = arith.constant 0 : i32
    return %c0_i32, %c0_i32_0, %c0_i32_1 : i32, i32, i32
  }
  func.func @transform_6(%arg0: i32) -> (i32, i32, i32) {
    %c0_i32 = arith.constant 0 : i32
    %c0_i32_0 = arith.constant 0 : i32
    %c0_i32_1 = arith.constant 0 : i32
    return %arg0, %c0_i32, %c0_i32_0 : i32, i32, i32
  }
}

</mosaic_0001>

<bundles_post_ra>
// kernel: tpu_custom_call.1
= control target key start
LH: loop header
LB: loop body
LE: loop exit
PB: predicated region body
PF: predicated region fallthrough
CT: control target
= control target key end

     0   :  { %11 = vsyncpa [#allocation4], 0  ;;  %s7347_s0 = inlined_call_operand.hbm [shape: bf16[2,16,16,128], index: 0, kind: input, shape index: {}]   ;;  %s7348_s1 = inlined_call_operand.hbm [shape: bf16[128,128], index: 1, kind: input, shape index: {}]   ;;  %s7349_s2 = inlined_call_operand.hbm [shape: bf16[384,128], index: 2, kind: input, shape index: {}]   ;;  %s7350_s3 = inlined_call_operand.hbm [shape: bf16[384,128], index: 3, kind: input, shape index: {}]   ;;  %s7351_s4 = inlined_call_operand.hbm [shape: bf16[640,128], index: 4, kind: input, shape index: {}]   ;;  %s7352_s5 = inlined_call_operand.vmem [shape: f32[4,1,128], index: 5, kind: input, shape index: {}]   ;;  %s7353_s6 = inlined_call_operand.hbm [shape: f32[2,16,128], index: 6, kind: output, shape index: {}]  }
   0x1   :  { %13 = vsyncpa [#allocation4 + $0x1], 0 }
   0x2   :  { %14 = vsyncpa [#allocation7], 0 }
   0x3   :  { %15 = vsyncpa [#allocation10], 0 }
   0x4   :  { %16 = vsyncpa [#allocation5], 0 }
   0x5   :  { %18 = vsyncpa [#allocation5 + $0x1], 0  ;;  %s5102_s21 = smov 0   ;;  %s5104_s22 = smov 0  }
   0x6   :  { %s5106_s23 = smov 0   ;;  %s5108_s24 = smov 0  }
   0x7 LB: > { %s5123_s25 = sadd.s32 4294967295, %s5051_s24   ;;  %s3993_s26 = sadd.s32 4294967294, %s5051_s24   ;;  %s5051_s24 = sphi %s5108_s24, %s7635_s24   ;;  %s5047_s23 = sphi %s5106_s23, %s7634_s23   ;;  %s5043_s22 = sphi %s5104_s22, %s7633_s22   ;;  %s5039_s21 = sphi %s5102_s21, %s7632_s21  }
   0x8   : > { %p44_p0 = scmp.ne.s32.totalorder %s5043_s22, %s5039_s21  ;;  %p7354_p1 = scmp.eq.s32.totalorder %s5123_s25, 0 }
   0x9   : > { %p179_p3 = scmp.eq.s32.totalorder %s3993_s26, 1  ;;  %p3994_p5 = scmp.ge.s32.totalorder %s5051_s24, 1 }
   0xa   : > { %p5132_p4 = por %p7354_p1, %p44_p0  ;;  %p186_p7 = scmp.lt.s32.totalorder %s5051_s24, 3 }
   0xb   : > { %p5137_p6 = por %p179_p3, %p44_p0  ;;  %s5053_s30 = smov [#allocation6]  }
   0xc   : > { %s7438_s27 = scalar_select %p5132_p4, 1, 0 }
   0xd   : > { %s7439_s28 = scalar_select %p5137_p6, 1, 0 }
   0xe   : > { %p5142_p8 = pnand %p3994_p5, %p186_p7  ;;  %s198_s7 = sshll.u32 %s5053_s30, 4  ;;  %s5146_s7 = int_to_ptr.vmem [resolvable:$true] %s198_s7 }
   0xf   : > { %s5054_s9 = smov [#allocation9]   ;;  %s5055_s11 = smov [#allocation8]  }
  0x10   : > { %s7440_s29 = scalar_select %p5142_p8, 1, 0 }
  0x11   : > { %p4620_p9 = pneg %p5142_p8  ;;  %s224_s10 = sshll.u32 %s5054_s9, 4  ;;  %s5157_s10 = int_to_ptr.vmem [resolvable:$true] %s224_s10 }
  0x12   : > { %s5159_s12 = sshll.u32 %s5055_s11, 4  ;;  %s4835_s15 = scalar_lea.hbm %s7348_s1, 1024  ;;  %s212_s12 = int_to_ptr.vmem [resolvable:$true] %s5159_s12 }
  0x13   : > { %p5153_p11 = pnand %p4620_p9, %p7354_p1  ;;  %p4836_p12 = scmp.ne.s32.totalorder %s7348_s1, %s4835_s15 }
  0x14   : > { %p4842_p5 = scmp.lt.u32.totalorder %s4835_s15, %s7348_s1 }
  0x15   : > { %p5169_p13 = pneg %p5153_p11 }
  0x17   : > { %p4838_p0 = pnand %p5169_p13, %p4836_p12 }
  0x19   : > { %p4839_p3 = pneg %p4838_p0 }
  0x1b   : > { %p4844_p7 = pnand %p4842_p5, %p4839_p3 }
  0x1d   : > { %4847 = shalt.err (!%p4844_p7)
}
  0x1e   : > { %s4848_s26 = scalar_lea.vmem %s5146_s7, 1024  ;;  %p4856_p2 = scmp.lt.s32.totalorder %s5146_s7, %s5146_s7 }
  0x1f   : > { %p4849_p9 = scmp.ne.s32.totalorder %s5146_s7, %s4848_s26  ;;  %p4857_p6 = scmp.lt.s32.totalorder %s4848_s26, %s4848_s26 }
  0x21   : > { %p4851_p10 = pnand %p4849_p9, %p5169_p13  ;;  %p4858_p12 = por %p4857_p6, %p4856_p2 }
  0x23   : > { %p4852_p1 = pneg %p4851_p10 }
  0x25   : > { %p4859_p0 = pnand %p4858_p12, %p4852_p1 }
  0x27   : > { %4862 = shalt.err (!%p4859_p0)
}
  0x28   : > { %s5056_s30 = smov 64   ;;  %s5057_s9 = smov 4  }
  0x29   : > { %4623 = dma.hbm_to_vmem [thread:$0]  (!%p5153_p11), %s7348_s1, 1024, %s5146_s7, [#allocation7], %s5056_s30, %s5056_s30, %s5057_s9  }
  0x2a   : > { %s4863_s16 = scalar_lea.hbm %s7350_s3, 3072 }
  0x2b   : > { %p4864_p1 = scmp.ne.s32.totalorder %s7350_s3, %s4863_s16  ;;  %p4870_p10 = scmp.lt.u32.totalorder %s4863_s16, %s7350_s3 }
  0x2d   : > { %p4866_p2 = pnand %p4864_p1, %p5169_p13 }
  0x2f   : > { %p4867_p6 = pneg %p4866_p2 }
  0x31   : > { %p4872_p3 = pnand %p4870_p10, %p4867_p6 }
  0x33   : > { %4875 = shalt.err (!%p4872_p3)
}
  0x34   : > { %s4876_s7 = scalar_lea.vmem %s5157_s10, 3072  ;;  %p4884_p12 = scmp.lt.s32.totalorder %s5157_s10, %s5157_s10 }
  0x35   : > { %p4877_p5 = scmp.ne.s32.totalorder %s5157_s10, %s4876_s7  ;;  %p4885_p0 = scmp.lt.s32.totalorder %s4876_s7, %s4876_s7 }
  0x37   : > { %p4879_p7 = pnand %p4877_p5, %p5169_p13  ;;  %p4886_p1 = por %p4885_p0, %p4884_p12 }
  0x39   : > { %p4880_p9 = pneg %p4879_p7 }
  0x3b   : > { %p4887_p2 = pnand %p4886_p1, %p4880_p9 }
  0x3d   : > { %4890 = shalt.err (!%p4887_p2)
}
  0x3e   : > { %4629 = dma.hbm_to_vmem [thread:$0]  (!%p5153_p11), %s7350_s3, 3072, %s5157_s10, [#allocation10], %s5056_s30, %s5056_s30, %s5057_s9  }
  0x3f   : > { %s4891_s16 = scalar_lea.hbm %s7349_s2, 3072 }
  0x40   : > { %p4892_p6 = scmp.ne.s32.totalorder %s7349_s2, %s4891_s16  ;;  %p4898_p5 = scmp.lt.u32.totalorder %s4891_s16, %s7349_s2 }
  0x42   : > { %p4894_p10 = pnand %p4892_p6, %p5169_p13 }
  0x44   : > { %p4895_p3 = pneg %p4894_p10 }
  0x46   : > { %p4900_p7 = pnand %p4898_p5, %p4895_p3 }
  0x48   : > { %4903 = shalt.err (!%p4900_p7)
}
  0x49   : > { %s4904_s7 = scalar_lea.vmem %s212_s12, 3072  ;;  %p4912_p1 = scmp.lt.s32.totalorder %s212_s12, %s212_s12 }
  0x4a   : > { %p4905_p9 = scmp.ne.s32.totalorder %s212_s12, %s4904_s7  ;;  %p4913_p2 = scmp.lt.s32.totalorder %s4904_s7, %s4904_s7 }
  0x4c   : > { %p4907_p12 = pnand %p4905_p9, %p5169_p13  ;;  %p4914_p4 = por %p4913_p2, %p4912_p1 }
  0x4e   : > { %p4908_p0 = pneg %p4907_p12 }
  0x50   : > { %p4915_p8 = pnand %p4914_p4, %p4908_p0 }
  0x52   : > { %4918 = shalt.err (!%p4915_p8)
}
  0x53   : > { %4626 = dma.hbm_to_vmem [thread:$0]  (!%p5153_p11), %s7349_s2, 3072, %s212_s12, [#allocation7], %s5056_s30, %s5056_s30, %s5057_s9  }
  0x54   : > { %s5058_s13 = smov [#allocation11]   ;;  %s4919_s17 = scalar_lea.hbm %s7351_s4, 5120 }
  0x55   : > { %s237_s14 = sshll.u32 %s5058_s13, 4  ;;  %p4920_p4 = scmp.ne.s32.totalorder %s7351_s4, %s4919_s17  ;;  %s238_s14 = int_to_ptr.vmem [resolvable:$true] %s237_s14 }
  0x56   : > { %p4926_p10 = scmp.lt.u32.totalorder %s4919_s17, %s7351_s4 }
  0x57   : > { %p4922_p8 = pnand %p4920_p4, %p5169_p13 }
  0x59   : > { %p4923_p6 = pneg %p4922_p8 }
  0x5b   : > { %p4928_p3 = pnand %p4926_p10, %p4923_p6 }
  0x5d   : > { %4931 = shalt.err (!%p4928_p3)
}
  0x5e   : > { %s4932_s12 = scalar_lea.vmem %s238_s14, 5120  ;;  %p4940_p12 = scmp.lt.s32.totalorder %s238_s14, %s238_s14 }
  0x5f   : > { %p4933_p5 = scmp.ne.s32.totalorder %s238_s14, %s4932_s12  ;;  %p4941_p0 = scmp.lt.s32.totalorder %s4932_s12, %s4932_s12 }
  0x61   : > { %p4935_p7 = pnand %p4933_p5, %p5169_p13  ;;  %p4942_p1 = por %p4941_p0, %p4940_p12 }
  0x63   : > { %p4936_p9 = pneg %p4935_p7 }
  0x65   : > { %p4943_p2 = pnand %p4942_p1, %p4936_p9 }
  0x67   : > { %4946 = shalt.err (!%p4943_p2)
}
  0x68   : > { %4632 = dma.hbm_to_vmem [thread:$0]  (!%p5153_p11), %s7351_s4, 5120, %s238_s14, [#allocation10], %s5056_s30, %s5056_s30, %s5057_s9  }
  0x69   : > { %s5263_s18 = sadd.s32 1, %s5051_s24   ;;  %s31_s8 = sadd.s32 1, %s5047_s23 }
  0x6a   : > { %s28_s13 = ssub.s32 %s5051_s24, %s5263_s18  ;;  %p38_p13 = scmp.ne.s32.totalorder %s5047_s23, %s5043_s22 }
  0x6b   : > { %p29_p4 = scmp.eq.s32.totalorder %s28_s13, 0  ;;  %p39_p8 = scmp.eq.s32.totalorder %s5051_s24, 0 }
  0x6c   : > { %p7443_p6 = scmp.eq.s32.totalorder %s5123_s25, 1  ;;  %p4645_p3 = scmp.lt.s32.totalorder %s5051_s24, 2 }
  0x6d   : > { %s5279_s16 = scalar_select %p29_p4, %s5047_s23, %s31_s8  }
  0x6e   : > { %p5273_p10 = por %p7443_p6, %p38_p13  ;;  %p40_p5 = por %p39_p8, %p38_p13 }
  0x6f   : > { %s254_s17 = sand.u32 1, %s5047_s23   ;;  %s4134_s14 = sshll.u32 %s5051_s24, 11 }
  0x70   : > { %s4000_s19 = sshll.u32 %s254_s17, 7  ;;  %s5286_s7 = scalar_lea.hbm %s7347_s0, %s4134_s14 }
  0x71   : > { %s258_s12 = scalar_lea.vmem [#allocation3], %s4000_s19  ;;  %p5290_p11 = pnand %p4645_p3, %p40_p5 }
  0x72   : > { %s265_s10 = sshll.u32 %s258_s12, 4  ;;  %s5294_s8 = scalar_lea.sflag [#allocation4], %s254_s17  ;;  %s5288_s10 = int_to_ptr.vmem [resolvable:$true] %s265_s10 }
  0x73   : > { %s4947_s13 = scalar_lea.hbm %s5286_s7, 2048  ;;  %p4949_p9 = pneg %p5290_p11 }
  0x74   : > { %p4948_p7 = scmp.ne.s32.totalorder %s5286_s7, %s4947_s13  ;;  %s4952_s20 = scalar_lea.hbm %s7347_s0, 4096 }
  0x75   : > { %p4953_p1 = scmp.lt.u32.totalorder %s5286_s7, %s7347_s0  ;;  %p4954_p2 = scmp.lt.u32.totalorder %s4952_s20, %s4947_s13 }
  0x76   : > { %p4950_p12 = pnand %p4949_p9, %p4948_p7  ;;  %p4956_p4 = scmp.lt.u32.totalorder %s4947_s13, %s5286_s7 }
  0x77   : > { %p4955_p13 = por %p4954_p2, %p4953_p1 }
  0x78   : > { %p4951_p0 = pneg %p4950_p12 }
  0x79   : > { %p4957_p8 = por %p4956_p4, %p4955_p13 }
  0x7b   : > { %p4958_p6 = pnand %p4957_p8, %p4951_p0 }
  0x7d   : > { %4961 = shalt.err (!%p4958_p6)
}
  0x7e   : > { %s4962_s17 = scalar_lea.vmem %s5288_s10, 2048  ;;  %s5059_s19 = smov [#allocation3]  }
  0x7f   : > { %p4963_p3 = scmp.ne.s32.totalorder %s5288_s10, %s4962_s17  ;;  %s4967_s14 = sshll.u32 %s5059_s19, 4  ;;  %s4968_s14 = int_to_ptr.vmem [resolvable:$false] %s4967_s14 }
  0x80   : > { %s4969_s26 = scalar_lea.vmem %s4968_s14, 4096  ;;  %p4970_p12 = scmp.lt.s32.totalorder %s5288_s10, %s4968_s14 }
  0x81   : > { %p4965_p5 = pnand %p4963_p3, %p4949_p9  ;;  %p4971_p1 = scmp.lt.s32.totalorder %s4969_s26, %s4962_s17 }
  0x83   : > { %p4966_p7 = pneg %p4965_p5  ;;  %p4972_p2 = por %p4971_p1, %p4970_p12 }
  0x85   : > { %p4973_p13 = pnand %p4972_p2, %p4966_p7 }
  0x87   : > { %4976 = shalt.err (!%p4973_p13)
}
  0x88   : > { %4636 = dma.hbm_to_vmem [thread:$0]  (!%p5290_p11), %s5286_s7, 2048, %s5288_s10, %s5294_s8, %s5056_s30, %s5056_s30, %s5057_s9  }
  0x89   : > { %p7446_p9 = scmp.ne.s32.totalorder %s7440_s29, 0 }
  0x8b   : > { %277 = sbr.rel (%p7446_p9) target bundleno = 1889 (0x761), region = 44 }
  0x92   : > { %s5328_s13 = sand.u32 1, %s5043_s22   ;;  %p7447_p0 = scmp.ne.s32.totalorder %s7438_s27, 0 }
  0x93   : > { %s4004_s20 = sshll.u32 %s5328_s13, 7  ;;  %s280_s12 = scalar_lea.sflag [#allocation4], %s5328_s13 }
  0x94   : > { %s5332_s17 = scalar_lea.vmem [#allocation3], %s4004_s20 }
  0x95   : > { %5022 = dma.done.wait (%p7447_p0), %s280_s12, 2048  }
  0x96   : > { %5024 = vsyncadd (%p7447_p0), %s280_s12, 4294965248  ;;  %p7448_p11 = scmp.eq.s32.totalorder %s5123_s25, 0 }
  0x98   : > { %5026 = dma.done.wait (%p7448_p11), [#allocation7], 4096   ;;  %p7449_p4 = pmov %p7448_p11 }
  0x9a   : > { %5028 = vsyncadd (%p7449_p4), [#allocation7], 4294963200  ;;  %p7450_p8 = pmov %p7449_p4 }
  0x9b   : > { %p7451_p6 = pmov %p7449_p4 }
  0x9c   : > { %5030 = dma.done.wait (%p7450_p8), [#allocation10], 8192  }
  0x9d   : > { %5032 = vsyncadd (%p7451_p6), [#allocation10], 4294959104  ;;  %v4715_v0 = vld [vmem:[#allocation6] sm:$0xff]   ;;  %v4716_v1 = vld [vmem:[#allocation6 + $0x8] sm:$0xff]   ;;  %v5060_v19 = vmov 0.0   ;;  %vm836_vm0 = vcmask 1040384  }
  0x9e   : > { %4440 = vmatprep.subr.bf16.mxu0 %v4715_v0  ;;  %v4717_v2 = vld [vmem:[#allocation6 + $0x10] sm:$0xff]   ;;  %v4718_v3 = vld [vmem:[#allocation6 + $0x18] sm:$0xff]   ;;  %v4723_v4 = vld [vmem:[%s5332_s17] sm:$0xff]   ;;  %v5357_v20 = vrot.slane %v5060_v19, 7  ;;  %vm1003_vm1 = vcmask 1046528   ;;  %s5061_s27 = smov 32  }
  0x9f   : > { %4441 = vmatpush3.bf16.msra.mxu0 %v4715_v0  ;;  %4456 = vmatprep.mubr.bf16.mxu0 %v4723_v4  ;;  %v4719_v5 = vld [vmem:[#allocation6 + $0x20] sm:$0xff]   ;;  %v4720_v6 = vld [vmem:[#allocation6 + $0x28] sm:$0xff]   ;;  %v4721_v7 = vld [vmem:[#allocation6 + $0x30] sm:$0xff]   ;;  %vm1212_vm2 = vcmask 1045504   ;;  %s5062_s29 = smov 64   ;;  %s5063_s7 = smov 96  }
  0xa0   : > { %4442 = vmatprep.subr.bf16.mxu0 %v4716_v1  ;;  %v4722_v8 = vld [vmem:[#allocation6 + $0x38] sm:$0xff]   ;;  %v4724_v9 = vld [vmem:[%s5332_s17 + $0x8] sm:$0xff]   ;;  %v4725_v10 = vld [vmem:[%s5332_s17 + $0x10] sm:$0xff]   ;;  %7452 = vst [vmem:[#allocation17_spill] sm:$0xff] %v5357_v20  ;;  %v5361_v21 = vsel %vm836_vm0, 0.0, %v5357_v20  ;;  %v5365_v22 = vsel %vm836_vm0, %v5357_v20, 0.0 }
  0xa1   : > { %v4726_v11 = vld [vmem:[%s5332_s17 + $0x18] sm:$0xff]   ;;  %v4727_v12 = vld [vmem:[%s5332_s17 + $0x20] sm:$0xff]   ;;  %v4728_v13 = vld [vmem:[%s5332_s17 + $0x28] sm:$0xff]   ;;  %7453 = vst [vmem:[#allocation18_spill] sm:$0xff] %v5361_v21  ;;  %v7359_v23 = vrot.slane %v5361_v21, 1  ;;  %v1005_v24 = vrot.slane %v5357_v20, 1 }
  0xa2   : > { %v4729_v14 = vld [vmem:[%s5332_s17 + $0x30] sm:$0xff]   ;;  %v4730_v15 = vld [vmem:[%s5332_s17 + $0x38] sm:$0xff]   ;;  %v4731_v16 = vld [vmem:[%s5332_s17 + $0x40] sm:$0xff]   ;;  %7454 = vst [vmem:[#allocation19_spill] sm:$0xff] %v5365_v22  ;;  %v7360_v25 = vrot.slane %v5365_v22, 1  ;;  %v7358_v30 = vrot.slane %v5365_v22, 2 }
  0xa3   : > { %4443 = vmatpush3.bf16.msra.mxu0 %v4716_v1  ;;  %v4732_v17 = vld [vmem:[%s5332_s17 + $0x48] sm:$0xff]   ;;  %v4733_v18 = vld [vmem:[%s5332_s17 + $0x50] sm:$0xff]   ;;  %v4734_v26 = vld [vmem:[%s5332_s17 + $0x58] sm:$0xff]   ;;  %v1006_v27 = vsel %vm1003_vm1, %v7359_v23, %v1005_v24  ;;  %v7357_v31 = vrot.slane %v5361_v21, 2  ;;  %v1214_v32 = vrot.slane %v5357_v20, 2  ;;  %s3869_s11 = scalar_lea.sflag [#allocation5], %s5328_s13 }
  0xa4   : > { %4444 = vmatprep.subr.bf16.mxu0 %v4717_v2  ;;  %v1008_v28 = vsel %vm1003_vm1, %v1005_v24, %v7360_v25  ;;  %v4735_v36 = vld [vmem:[%s5332_s17 + $0x60] sm:$0xff]   ;;  %v4736_v37 = vld [vmem:[%s5332_s17 + $0x68] sm:$0xff]   ;;  %v4737_v38 = vld [vmem:[%s5332_s17 + $0x70] sm:$0xff]   ;;  %s5064_s8 = smov [#allocation12]  }
  0xa5   : > { %v5377_v29 = vpack.i.bf16 %v1008_v28, %v1006_v27  ;;  %v5387_v33 = vsel %vm1212_vm2, %v7357_v31, %v1214_v32  ;;  %v5392_v34 = vsel %vm1212_vm2, %v1214_v32, %v7358_v30  ;;  %v4738_v39 = vld [vmem:[%s5332_s17 + $0x78] sm:$0xff]   ;;  %v4739_v40 = vld [vmem:[#allocation8 + $0x80] sm:$0xff]   ;;  %v4740_v41 = vld [vmem:[#allocation8 + $0x88] sm:$0xff]   ;;  %s4009_s17 = sshll.u32 %s5328_s13, 4  ;;  %s4981_s19 = sshll.u32 %s5064_s8, 4  ;;  %s4982_s19 = int_to_ptr.vmem [resolvable:$false] %s4981_s19 }
  0xa6   : > { %7456 = vst [vmem:[#allocation21_spill] sm:$0xff] %v5387_v33  ;;  %7457 = vst [vmem:[#allocation22_spill] sm:$0xff] %v5392_v34  ;;  %v4700_v35 = vpack.i.bf16 %v5392_v34, %v5387_v33  ;;  %v4741_v42 = vld [vmem:[#allocation8 + $0x90] sm:$0xff]   ;;  %v4742_v43 = vld [vmem:[#allocation8 + $0x98] sm:$0xff]   ;;  %s4983_s14 = scalar_lea.vmem %s4982_s19, 512 }
  0xa7   : > { %4445 = vmatpush3.bf16.msra.mxu0 %v4717_v2  ;;  %7455 = vst [vmem:[#allocation20_spill] sm:$0xff] %v5377_v29  ;;  %4696 = vrot.lane.b32.xlu1 %v5377_v29, %s5061_s27  ;;  %v4743_v44 = vld [vmem:[#allocation8 + $0xa0] sm:$0xff]   ;;  %v4744_v45 = vld [vmem:[#allocation8 + $0xa8] sm:$0xff]   ;;  %v4745_v46 = vld [vmem:[#allocation8 + $0xb0] sm:$0xff]  }
  0xa8   : > { %4446 = vmatprep.subr.bf16.mxu0 %v4718_v3  ;;  %v4746_v47 = vld [vmem:[#allocation8 + $0xb8] sm:$0xff]   ;;  %v5404_v48 = vld [vmem:[%s7352_s5] ss:$0 sm:$0xff]  ;;  %v4751_v32 = vld [vmem:[#allocation8 + $0x50] sm:$0xff]  }
  0xa9   : > { %v4747_v1 = vld [vmem:[#allocation8 + $0x40] sm:$0xff]  }
  0xaa   : > { %v4748_v2 = vld [vmem:[#allocation8] sm:$0xff]   ;;  %4160 = vmatprep.subr.bf16.mxu1 %v4747_v1 }
  0xab   : > { %4447 = vmatpush3.bf16.msra.mxu0 %v4718_v3  ;;  %4701 = vrot.lane.b32.xlu1 %v4700_v35, %s5062_s29 }
  0xac   : > { %4448 = vmatprep.subr.bf16.mxu0 %v4719_v5  ;;  %4161 = vmatpush3.bf16.msra.mxu1 %v4748_v2 }
  0xaf   : > { %4449 = vmatpush3.bf16.msra.mxu0 %v4719_v5  ;;  %v4749_v5 = vld [vmem:[#allocation8 + $0x48] sm:$0xff]  }
  0xb0   : > { %4450 = vmatprep.subr.bf16.mxu0 %v4720_v6  ;;  %4162 = vmatprep.subr.bf16.mxu1 %v4749_v5 }
  0xb3   : > { %4451 = vmatpush3.bf16.msra.mxu0 %v4720_v6 }
  0xb4   : > { %4452 = vmatprep.subr.bf16.mxu0 %v4721_v7 }
  0xb7   : > { %4453 = vmatpush3.bf16.msra.mxu0 %v4721_v7 }
  0xb8   : > { %4454 = vmatprep.subr.bf16.mxu0 %v4722_v8 }
  0xbb   : > { %4455 = vmatpush3.bf16.msra.mxu0 %v4722_v8 }
  0xbc   : > { %4488 = vmatprep.subr.bf16.mxu0 %v4739_v40 }
  0xbe   : > { %4457 = vmatmul.mubr.bf16.vlgmr.msra.gmra.mrb[0].mxu0 %v4724_v9 }
  0xbf   : > { %4460 = vmatprep.mubr.bf16.mxu0 %v4725_v10  ;;  %4489 = vmatpush3.bf16.msra.mxu0 %v4739_v40 }
  0xc0   : > { %4490 = vmatprep.subr.bf16.mxu0 %v4740_v41 }
  0xc3   : > { %4491 = vmatpush3.bf16.msra.mxu0 %v4740_v41  ;;  %v4752_v41 = vld [vmem:[#allocation8 + $0x10] sm:$0xff]  }
  0xc4   : > { %4492 = vmatprep.subr.bf16.mxu0 %v4741_v42 }
  0xc6   : > { %4461 = vmatmul.mubr.bf16.gmra.mrb[4].mxu0 %v4726_v11 }
  0xc7   : > { %4464 = vmatprep.mubr.bf16.mxu0 %v4727_v12  ;;  %4493 = vmatpush3.bf16.msra.mxu0 %v4741_v42 }
  0xc8   : > { %4494 = vmatprep.subr.bf16.mxu0 %v4742_v43 }
  0xcb   : > { %4495 = vmatpush3.bf16.msra.mxu0 %v4742_v43 }
  0xcc   : > { %4496 = vmatprep.subr.bf16.mxu0 %v4743_v44 }
  0xce   : > { %4465 = vmatmul.mubr.bf16.gmra.mrb[8].mxu0 %v4728_v13 }
  0xcf   : > { %4468 = vmatprep.mubr.bf16.mxu0 %v4729_v14  ;;  %4497 = vmatpush3.bf16.msra.mxu0 %v4743_v44 }
  0xd0   : > { %4498 = vmatprep.subr.bf16.mxu0 %v4744_v45 }
  0xd3   : > { %4499 = vmatpush3.bf16.msra.mxu0 %v4744_v45 }
  0xd4   : > { %4500 = vmatprep.subr.bf16.mxu0 %v4745_v46 }
  0xd6   : > { %4469 = vmatmul.mubr.bf16.gmra.mrb[12].mxu0 %v4730_v15 }
  0xd7   : > { %4472 = vmatprep.mubr.bf16.mxu0 %v4731_v16  ;;  %4501 = vmatpush3.bf16.msra.mxu0 %v4745_v46 }
  0xd8   : > { %4502 = vmatprep.subr.bf16.mxu0 %v4746_v47 }
  0xdb   : > { %4503 = vmatpush3.bf16.msra.mxu0 %v4746_v47 }
  0xde   : > { %4473 = vmatmul.mubr.bf16.gmra.mrb[16].mxu0 %v4732_v17 }
  0xdf   : > { %4476 = vmatprep.mubr.bf16.mxu0 %v4733_v18  ;;  %v4750_v18 = vld [vmem:[#allocation8 + $0x8] sm:$0xff]  }
  0xe0   : > { %4163 = vmatpush3.bf16.msra.mxu1 %v4750_v18 }
  0xe1   : > { %4164 = vmatprep.subr.bf16.mxu1 %v4751_v32 }
  0xe4   : > { %4165 = vmatpush3.bf16.msra.mxu1 %v4752_v41 }
  0xe6   : > { %4477 = vmatmul.mubr.bf16.gmra.mrb[20].mxu0 %v4734_v26 }
  0xe7   : > { %4480 = vmatprep.mubr.bf16.mxu0 %v4735_v36 }
  0xee   : > { %4481 = vmatmul.mubr.bf16.gmra.mrb[24].mxu0 %v4736_v37 }
  0xef   : > { %4484 = vmatprep.mubr.bf16.mxu0 %v4737_v38 }
  0xf6   : > { %4485 = vmatmul.mubr.bf16.gmra.mrb[28].mxu0 %v4738_v39 }
 0x191   : > { %v4458_v49 = vpop.f32.mrb[0].mxu0 }
 0x192   : > { %v571_v50 = vadd.f32 %v4458_v49, %v5404_v48  ;;  %v562_v51 = vpop.f32.mrb[1].mxu0 }
 0x193   : > { %v563_v52 = vadd.f32 %v5404_v48, %v562_v51  ;;  %v4459_v53 = vpop.f32.mrb[2].mxu0 }
 0x194   : > { %v691_v54 = vmul.f32 0.2, %v571_v50  ;;  %v574_v55 = vadd.f32 %v4459_v53, %v5404_v48  ;;  %v565_v56 = vpop.f32.mrb[3].mxu0 }
 0x195   : > { %v689_v57 = vmul.f32 0.2, %v563_v52  ;;  %v566_v58 = vadd.f32 %v5404_v48, %v565_v56 }
 0x196   : > { %v723_v59 = vmax.f32 %v571_v50, %v691_v54  ;;  %v692_v60 = vmul.f32 0.2, %v574_v55 }
 0x197   : > { %v721_v61 = vmax.f32 %v563_v52, %v689_v57  ;;  %v690_v62 = vmul.f32 0.2, %v566_v58 }
 0x198   : > { %v842_v63 = vrot.slane %v723_v59, 7  ;;  %v724_v0 = vmax.f32 %v574_v55, %v692_v60  ;;  %v4753_v55 = vld [vmem:[#allocation8 + $0x58] sm:$0xff]  }
 0x199   : > { %v722_v3 = vmax.f32 %v566_v58, %v690_v62  ;;  %v4462_v4 = vpop.f32.mrb[4].mxu0  ;;  %v839_v7 = vrot.slane %v721_v61, 7  ;;  %v4754_v59 = vld [vmem:[#allocation8 + $0x18] sm:$0xff]   ;;  %4166 = vmatprep.subr.bf16.mxu1 %v4753_v55 }
 0x19a   : > { %v5411_v6 = vsel %vm836_vm0, 0.0, %v842_v63  ;;  %v843_v8 = vrot.slane %v724_v0, 7  ;;  %v587_v9 = vadd.f32 %v4462_v4, %v5404_v48  ;;  %v578_v10 = vpop.f32.mrb[5].mxu0  ;;  %4167 = vmatpush3.bf16.msra.mxu1 %v4754_v59 }
 0x19b   : > { %v5414_v11 = vrot.slane %v722_v3, 7  ;;  %1425 = vrot.lane.b32.xlu0 %v5411_v6, %s5063_s7  ;;  %1629 = vrot.lane.b32.xlu1 %v5411_v6, %s5062_s29  ;;  %v4463_v12 = vpop.f32.mrb[6].mxu0  ;;  %v579_v16 = vadd.f32 %v5404_v48, %v578_v10  ;;  %v1223_v24 = vrot.slane %v5411_v6, 2  ;;  %v5428_v27 = vsel %vm836_vm0, 0.0, %v839_v7  ;;  %v4755_v3 = vld [vmem:[#allocation8 + $0x60] sm:$0xff]  }
 0x19c   : > { %v956_v13 = vsel %vm836_vm0, %v843_v8, 0.0  ;;  %v5422_v14 = vsel %vm836_vm0, %v842_v63, %v843_v8  ;;  %v695_v15 = vmul.f32 0.2, %v587_v9  ;;  %v581_v17 = vpop.f32.mrb[7].mxu0  ;;  %v590_v40 = vadd.f32 %v4463_v12, %v5404_v48  ;;  %v4756_v12 = vld [vmem:[#allocation8 + $0x20] sm:$0xff]   ;;  %4168 = vmatprep.subr.bf16.mxu1 %v4755_v3 }
 0x19d   : > { %v1226_v19 = vrot.slane %v956_v13, 2  ;;  %v1224_v26 = vrot.slane %v5422_v14, 2  ;;  %v5432_v28 = vsel %vm836_vm0, %v839_v7, %v5414_v11  ;;  %v693_v38 = vmul.f32 0.2, %v579_v16 }
 0x19e   : > { %v727_v37 = vmax.f32 %v587_v9, %v695_v15  ;;  %v582_v43 = vadd.f32 %v5404_v48, %v581_v17  ;;  %v1017_v45 = vrot.slane %v956_v13, 1  ;;  %v1015_v46 = vrot.slane %v5422_v14, 1  ;;  %4169 = vmatpush3.bf16.msra.mxu1 %v4756_v12 }
 0x19f   : > { %1427 = vrot.lane.b32.xlu1 %v5422_v14, %s5063_s7  ;;  %1421 = vrot.lane.b32.xlu0 %v5428_v27, %s5063_s7  ;;  %v5439_v35 = vsel %vm1212_vm2, %v1223_v24, %v1224_v26  ;;  %v5442_v36 = vsel %vm1212_vm2, %v1224_v26, %v1226_v19  ;;  %v725_v42 = vmax.f32 %v579_v16, %v693_v38  ;;  %v696_v47 = vmul.f32 0.2, %v590_v40 }
 0x1a0   : > { %v1823_v39 = vpack.c.bf16 %v5442_v36, %v5439_v35  ;;  %v848_v50 = vrot.slane %v727_v37, 7  ;;  %v694_v52 = vmul.f32 0.2, %v582_v43  ;;  %v1014_v56 = vrot.slane %v5411_v6, 1 }
 0x1a1   : > { %v4466_v44 = vpop.f32.mrb[8].mxu0  ;;  %v845_v51 = vrot.slane %v725_v42, 7  ;;  %v728_v57 = vmax.f32 %v590_v40, %v696_v47  ;;  %v5465_v0 = vsel %vm1003_vm1, %v1015_v46, %v1017_v45  ;;  %v5493_v38 = vsel %vm836_vm0, %v5414_v11, 0.0  ;;  %v4758_v47 = vld [vmem:[#allocation8 + $0x28] sm:$0xff]  }
 0x1a2   : > { %4504 = vmatprep.mubr.bf16.mxu0 %v1823_v39  ;;  %v594_v49 = vpop.f32.mrb[9].mxu0  ;;  %v603_v53 = vadd.f32 %v4466_v44, %v5404_v48  ;;  %v5456_v60 = vsel %vm836_vm0, 0.0, %v848_v50  ;;  %v726_v62 = vmax.f32 %v582_v43, %v694_v52  ;;  %v5462_v63 = vsel %vm1003_vm1, %v1014_v56, %v1015_v46  ;;  %v4757_v46 = vld [vmem:[#allocation8 + $0x68] sm:$0xff]  }
 0x1a3   : > { %1631 = vrot.lane.b32.xlu0 %v5422_v14, %s5062_s29  ;;  %1423 = vrot.lane.b32.xlu1 %v5432_v28, %s5063_s7  ;;  %v4467_v54 = vpop.f32.mrb[10].mxu0  ;;  %7458 = vst [vmem:[#allocation23_spill] sm:$0xff] %v5456_v60  ;;  %v5459_v61 = vsel %vm836_vm0, 0.0, %v845_v51  ;;  %v849_v1 = vrot.slane %v728_v57, 7  ;;  %v595_v5 = vadd.f32 %v5404_v48, %v594_v49  ;;  %v1233_v10 = vrot.slane %v5456_v60, 2 }
 0x1a4   : > { %v597_v58 = vpop.f32.mrb[11].mxu0  ;;  %7459 = vst [vmem:[#allocation24_spill] sm:$0xff] %v5459_v61  ;;  %v699_v2 = vmul.f32 0.2, %v603_v53  ;;  %v846_v4 = vrot.slane %v726_v62, 7  ;;  %v1228_v7 = vrot.slane %v5459_v61, 2  ;;  %v606_v32 = vadd.f32 %v4467_v54, %v5404_v48  ;;  %4170 = vmatprep.subr.bf16.mxu1 %v4757_v46 }
 0x1a5   : > { %v5474_v8 = vsel %vm836_vm0, %v849_v1, 0.0  ;;  %v5477_v9 = vsel %vm836_vm0, %v848_v50, %v849_v1  ;;  %v697_v39 = vmul.f32 0.2, %v595_v5  ;;  %v598_v40 = vadd.f32 %v5404_v48, %v597_v58  ;;  %4171 = vmatpush3.bf16.msra.mxu1 %v4758_v47  ;;  %v4762_v46 = vld [vmem:[#allocation8 + $0x38] sm:$0xff]  }
 0x1a6   : > { %7460 = vst [vmem:[#allocation25_spill] sm:$0xff] %v5477_v9  ;;  %v1236_v13 = vrot.slane %v5474_v8, 2  ;;  %v5482_v15 = vsel %vm836_vm0, %v845_v51, %v846_v4  ;;  %v5485_v16 = vsel %vm836_vm0, %v846_v4, 0.0  ;;  %v731_v17 = vmax.f32 %v603_v53, %v699_v2  ;;  %v4759_v4 = vld [vmem:[#allocation8 + $0x70] sm:$0xff]  }
 0x1a7   : > { %1725 = vrot.lane.b32.xlu0 %v5462_v63, %s5063_s7  ;;  %1727 = vrot.lane.b32.xlu1 %v5465_v0, %s5063_s7  ;;  %7461 = vst [vmem:[#allocation26_spill] sm:$0xff] %v5482_v15  ;;  %v1229_v19 = vrot.slane %v5482_v15, 2  ;;  %v1231_v24 = vrot.slane %v5485_v16, 2  ;;  %v1234_v26 = vrot.slane %v5477_v9, 2  ;;  %v1219_v49 = vrot.slane %v5432_v28, 2 }
 0x1a8   : > { %v854_v52 = vrot.slane %v731_v17, 7  ;;  %v1012_v53 = vrot.slane %v5493_v38, 1  ;;  %v729_v54 = vmax.f32 %v595_v5, %v697_v39  ;;  %v700_v55 = vmul.f32 0.2, %v606_v32  ;;  %v4760_v5 = vld [vmem:[#allocation8 + $0x30] sm:$0xff]   ;;  %4172 = vmatprep.subr.bf16.mxu1 %v4759_v4 }
 0x1a9   : > { %v4470_v18 = vpop.f32.mrb[12].mxu0  ;;  %v5501_v42 = vsel %vm1212_vm2, %v1229_v19, %v1231_v24  ;;  %v5504_v43 = vsel %vm1212_vm2, %v1228_v7, %v1229_v19  ;;  %v5507_v44 = vsel %vm1212_vm2, %v1233_v10, %v1234_v26  ;;  %v5510_v11 = vsel %vm1212_vm2, %v1234_v26, %v1236_v13  ;;  %4173 = vmatpush3.bf16.msra.mxu1 %v4760_v5 }
 0x1aa   : > { %v610_v37 = vpop.f32.mrb[13].mxu0  ;;  %v1826_v50 = vpack.c.bf16 %v5501_v42, %v5504_v43  ;;  %v1829_v51 = vpack.c.bf16 %v5510_v11, %v5507_v44  ;;  %v1218_v56 = vrot.slane %v5428_v27, 2  ;;  %v1010_v57 = vrot.slane %v5432_v28, 1 }
 0x1ab   : > { %1537 = vrot.lane.b32.xlu0 %v5439_v35, %s5061_s27  ;;  %1539 = vrot.lane.b32.xlu1 %v5442_v36, %s5061_s27  ;;  %v4471_v41 = vpop.f32.mrb[14].mxu0  ;;  %v5525_v58 = vsel %vm836_vm0, 0.0, %v854_v52  ;;  %v698_v59 = vmul.f32 0.2, %v598_v40  ;;  %v851_v62 = vrot.slane %v729_v54, 7  ;;  %v732_v1 = vmax.f32 %v606_v32, %v700_v55 }
 0x1ac   : > { %v613_v45 = vpop.f32.mrb[15].mxu0  ;;  %7462 = vst [vmem:[#allocation27_spill] sm:$0xff] %v5525_v58  ;;  %4505 = vmatmul.mubr.bf16.vlgmr.msra.gmra.mrb[32].mxu0 %v1826_v50  ;;  %v619_v2 = vadd.f32 %v4470_v18, %v5404_v48  ;;  %v611_v3 = vadd.f32 %v5404_v48, %v610_v37  ;;  %v1221_v7 = vrot.slane %v5493_v38, 2  ;;  %v5533_v10 = vsel %vm1212_vm2, %v1218_v56, %v1219_v49 }
 0x1ad   : > { %4508 = vmatprep.mubr.bf16.mxu0 %v1829_v51  ;;  %v730_v12 = vmax.f32 %v598_v40, %v698_v59  ;;  %v622_v13 = vadd.f32 %v4471_v41, %v5404_v48  ;;  %v5537_v17 = vsel %vm836_vm0, 0.0, %v851_v62  ;;  %v855_v18 = vrot.slane %v732_v1, 7 }
 0x1ae   : > { %7463 = vst [vmem:[#allocation28_spill] sm:$0xff] %v5537_v17  ;;  %v703_v19 = vmul.f32 0.2, %v619_v2  ;;  %v701_v24 = vmul.f32 0.2, %v611_v3  ;;  %v5546_v26 = vsel %vm1003_vm1, %v1010_v57, %v1012_v53  ;;  %v1243_v37 = vrot.slane %v5525_v58, 2 }
 0x1af   : > { %1124 = vrot.lane.b32.xlu0 %v5462_v63, %s5061_s27  ;;  %1126 = vrot.lane.b32.xlu1 %v5465_v0, %s5061_s27  ;;  %v852_v32 = vrot.slane %v730_v12, 7  ;;  %v614_v38 = vadd.f32 %v5404_v48, %v613_v45  ;;  %v5551_v39 = vsel %vm836_vm0, %v855_v18, 0.0  ;;  %v5554_v40 = vsel %vm836_vm0, %v854_v52, %v855_v18 }
 0x1b0   : > { %7464 = vst [vmem:[#allocation29_spill] sm:$0xff] %v5554_v40  ;;  %v733_v41 = vmax.f32 %v611_v3, %v701_v24  ;;  %v1246_v47 = vrot.slane %v5551_v39, 2  ;;  %v735_v45 = vmax.f32 %v619_v2, %v703_v19  ;;  %v1244_v54 = vrot.slane %v5554_v40, 2 }
 0x1b1   : > { %v5559_v50 = vsel %vm836_vm0, %v851_v62, %v852_v32  ;;  %v5562_v51 = vsel %vm836_vm0, %v852_v32, 0.0  ;;  %v704_v55 = vmul.f32 0.2, %v622_v13  ;;  %v702_v59 = vmul.f32 0.2, %v614_v38 }
 0x1b2   : > { %7465 = vst [vmem:[#allocation30_spill] sm:$0xff] %v5559_v50  ;;  %v1241_v53 = vrot.slane %v5562_v51, 2  ;;  %v1239_v52 = vrot.slane %v5559_v50, 2  ;;  %v857_v56 = vrot.slane %v733_v41, 7  ;;  %v5578_v2 = vsel %vm1212_vm2, %v1243_v37, %v1244_v54 }
 0x1b3   : > { %1333 = vrot.lane.b32.xlu0 %v5439_v35, %s5062_s29  ;;  %1335 = vrot.lane.b32.xlu1 %v5442_v36, %s5062_s29  ;;  %v1238_v35 = vrot.slane %v5537_v17, 2  ;;  %v4761_v36 = vld [vmem:[#allocation8 + $0x78] sm:$0xff]   ;;  %v5581_v3 = vsel %vm1212_vm2, %v1244_v54, %v1246_v47  ;;  %v860_v12 = vrot.slane %v735_v45, 7  ;;  %v1222_v18 = vsel %vm1212_vm2, %v1219_v49, %v1221_v7 }
 0x1b4   : > { %4174 = vmatprep.subr.bf16.mxu1 %v4761_v36  ;;  %v5575_v1 = vsel %vm1212_vm2, %v1239_v52, %v1241_v53  ;;  %v1835_v5 = vpack.c.bf16 %v5581_v3, %v5578_v2  ;;  %v736_v19 = vmax.f32 %v622_v13, %v704_v55  ;;  %v1009_v24 = vrot.slane %v5428_v27, 1 }
 0x1b5   : > { %v5572_v62 = vsel %vm1212_vm2, %v1238_v35, %v1239_v52  ;;  %4175 = vmatpush3.bf16.msra.mxu1 %v4762_v46  ;;  %v5594_v32 = vsel %vm836_vm0, 0.0, %v860_v12  ;;  %v5597_v37 = vsel %vm836_vm0, 0.0, %v857_v56  ;;  %v734_v35 = vmax.f32 %v614_v38, %v702_v59 }
 0x1b6   : > { %v1832_v4 = vpack.c.bf16 %v5575_v1, %v5572_v62  ;;  %7466 = vst [vmem:[#allocation31_spill] sm:$0xff] %v5594_v32  ;;  %7467 = vst [vmem:[#allocation32_spill] sm:$0xff] %v5597_v37  ;;  %v861_v41 = vrot.slane %v736_v19, 7  ;;  %v5602_v49 = vsel %vm1003_vm1, %v1009_v24, %v1010_v57  ;;  %v1248_v46 = vrot.slane %v5597_v37, 2 }
 0x1b7   : > { %1533 = vrot.lane.b32.xlu0 %v5533_v10, %s5061_s27  ;;  %1122 = vrot.lane.b32.xlu1 %v5546_v26, %s5061_s27  ;;  %v858_v7 = vrot.slane %v734_v35, 7  ;;  %v1253_v47 = vrot.slane %v5594_v32, 2  ;;  %v1035_v34 = vrot.slane %v5554_v40, 1 }
 0x1b8   : > { %4509 = vmatmul.mubr.bf16.gmra.mrb[36].mxu0 %v1832_v4  ;;  %v5605_v13 = vsel %vm836_vm0, %v861_v41, 0.0  ;;  %v5608_v36 = vsel %vm836_vm0, %v860_v12, %v861_v41 }
 0x1b9   : > { %4512 = vmatprep.mubr.bf16.mxu0 %v1835_v5  ;;  %7468 = vst [vmem:[#allocation33_spill] sm:$0xff] %v5608_v36  ;;  %v1256_v57 = vrot.slane %v5605_v13, 2  ;;  %v5618_v38 = vsel %vm836_vm0, %v857_v56, %v858_v7  ;;  %v5621_v45 = vsel %vm836_vm0, %v858_v7, 0.0  ;;  %v1254_v54 = vrot.slane %v5608_v36, 2  ;;  %v4474_v5 = vpop.f32.mrb[16].mxu0 }
 0x1ba   : > { %7469 = vst [vmem:[#allocation34_spill] sm:$0xff] %v5618_v38  ;;  %v1251_v53 = vrot.slane %v5621_v45, 2  ;;  %v1249_v52 = vrot.slane %v5618_v38, 2  ;;  %v626_v19 = vpop.f32.mrb[17].mxu0  ;;  %v635_v24 = vadd.f32 %v4474_v5, %v5404_v48 }
 0x1bb   : > { %1535 = vrot.lane.b32.xlu0 %v1222_v18, %s5061_s27  ;;  %1331 = vrot.lane.b32.xlu1 %v1222_v18, %s5062_s29  ;;  %v5633_v4 = vsel %vm1212_vm2, %v1253_v47, %v1254_v54  ;;  %v5636_v56 = vsel %vm1212_vm2, %v1254_v54, %v1256_v57  ;;  %v627_v35 = vadd.f32 %v5404_v48, %v626_v19  ;;  %v4475_v41 = vpop.f32.mrb[18].mxu0  ;;  %v1025_v19 = vrot.slane %v5477_v9, 1 }
 0x1bc   : > { %v5627_v55 = vsel %vm1212_vm2, %v1248_v46, %v1249_v52  ;;  %v5630_v59 = vsel %vm1212_vm2, %v1249_v52, %v1251_v53  ;;  %v1841_v18 = vpack.c.bf16 %v5636_v56, %v5633_v4  ;;  %v638_v7 = vadd.f32 %v4475_v41, %v5404_v48  ;;  %v629_v52 = vpop.f32.mrb[19].mxu0 }
 0x1bd   : > { %v1838_v12 = vpack.c.bf16 %v5630_v59, %v5627_v55  ;;  %v707_v46 = vmul.f32 0.2, %v635_v24  ;;  %v705_v47 = vmul.f32 0.2, %v627_v35  ;;  %v630_v5 = vadd.f32 %v5404_v48, %v629_v52 }
 0x1bf   : > { %1639 = vrot.lane.b32.xlu1 %v5477_v9, %s5062_s29  ;;  %1120 = vrot.lane.b32.xlu0 %v5602_v49, %s5061_s27  ;;  %v739_v57 = vmax.f32 %v635_v24, %v707_v46  ;;  %v737_v53 = vmax.f32 %v627_v35, %v705_v47  ;;  %v706_v31 = vmul.f32 0.2, %v630_v5 }
 0x1c0   : > { %4513 = vmatmul.mubr.bf16.gmra.mrb[40].mxu0 %v1838_v12  ;;  %v1027_v12 = vrot.slane %v5474_v8, 1 }
 0x1c1   : > { %4516 = vmatprep.mubr.bf16.mxu0 %v1841_v18  ;;  %v866_v18 = vrot.slane %v739_v57, 7  ;;  %v863_v30 = vrot.slane %v737_v53, 7  ;;  %v738_v24 = vmax.f32 %v630_v5, %v706_v31 }
 0x1c2   : > { %v5661_v35 = vsel %vm1003_vm1, %v1025_v19, %v1027_v12 }
 0x1c3   : > { %1435 = vrot.lane.b32.xlu1 %v5477_v9, %s5063_s7  ;;  %1329 = vrot.lane.b32.xlu0 %v5533_v10, %s5062_s29  ;;  %v708_v10 = vmul.f32 0.2, %v638_v7  ;;  %7470 = vst [vmem:[#allocation35_spill] sm:$0xff] %v5661_v35  ;;  %v864_v8 = vrot.slane %v738_v24, 7  ;;  %v5671_v46 = vsel %vm836_vm0, 0.0, %v863_v30  ;;  %v5700_v24 = vsel %vm836_vm0, 0.0, %v866_v18 }
 0x1c4   : > { %7472 = vst [vmem:[#allocation37_spill] sm:$0xff] %v5671_v46  ;;  %v1258_v53 = vrot.slane %v5671_v46, 2  ;;  %7478 = vst [vmem:[#allocation43_spill] sm:$0xff] %v5700_v24 }
 0x1c5   : > { %v740_v54 = vmax.f32 %v638_v7, %v708_v10  ;;  %v5674_v47 = vsel %vm836_vm0, %v863_v30, %v864_v8  ;;  %v5677_v31 = vsel %vm836_vm0, %v864_v8, 0.0  ;;  %v1024_v10 = vrot.slane %v5456_v60, 1 }
 0x1c6   : > { %7473 = vst [vmem:[#allocation38_spill] sm:$0xff] %v5674_v47  ;;  %7474 = vst [vmem:[#allocation39_spill] sm:$0xff] %v5677_v31  ;;  %v1261_v57 = vrot.slane %v5677_v31, 2  ;;  %v1259_v52 = vrot.slane %v5674_v47, 2 }
 0x1c7   : > { %1635 = vrot.lane.b32.xlu1 %v5482_v15, %s5062_s29  ;;  %1637 = vrot.lane.b32.xlu0 %v5456_v60, %s5062_s29  ;;  %v867_v41 = vrot.slane %v740_v54, 7  ;;  %v5697_v12 = vsel %vm1003_vm1, %v1024_v10, %v1025_v19  ;;  %v1022_v10 = vrot.slane %v5485_v16, 1  ;;  %v1019_v16 = vrot.slane %v5459_v61, 1 }
 0x1c8   : > { %v5691_v54 = vsel %vm1212_vm2, %v1258_v53, %v1259_v52  ;;  %v5694_v5 = vsel %vm1212_vm2, %v1259_v52, %v1261_v57  ;;  %7477 = vst [vmem:[#allocation42_spill] sm:$0xff] %v5697_v12  ;;  %v1263_v57 = vrot.slane %v5700_v24, 2 }
 0x1c9   : > { %v5664_v7 = vsel %vm836_vm0, %v866_v18, %v867_v41  ;;  %v5688_v30 = vsel %vm836_vm0, %v867_v41, 0.0  ;;  %7475 = vst [vmem:[#allocation40_spill] sm:$0xff] %v5691_v54  ;;  %7476 = vst [vmem:[#allocation41_spill] sm:$0xff] %v5694_v5  ;;  %v1844_v8 = vpack.c.bf16 %v5694_v5, %v5691_v54  ;;  %v1020_v18 = vrot.slane %v5482_v15, 1 }
 0x1ca   : > { %7471 = vst [vmem:[#allocation36_spill] sm:$0xff] %v5664_v7  ;;  %v1266_v41 = vrot.slane %v5688_v30, 2  ;;  %v1264_v19 = vrot.slane %v5664_v7, 2 }
 0x1cb   : > { %1431 = vrot.lane.b32.xlu1 %v5482_v15, %s5063_s7  ;;  %1433 = vrot.lane.b32.xlu0 %v5456_v60, %s5063_s7  ;;  %v5726_v23 = vsel %vm1003_vm1, %v1020_v18, %v1022_v10 }
 0x1cc   : > { %4517 = vmatmul.mubr.bf16.gmra.mrb[44].mxu0 %v1844_v8  ;;  %v5718_v53 = vsel %vm1212_vm2, %v1263_v57, %v1264_v19  ;;  %v5721_v52 = vsel %vm1212_vm2, %v1264_v19, %v1266_v41 }
 0x1cd   : > { %7479 = vst [vmem:[#allocation44_spill] sm:$0xff] %v5718_v53  ;;  %7480 = vst [vmem:[#allocation45_spill] sm:$0xff] %v5721_v52  ;;  %v1847_v8 = vpack.c.bf16 %v5721_v52, %v5718_v53 }
 0x1cf   : > { %1735 = vrot.lane.b32.xlu1 %v5661_v35, %s5063_s7  ;;  %1633 = vrot.lane.b32.xlu0 %v5459_v61, %s5062_s29 }
 0x1d0   : > { %4520 = vmatprep.mubr.bf16.mxu0 %v1847_v8 }
 0x1d3   : > { %1547 = vrot.lane.b32.xlu1 %v5510_v11, %s5061_s27  ;;  %1429 = vrot.lane.b32.xlu0 %v5459_v61, %s5063_s7 }
 0x1d7   : > { %1134 = vrot.lane.b32.xlu1 %v5661_v35, %s5061_s27  ;;  %1733 = vrot.lane.b32.xlu0 %v5697_v12, %s5063_s7 }
 0x1db   : > { %1343 = vrot.lane.b32.xlu1 %v5510_v11, %s5062_s29  ;;  %1545 = vrot.lane.b32.xlu0 %v5507_v44, %s5061_s27  ;;  %v5738_v11 = vsel %vm1003_vm1, %v1019_v16, %v1020_v18 }
 0x1df   : > { %1731 = vrot.lane.b32.xlu1 %v5726_v23, %s5063_s7  ;;  %1132 = vrot.lane.b32.xlu0 %v5697_v12, %s5061_s27 }
 0x1e3   : > { %1543 = vrot.lane.b32.xlu1 %v5501_v42, %s5061_s27  ;;  %1341 = vrot.lane.b32.xlu0 %v5507_v44, %s5062_s29  ;;  %v4478_v44 = vpop.f32.mrb[20].mxu0 }
 0x1e4   : > { %v651_v41 = vadd.f32 %v4478_v44, %v5404_v48  ;;  %v642_v57 = vpop.f32.mrb[21].mxu0 }
 0x1e5   : > { %v4479_v19 = vpop.f32.mrb[22].mxu0 }
 0x1e6   : > { %v711_v10 = vmul.f32 0.2, %v651_v41  ;;  %v654_v18 = vadd.f32 %v4479_v19, %v5404_v48 }
 0x1e7   : > { %1130 = vrot.lane.b32.xlu1 %v5726_v23, %s5061_s27  ;;  %1729 = vrot.lane.b32.xlu0 %v5738_v11, %s5063_s7 }
 0x1e8   : > { %v743_v16 = vmax.f32 %v651_v41, %v711_v10  ;;  %v712_v25 = vmul.f32 0.2, %v654_v18 }
 0x1ea   : > { %v744_v29 = vmax.f32 %v654_v18, %v712_v25  ;;  %v872_v33 = vrot.slane %v743_v16, 7 }
 0x1eb   : > { %1339 = vrot.lane.b32.xlu1 %v5501_v42, %s5062_s29  ;;  %1541 = vrot.lane.b32.xlu0 %v5504_v43, %s5061_s27  ;;  %v643_v42 = vadd.f32 %v5404_v48, %v642_v57  ;;  %v1037_v57 = vrot.slane %v5551_v39, 1 }
 0x1ec   : > { %v873_v19 = vrot.slane %v744_v29, 7  ;;  %v5783_v29 = vpop.permute.xlu1 %4696 }
 0x1ed   : > { %v709_v8 = vmul.f32 0.2, %v643_v42 }
 0x1ee   : > { %v5774_v25 = vsel %vm836_vm0, %v872_v33, %v873_v19 }
 0x1ef   : > { %1647 = vrot.lane.b32.xlu1 %v5554_v40, %s5062_s29  ;;  %1128 = vrot.lane.b32.xlu0 %v5738_v11, %s5061_s27  ;;  %v741_v22 = vmax.f32 %v643_v42, %v709_v8  ;;  %v5771_v42 = vsel %vm1003_vm1, %v1035_v34, %v1037_v57  ;;  %7482 = vst [vmem:[#allocation47_spill] sm:$0xff] %v5774_v25  ;;  %v1034_v8 = vrot.slane %v5525_v58, 1  ;;  %v5800_v57 = vsel %vm836_vm0, %v873_v19, 0.0 }
 0x1f0   : > { %7481 = vst [vmem:[#allocation46_spill] sm:$0xff] %v5771_v42  ;;  %7486 = vst [vmem:[#allocation51_spill] sm:$0xff] %v5800_v57  ;;  %v5820_v19 = vpop.permute.xlu1 %4701 }
 0x1f1   : > { %v869_v41 = vrot.slane %v741_v22, 7 }
 0x1f3   : > { %1443 = vrot.lane.b32.xlu1 %v5554_v40, %s5063_s7  ;;  %1337 = vrot.lane.b32.xlu0 %v5504_v43, %s5062_s29  ;;  %v645_v43 = vpop.f32.mrb[23].mxu0  ;;  %v5781_v18 = vsel %vm836_vm0, 0.0, %v869_v41  ;;  %v5812_v40 = vsel %vm836_vm0, 0.0, %v872_v33  ;;  %v1032_v33 = vrot.slane %v5562_v51, 1 }
 0x1f4   : > { %v646_v44 = vadd.f32 %v5404_v48, %v645_v43  ;;  %7483 = vst [vmem:[#allocation48_spill] sm:$0xff] %v5781_v18  ;;  %v1268_v43 = vrot.slane %v5781_v18, 2  ;;  %7490 = vst [vmem:[#allocation55_spill] sm:$0xff] %v5812_v40 }
 0x1f6   : > { %v710_v9 = vmul.f32 0.2, %v646_v44 }
 0x1f7   : > { %1643 = vrot.lane.b32.xlu1 %v5559_v50, %s5062_s29  ;;  %1645 = vrot.lane.b32.xlu0 %v5525_v58, %s5062_s29 }
 0x1f8   : > { %v742_v10 = vmax.f32 %v646_v44, %v710_v9 }
 0x1fa   : > { %v870_v39 = vrot.slane %v742_v10, 7 }
 0x1fb   : > { %1439 = vrot.lane.b32.xlu1 %v5559_v50, %s5063_s7  ;;  %1441 = vrot.lane.b32.xlu0 %v5525_v58, %s5063_s7 }
 0x1fc   : > { %v5786_v22 = vsel %vm836_vm0, %v869_v41, %v870_v39  ;;  %v5789_v9 = vsel %vm836_vm0, %v870_v39, 0.0  ;;  %v5809_v39 = vsel %vm1003_vm1, %v1034_v8, %v1035_v34  ;;  %v1273_v34 = vrot.slane %v5812_v40, 2 }
 0x1fd   : > { %7484 = vst [vmem:[#allocation49_spill] sm:$0xff] %v5786_v22  ;;  %7485 = vst [vmem:[#allocation50_spill] sm:$0xff] %v5789_v9  ;;  %v1271_v16 = vrot.slane %v5789_v9, 2  ;;  %v1269_v44 = vrot.slane %v5786_v22, 2  ;;  %v1274_v8 = vrot.slane %v5774_v25, 2 }
 0x1fe   : > { %7489 = vst [vmem:[#allocation54_spill] sm:$0xff] %v5809_v39 }
 0x1ff   : > { %1743 = vrot.lane.b32.xlu1 %v5771_v42, %s5063_s7  ;;  %1641 = vrot.lane.b32.xlu0 %v5537_v17, %s5062_s29  ;;  %v5803_v41 = vsel %vm1212_vm2, %v1268_v43, %v1269_v44  ;;  %v5806_v10 = vsel %vm1212_vm2, %v1269_v44, %v1271_v16  ;;  %v1276_v16 = vrot.slane %v5800_v57, 2  ;;  %v1030_v43 = vrot.slane %v5559_v50, 1 }
 0x200   : > { %7487 = vst [vmem:[#allocation52_spill] sm:$0xff] %v5803_v41  ;;  %7488 = vst [vmem:[#allocation53_spill] sm:$0xff] %v5806_v10  ;;  %v1850_v58 = vpack.c.bf16 %v5806_v10, %v5803_v41  ;;  %v5832_v44 = vsel %vm1212_vm2, %v1273_v34, %v1274_v8  ;;  %v1029_v34 = vrot.slane %v5537_v17, 1 }
 0x201   : > { %7491 = vst [vmem:[#allocation56_spill] sm:$0xff] %v5832_v44  ;;  %v5844_v50 = vsel %vm1003_vm1, %v1030_v43, %v1032_v33 }
 0x202   : > { %4521 = vmatmul.mubr.bf16.gmra.mrb[48].mxu0 %v1850_v58  ;;  %7493 = vst [vmem:[#allocation58_spill] sm:$0xff] %v5844_v50 }
 0x203   : > { %1555 = vrot.lane.b32.xlu1 %v5581_v3, %s5061_s27  ;;  %1437 = vrot.lane.b32.xlu0 %v5537_v17, %s5063_s7 }
 0x207   : > { %1142 = vrot.lane.b32.xlu1 %v5771_v42, %s5061_s27  ;;  %1741 = vrot.lane.b32.xlu0 %v5809_v39, %s5063_s7  ;;  %v5835_v42 = vsel %vm1212_vm2, %v1274_v8, %v1276_v16  ;;  %v4482_v8 = vpop.f32.mrb[24].mxu0 }
 0x208   : > { %7492 = vst [vmem:[#allocation57_spill] sm:$0xff] %v5835_v42  ;;  %v1853_v58 = vpack.c.bf16 %v5835_v42, %v5832_v44  ;;  %v658_v33 = vpop.f32.mrb[25].mxu0  ;;  %v667_v15 = vadd.f32 %v4482_v8, %v5404_v48 }
 0x20a   : > { %4524 = vmatprep.mubr.bf16.mxu0 %v1853_v58  ;;  %v4483_v58 = vpop.f32.mrb[26].mxu0  ;;  %v715_v8 = vmul.f32 0.2, %v667_v15 }
 0x20b   : > { %1351 = vrot.lane.b32.xlu1 %v5581_v3, %s5062_s29  ;;  %1553 = vrot.lane.b32.xlu0 %v5578_v2, %s5061_s27  ;;  %v661_v9 = vpop.f32.mrb[27].mxu0  ;;  %v670_v12 = vadd.f32 %v4483_v58, %v5404_v48 }
 0x20c   : > { %v4486_v17 = vpop.f32.mrb[28].mxu0  ;;  %v662_v35 = vadd.f32 %v5404_v48, %v661_v9 }
 0x20d   : > { %v5839_v41 = vpop.permute.xlu0 %1425  ;;  %v5841_v51 = vpop.permute.xlu1 %1629  ;;  %v683_v42 = vadd.f32 %v4486_v17, %v5404_v48  ;;  %v716_v58 = vmul.f32 0.2, %v670_v12 }
 0x20e   : > { %v714_v54 = vmul.f32 0.2, %v662_v35 }
 0x20f   : > { %1739 = vrot.lane.b32.xlu1 %v5844_v50, %s5063_s7  ;;  %1140 = vrot.lane.b32.xlu0 %v5809_v39, %s5061_s27  ;;  %v5864_v39 = vsel %vm1003_vm1, %v1029_v34, %v1030_v43  ;;  %v719_v57 = vmul.f32 0.2, %v683_v42 }
 0x210   : > { %7494 = vst [vmem:[#allocation59_spill] sm:$0xff] %v5864_v39  ;;  %v746_v53 = vmax.f32 %v662_v35, %v714_v54  ;;  %v4828_v35 = vadd.high.f32.bf16 %v5357_v20, %v5783_v29 }
 0x211   : > { %v5850_v3 = vpop.permute.xlu1 %1427  ;;  %v5852_v16 = vpop.permute.xlu0 %1421  ;;  %v751_v22 = vmax.f32 %v683_v42, %v719_v57 }
 0x213   : > { %1551 = vrot.lane.b32.xlu1 %v5575_v1, %s5061_s27  ;;  %1349 = vrot.lane.b32.xlu0 %v5578_v2, %s5062_s29  ;;  %v5871_v2 = vpop.f32.mrb[29].mxu0  ;;  %v5900_v42 = vrot.slane %v751_v22, 7 }
 0x214   : > { %v4487_v40 = vpop.f32.mrb[30].mxu0 }
 0x215   : > { %v5859_v10 = vpop.permute.xlu0 %1631  ;;  %v5861_v44 = vpop.permute.xlu1 %1423  ;;  %v686_v34 = vadd.f32 %v4487_v40, %v5404_v48  ;;  %v659_v40 = vadd.f32 %v5404_v48, %v658_v33 }
 0x216   : > { %v5881_v43 = vpop.f32.mrb[31].mxu0 }
 0x217   : > { %1138 = vrot.lane.b32.xlu1 %v5844_v50, %s5061_s27  ;;  %1737 = vrot.lane.b32.xlu0 %v5864_v39, %s5063_s7 }
 0x219   : > { %v5873_v18 = vpop.permute.xlu0 %1725  ;;  %v5875_v60 = vpop.permute.xlu1 %1727 }
 0x21b   : > { %1347 = vrot.lane.b32.xlu1 %v5575_v1, %s5062_s29  ;;  %1549 = vrot.lane.b32.xlu0 %v5572_v62, %s5061_s27  ;;  %v720_v1 = vmul.f32 0.2, %v686_v34 }
 0x21d   : > { %v5884_v50 = vpop.permute.xlu0 %1537  ;;  %v5886_v17 = vpop.permute.xlu1 %1539  ;;  %v752_v57 = vmax.f32 %v686_v34, %v720_v1  ;;  %v747_v34 = vmax.f32 %v667_v15, %v715_v8  ;;  %v748_v1 = vmax.f32 %v670_v12, %v716_v58  ;;  %v876_v12 = vrot.slane %v746_v53, 7 }
 0x21f   : > { %1655 = vrot.lane.b32.xlu1 %v5608_v36, %s5062_s29  ;;  %1136 = vrot.lane.b32.xlu0 %v5864_v39, %s5061_s27  ;;  %v5906_v9 = vrot.slane %v752_v57, 7  ;;  %v713_v39 = vmul.f32 0.2, %v659_v40  ;;  %v1047_v57 = vrot.slane %v5605_v13, 1  ;;  %v879_v15 = vrot.slane %v748_v1, 7 }
 0x220   : > { %v4829_v13 = vadd.low.f32.bf16 %v5361_v21, %v5783_v29  ;;  %v5942_v8 = vsel %vm836_vm0, %v876_v12, 0.0 }
 0x221   : > { %v5896_v61 = vpop.permute.xlu0 %1124  ;;  %v5898_v25 = vpop.permute.xlu1 %1126  ;;  %v5915_v22 = vsel %vm836_vm0, %v5900_v42, %v5906_v9 }
 0x222   : > { %7495 = vst [vmem:[#allocation60_spill] sm:$0xff] %v5898_v25  ;;  %v878_v25 = vrot.slane %v747_v34, 7  ;;  %v4830_v29 = vadd.low.f32.bf16 %v4829_v13, %v5820_v19  ;;  %v4831_v34 = vadd.high.f32.bf16 %v4828_v35, %v5820_v19 }
 0x223   : > { %1451 = vrot.lane.b32.xlu1 %v5608_v36, %s5063_s7  ;;  %1345 = vrot.lane.b32.xlu0 %v5572_v62, %s5062_s29  ;;  %v745_v62 = vmax.f32 %v659_v40, %v713_v39 }
 0x224   : > { %v5945_v58 = vsel %vm836_vm0, %v878_v25, %v879_v15 }
 0x225   : > { %v5908_v33 = vpop.permute.xlu0 %1333  ;;  %v5910_v5 = vpop.permute.xlu1 %1335  ;;  %v875_v54 = vrot.slane %v745_v62, 7  ;;  %v1044_v62 = vrot.slane %v5594_v32, 1 }
 0x226   : > { %7496 = vst [vmem:[#allocation61_spill] sm:$0xff] %v5908_v33  ;;  %7497 = vst [vmem:[#allocation62_spill] sm:$0xff] %v5910_v5  ;;  %v1045_v5 = vrot.slane %v5608_v36, 1 }
 0x227   : > { %1651 = vrot.lane.b32.xlu1 %v5618_v38, %s5062_s29  ;;  %1653 = vrot.lane.b32.xlu0 %v5594_v32, %s5062_s29  ;;  %v5967_v19 = vsel %vm836_vm0, %v875_v54, %v876_v12 }
 0x228   : > { %v1279_v35 = vrot.slane %v5967_v19, 2 }
 0x229   : > { %v1534_v31 = vpop.permute.xlu0 %1533  ;;  %v5922_v52 = vpop.permute.xlu1 %1122 }
 0x22a   : > { %v1597_v33 = vadd.f32 %v1534_v31, %v5602_v49  ;;  %v5937_v49 = vsel %vm1003_vm1, %v1045_v5, %v1047_v57  ;;  %v1281_v57 = vrot.slane %v5942_v8, 2 }
 0x22b   : > { %1447 = vrot.lane.b32.xlu1 %v5618_v38, %s5063_s7  ;;  %1449 = vrot.lane.b32.xlu0 %v5594_v32, %s5063_s7  ;;  %7498 = vst [vmem:[#allocation63_spill] sm:$0xff] %v5937_v49 }
 0x22c   : > { %v1693_v31 = vadd.f32 %v5841_v51, %v1597_v33 }
 0x22d   : > { %v1536_v39 = vpop.permute.xlu0 %1535  ;;  %v5934_v40 = vpop.permute.xlu1 %1331 }
 0x22e   : > { %v1598_v53 = vadd.f32 %v1536_v39, %v5546_v26  ;;  %v5955_v26 = vsel %vm836_vm0, 0.0, %v875_v54  ;;  %v1486_v39 = vadd.f32 %v4831_v34, %v5861_v44  ;;  %v1789_v20 = vadd.f32 %v5873_v18, %v1693_v31 }
 0x22f   : > { %1751 = vrot.lane.b32.xlu1 %v5937_v49, %s5063_s7  ;;  %1649 = vrot.lane.b32.xlu0 %v5597_v37, %s5062_s29  ;;  %v5977_v18 = vsel %vm836_vm0, %v879_v15, 0.0  ;;  %v5987_v31 = vsel %vm1212_vm2, %v1279_v35, %v1281_v57  ;;  %v1042_v57 = vrot.slane %v5621_v45, 1 }
 0x230   : > { %v1694_v51 = vadd.f32 %v5859_v10, %v1598_v53  ;;  %v1278_v10 = vrot.slane %v5955_v26, 2  ;;  %v1485_v53 = vadd.f32 %v4830_v29, %v5852_v16  ;;  %v1286_v15 = vrot.slane %v5977_v18, 2 }
 0x231   : > { %v5957_v33 = vpop.permute.xlu1 %1639  ;;  %v5959_v1 = vpop.permute.xlu0 %1120 }
 0x232   : > { %v1790_v13 = vadd.f32 %v5875_v60, %v1694_v51  ;;  %v5984_v54 = vsel %vm1212_vm2, %v1278_v10, %v1279_v35  ;;  %v1821_v34 = vpack.c.bf16 %v1486_v39, %v1485_v53  ;;  %v5990_v51 = vsel %vm1003_vm1, %v1044_v62, %v1045_v5 }
 0x233   : > { %1563 = vrot.lane.b32.xlu1 %v5636_v56, %s5061_s27  ;;  %1445 = vrot.lane.b32.xlu0 %v5597_v37, %s5063_s7  ;;  %7499 = vst [vmem:[#allocation64_spill] sm:$0xff] %v5990_v51  ;;  %v1856_v16 = vpack.c.bf16 %v5987_v31, %v5984_v54  ;;  %v1284_v62 = vrot.slane %v5945_v58, 2  ;;  %v1040_v39 = vrot.slane %v5618_v38, 1 }
 0x234   : > { %v1822_v44 = vpack.c.bf16 %v1790_v13, %v1789_v20  ;;  %v5993_v20 = vsel %vm836_vm0, 0.0, %v878_v25 }
 0x235   : > { %v5979_v60 = vpop.permute.xlu1 %1435  ;;  %v5981_v12 = vpop.permute.xlu0 %1329  ;;  %4525 = vmatmul.mubr.bf16.gmra.mrb[52].mxu0 %v1856_v16  ;;  %v1283_v25 = vrot.slane %v5993_v20, 2  ;;  %v6018_v10 = vsel %vm1212_vm2, %v1284_v62, %v1286_v15  ;;  %v1039_v16 = vrot.slane %v5597_v37, 1  ;;  %v675_v15 = vadd.f32 %v5404_v48, %v5871_v2 }
 0x236   : > { %2051 = vmatprep.mubr.bf16.mxu1 %v1822_v44  ;;  %v6027_v44 = vsel %vm1003_vm1, %v1040_v39, %v1042_v57 }
 0x237   : > { %1150 = vrot.lane.b32.xlu1 %v5937_v49, %s5061_s27  ;;  %1749 = vrot.lane.b32.xlu0 %v5990_v51, %s5063_s7  ;;  %v6015_v13 = vsel %vm1212_vm2, %v1283_v25, %v1284_v62  ;;  %v678_v25 = vadd.f32 %v5404_v48, %v5881_v43  ;;  %v717_v21 = vmul.f32 0.2, %v675_v15 }
 0x238   : > { %2052 = vmatmul.mubr.bf16.vlgmr.msra.gmra.mrb[0].mxu1 %v1821_v34  ;;  %v1859_v35 = vpack.c.bf16 %v6018_v10, %v6015_v13 }
 0x239   : > { %v6002_v29 = vpop.permute.xlu1 %1635  ;;  %v6004_v5 = vpop.permute.xlu0 %1637  ;;  %v718_v36 = vmul.f32 0.2, %v678_v25 }
 0x23a   : > { %4528 = vmatprep.mubr.bf16.mxu0 %v1859_v35  ;;  %v6049_v35 = vsel %vm1003_vm1, %v1039_v16, %v1040_v39 }
 0x23b   : > { %1359 = vrot.lane.b32.xlu1 %v5636_v56, %s5062_s29  ;;  %1561 = vrot.lane.b32.xlu0 %v5633_v4, %s5061_s27  ;;  %v750_v43 = vmax.f32 %v678_v25, %v718_v36 }
 0x23d   : > { %v6022_v53 = vpop.permute.xlu1 %1431  ;;  %v6024_v45 = vpop.permute.xlu0 %1433  ;;  %v882_v38 = vrot.slane %v750_v43, 7 }
 0x23f   : > { %1747 = vrot.lane.b32.xlu1 %v6027_v44, %s5063_s7  ;;  %1148 = vrot.lane.b32.xlu0 %v5990_v51, %s5061_s27  ;;  %v6083_v25 = vsel %vm836_vm0, %v882_v38, 0.0 }
 0x240   : > { %7500 = vst [vmem:[#allocation65_spill] sm:$0xff] %v6083_v25 }
 0x241   : > { %v6033_v56 = vpop.permute.xlu1 %1735  ;;  %v1634_v34 = vpop.permute.xlu0 %1633 }
 0x243   : > { %1559 = vrot.lane.b32.xlu1 %v5630_v59, %s5061_s27  ;;  %1357 = vrot.lane.b32.xlu0 %v5633_v4, %s5062_s29  ;;  %v749_v4 = vmax.f32 %v675_v15, %v717_v21  ;;  %v1182_v15 = vadd.f32 %v5959_v1, %v5428_v27  ;;  %v1599_v27 = vadd.f32 %v5884_v50, %v5462_v63  ;;  %v1057_v1 = vrot.slane %v5688_v30, 1 }
 0x244   : > { %v1055_v63 = vrot.slane %v5664_v7, 1 }
 0x245   : > { %v6044_v62 = vpop.permute.xlu1 %1547  ;;  %v6046_v57 = vpop.permute.xlu0 %1429  ;;  %v881_v32 = vrot.slane %v749_v4, 7  ;;  %v1183_v4 = vadd.f32 %v5922_v52, %v5432_v28  ;;  %v1391_v43 = vadd.f32 %v5981_v12, %v1182_v15  ;;  %v6103_v28 = vsel %vm836_vm0, %v5906_v9, 0.0 }
 0x246   : > { %v1529_v15 = vrot.slane %v6103_v28, 2 }
 0x247   : > { %1146 = vrot.lane.b32.xlu1 %v6027_v44, %s5061_s27  ;;  %1745 = vrot.lane.b32.xlu0 %v6049_v35, %s5063_s7  ;;  %v6091_v37 = vsel %vm836_vm0, 0.0, %v881_v32  ;;  %v1392_v52 = vadd.f32 %v5934_v40, %v1183_v4  ;;  %v1487_v9 = vadd.f32 %v5839_v41, %v1391_v43  ;;  %v1527_v43 = vrot.slane %v5915_v22, 2 }
 0x249   : > { %v6055_v48 = vpop.permute.xlu1 %1134  ;;  %v6057_v2 = vpop.permute.xlu0 %1733 }
 0x24b   : > { %1355 = vrot.lane.b32.xlu1 %v5630_v59, %s5062_s29  ;;  %1557 = vrot.lane.b32.xlu0 %v5627_v55, %s5061_s27  ;;  %v6074_v59 = vsel %vm836_vm0, %v881_v32, %v882_v38  ;;  %v6099_v38 = vsel %vm836_vm0, 0.0, %v5900_v42  ;;  %v1695_v32 = vadd.f32 %v1634_v34, %v1599_v27 }
 0x24c   : > { %7501 = vst [vmem:[#allocation66_spill] sm:$0xff] %v6099_v38  ;;  %v1289_v42 = vrot.slane %v6074_v59, 2  ;;  %v1526_v12 = vrot.slane %v6099_v38, 2  ;;  %v7526_v38 = vld [vmem:[#allocation51_spill] sm:$0xff] }
 0x24d   : > { %v6063_v39 = vpop.permute.xlu1 %1343  ;;  %v6065_v16 = vpop.permute.xlu0 %1545 }
 0x24f   : > { %1663 = vrot.lane.b32.xlu1 %v5664_v7, %s5062_s29  ;;  %1144 = vrot.lane.b32.xlu0 %v6049_v35, %s5061_s27 }
 0x251   : > { %v1732_v21 = vpop.permute.xlu1 %1731  ;;  %v6071_v36 = vpop.permute.xlu0 %1132 }
 0x253   : > { %1459 = vrot.lane.b32.xlu1 %v5664_v7, %s5063_s7  ;;  %1353 = vrot.lane.b32.xlu0 %v5627_v55, %s5062_s29  ;;  %v1600_v55 = vadd.f32 %v5886_v17, %v5465_v0  ;;  %v1291_v0 = vrot.slane %v6083_v25, 2  ;;  %v1288_v17 = vrot.slane %v6091_v37, 2 }
 0x255   : > { %v1544_v51 = vpop.permute.xlu1 %1543  ;;  %v6088_v49 = vpop.permute.xlu0 %1341  ;;  %v1696_v50 = vadd.f32 %v6002_v29, %v1600_v55  ;;  %v1488_v29 = vadd.f32 %v5850_v3, %v1392_v52  ;;  %v6128_v41 = vsel %vm1212_vm2, %v1288_v17, %v1289_v42  ;;  %v6131_v34 = vsel %vm1212_vm2, %v1289_v42, %v1291_v0  ;;  %v7506_v17 = vld [vmem:[#allocation61_spill] sm:$0xff] }
 0x256   : > { %v1602_v7 = vadd.f32 %v1544_v51, %v5726_v23  ;;  %v6135_v23 = vsel %vm1003_vm1, %v1055_v63, %v1057_v1  ;;  %v1862_v3 = vpack.c.bf16 %v6131_v34, %v6128_v41  ;;  %v1184_v51 = vadd.f32 %v5896_v61, %v5411_v6  ;;  %v7505_v6 = vld [vmem:[#allocation60_spill] sm:$0xff] }
 0x257   : > { %1659 = vrot.lane.b32.xlu1 %v5674_v47, %s5062_s29  ;;  %1661 = vrot.lane.b32.xlu0 %v5700_v24, %s5062_s29  ;;  %v1792_v4 = vadd.f32 %v1732_v21, %v1696_v50  ;;  %7502 = vst [vmem:[#allocation67_spill] sm:$0xff] %v6135_v23  ;;  %v1824_v52 = vpack.c.bf16 %v1488_v29, %v1487_v9  ;;  %v1054_v9 = vrot.slane %v5700_v24, 1 }
 0x258   : > { %v6144_v50 = vsel %vm1212_vm2, %v1526_v12, %v1527_v43  ;;  %v6147_v0 = vsel %vm1212_vm2, %v1527_v43, %v1529_v15  ;;  %4529 = vmatmul.mubr.bf16.gmra.mrb[56].mxu0 %v1862_v3  ;;  %v1185_v61 = vadd.f32 %v7505_v6, %v5422_v14  ;;  %v1393_v42 = vadd.f32 %v7506_v17, %v1184_v51  ;;  %v7508_v14 = vld [vmem:[#allocation45_spill] sm:$0xff] }
 0x259   : > { %v6117_v30 = vpop.permute.xlu1 %1130  ;;  %v1730_v40 = vpop.permute.xlu0 %1729  ;;  %7503 = vst [vmem:[#allocation68_spill] sm:$0xff] %v6144_v50  ;;  %7504 = vst [vmem:[#allocation69_spill] sm:$0xff] %v6147_v0  ;;  %v1049_v17 = vrot.slane %v5671_v46, 1 }
 0x25a   : > { %v1791_v25 = vadd.f32 %v1730_v40, %v1695_v32  ;;  %v1865_v32 = vpack.c.bf16 %v6147_v0, %v6144_v50  ;;  %v7507_v40 = vld [vmem:[#allocation62_spill] sm:$0xff]  ;;  %v1489_v15 = vadd.f32 %v6046_v57, %v1393_v42  ;;  %v6176_v57 = vsel %vm1003_vm1, %v1054_v9, %v1055_v63  ;;  %v7511_v63 = vld [vmem:[#allocation44_spill] sm:$0xff]  ;;  %v7513_v42 = vld [vmem:[#allocation41_spill] sm:$0xff] }
 0x25b   : > { %1455 = vrot.lane.b32.xlu1 %v5674_v47, %s5063_s7  ;;  %1457 = vrot.lane.b32.xlu0 %v5700_v24, %s5063_s7  ;;  %v1394_v12 = vadd.f32 %v7507_v40, %v1185_v61  ;;  %7509 = vst [vmem:[#allocation60_spill] sm:$0xff] %v6176_v57  ;;  %v7520_v24 = vld [vmem:[#allocation35_spill] sm:$0xff] }
 0x25c   : > { %v1825_v21 = vpack.c.bf16 %v1792_v4, %v1791_v25  ;;  %v1698_v25 = vadd.f32 %v5957_v33, %v1602_v7  ;;  %4532 = vmatprep.mubr.bf16.mxu0 %v1865_v32 }
 0x25d   : > { %v6141_v27 = vpop.permute.xlu1 %1339  ;;  %v1542_v55 = vpop.permute.xlu0 %1541 }
 0x25e   : > { %v1601_v1 = vadd.f32 %v1542_v55, %v5738_v11  ;;  %2059 = vmatprep.mubr.bf16.mxu1 %v1825_v21  ;;  %v1794_v4 = vadd.f32 %v6033_v56, %v1698_v25 }
 0x25f   : > { %1759 = vrot.lane.b32.xlu1 %v6135_v23, %s5063_s7  ;;  %1657 = vrot.lane.b32.xlu0 %v5671_v46, %s5062_s29 }
 0x260   : > { %v1697_v7 = vadd.f32 %v6004_v5, %v1601_v1  ;;  %2060 = vmatmul.mubr.bf16.gmra.mrb[4].mxu1 %v1824_v52  ;;  %v1490_v5 = vadd.f32 %v6022_v53, %v1394_v12  ;;  %v7510_v53 = vld [vmem:[#allocation39_spill] sm:$0xff]  ;;  %v1050_v52 = vrot.slane %v5674_v47, 1 }
 0x261   : > { %v6161_v11 = vpop.permute.xlu1 %1647  ;;  %v1129_v33 = vpop.permute.xlu0 %1128  ;;  %v1052_v55 = vrot.slane %v7510_v53, 1 }
 0x262   : > { %v1793_v29 = vadd.f32 %v6057_v2, %v1697_v7  ;;  %v1827_v51 = vpack.c.bf16 %v1490_v5, %v1489_v15  ;;  %v6213_v40 = vsel %vm1003_vm1, %v1049_v17, %v1050_v52  ;;  %v7516_v5 = vld [vmem:[#allocation47_spill] sm:$0xff] }
 0x263   : > { %1571 = vrot.lane.b32.xlu1 %v7508_v14, %s5061_s27  ;;  %1453 = vrot.lane.b32.xlu0 %v5671_v46, %s5063_s7  ;;  %v6195_v32 = vsel %vm1003_vm1, %v1050_v52, %v1052_v55  ;;  %7514 = vst [vmem:[#allocation62_spill] sm:$0xff] %v6213_v40  ;;  %v7518_v55 = vld [vmem:[#allocation24_spill] sm:$0xff]  ;;  %v7522_v46 = vld [vmem:[#allocation26_spill] sm:$0xff] }
 0x264   : > { %v1828_v43 = vpack.c.bf16 %v1794_v4, %v1793_v29  ;;  %7512 = vst [vmem:[#allocation61_spill] sm:$0xff] %v6195_v32  ;;  %v7515_v4 = vld [vmem:[#allocation40_spill] sm:$0xff]  ;;  %v1186_v52 = vadd.f32 %v1129_v33, %v7518_v55  ;;  %v1187_v50 = vadd.f32 %v6117_v30, %v7522_v46  ;;  %v7525_v33 = vld [vmem:[#allocation55_spill] sm:$0xff]  ;;  %v1065_v30 = vrot.slane %v7516_v5, 1 }
 0x265   : > { %v6173_v21 = vpop.permute.xlu1 %1443  ;;  %v1338_v3 = vpop.permute.xlu0 %1337 }
 0x266   : > { %2067 = vmatprep.mubr.bf16.mxu1 %v1828_v43  ;;  %v1395_v0 = vadd.f32 %v1338_v3, %v1186_v52 }
 0x267   : > { %1158 = vrot.lane.b32.xlu1 %v6135_v23, %s5061_s27  ;;  %1757 = vrot.lane.b32.xlu0 %v6176_v57, %s5063_s7  ;;  %v7521_v23 = vld [vmem:[#allocation42_spill] sm:$0xff] }
 0x268   : > { %2068 = vmatmul.mubr.bf16.gmra.mrb[8].mxu1 %v1827_v51  ;;  %v1603_v47 = vadd.f32 %v6065_v16, %v7521_v23  ;;  %v1067_v16 = vrot.slane %v7526_v38, 1  ;;  %v1491_v3 = vadd.f32 %v6024_v45, %v1395_v0  ;;  %v7529_v45 = vld [vmem:[#allocation23_spill] sm:$0xff] }
 0x269   : > { %v1644_v56 = vpop.permute.xlu1 %1643  ;;  %v6182_v2 = vpop.permute.xlu0 %1645  ;;  %v1188_v0 = vadd.f32 %v6071_v36, %v7529_v45 }
 0x26b   : > { %1367 = vrot.lane.b32.xlu1 %v7508_v14, %s5062_s29  ;;  %1569 = vrot.lane.b32.xlu0 %v7511_v63, %s5061_s27 }
 0x26d   : > { %v6190_v25 = vpop.permute.xlu1 %1439  ;;  %v6192_v1 = vpop.permute.xlu0 %1441 }
 0x26f   : > { %1755 = vrot.lane.b32.xlu1 %v6195_v32, %s5063_s7  ;;  %1156 = vrot.lane.b32.xlu0 %v6176_v57, %s5061_s27  ;;  %v1604_v57 = vadd.f32 %v6044_v62, %v7520_v24 }
 0x271   : > { %v6201_v6 = vpop.permute.xlu1 %1743  ;;  %v1642_v61 = vpop.permute.xlu0 %1641  ;;  %v1700_v24 = vadd.f32 %v1644_v56, %v1604_v57  ;;  %v6275_v57 = vsel %vm1003_vm1, %v1065_v30, %v1067_v16  ;;  %v1064_v16 = vrot.slane %v7525_v33, 1 }
 0x272   : > { %v1699_v62 = vadd.f32 %v1642_v61, %v1603_v47  ;;  %7528 = vst [vmem:[#allocation41_spill] sm:$0xff] %v6275_v57  ;;  %v7530_v61 = vld [vmem:[#allocation59_spill] sm:$0xff] }
 0x273   : > { %1567 = vrot.lane.b32.xlu1 %v7513_v42, %s5061_s27  ;;  %1365 = vrot.lane.b32.xlu0 %v7511_v63, %s5062_s29 }
 0x275   : > { %v6208_v7 = vpop.permute.xlu1 %1555  ;;  %v6210_v9 = vpop.permute.xlu0 %1437 }
 0x277   : > { %1154 = vrot.lane.b32.xlu1 %v6195_v32, %s5061_s27  ;;  %1753 = vrot.lane.b32.xlu0 %v6213_v40, %s5063_s7 }
 0x279   : > { %v6219_v12 = vpop.permute.xlu1 %1142  ;;  %v1742_v15 = vpop.permute.xlu0 %1741 }
 0x27b   : > { %1363 = vrot.lane.b32.xlu1 %v7513_v42, %s5062_s29  ;;  %1565 = vrot.lane.b32.xlu0 %v7515_v4, %s5061_s27 }
 0x27d   : > { %v6225_v29 = vpop.permute.xlu1 %1351  ;;  %v6227_v14 = vpop.permute.xlu0 %1553 }
 0x27f   : > { %1671 = vrot.lane.b32.xlu1 %v7516_v5, %s5062_s29  ;;  %1152 = vrot.lane.b32.xlu0 %v6213_v40, %s5061_s27  ;;  %v6239_v53 = vpop.f32.mrb[32].mxu0 }
 0x280   : > { %7517 = vst [vmem:[#allocation45_spill] sm:$0xff] %v6239_v53  ;;  %v6242_v63 = vpop.f32.mrb[33].mxu0  ;;  %v7524_v53 = vld [vmem:[#allocation49_spill] sm:$0xff] }
 0x281   : > { %v1740_v43 = vpop.permute.xlu1 %1739  ;;  %v6233_v51 = vpop.permute.xlu0 %1140  ;;  %7519 = vst [vmem:[#allocation39_spill] sm:$0xff] %v6242_v63  ;;  %v1396_v63 = vadd.f32 %v6141_v27, %v1187_v50 }
 0x282   : > { %v1796_v52 = vadd.f32 %v1740_v43, %v1700_v24  ;;  %v1397_v24 = vadd.f32 %v6088_v49, %v1188_v0  ;;  %v7536_v49 = vld [vmem:[#allocation57_spill] sm:$0xff] }
 0x283   : > { %1467 = vrot.lane.b32.xlu1 %v7516_v5, %s5063_s7  ;;  %1361 = vrot.lane.b32.xlu0 %v7515_v4, %s5062_s29  ;;  %v6252_v4 = vpop.f32.mrb[34].mxu0  ;;  %v1492_v47 = vadd.f32 %v5979_v60, %v1396_v63  ;;  %v7531_v60 = vld [vmem:[#allocation48_spill] sm:$0xff]  ;;  %v7533_v63 = vld [vmem:[#allocation25_spill] sm:$0xff]  ;;  %v7552_v5 = vld [vmem:[#allocation46_spill] sm:$0xff] }
 0x284   : > { %7523 = vst [vmem:[#allocation44_spill] sm:$0xff] %v6252_v4  ;;  %v6258_v55 = vpop.f32.mrb[35].mxu0  ;;  %v7527_v4 = vld [vmem:[#allocation58_spill] sm:$0xff] }
 0x285   : > { %v1552_v17 = vpop.permute.xlu1 %1551  ;;  %v6244_v42 = vpop.permute.xlu0 %1349 }
 0x286   : > { %v1606_v40 = vadd.f32 %v1552_v17, %v7527_v4  ;;  %v1830_v17 = vpack.c.bf16 %v1492_v47, %v1491_v3  ;;  %v1189_v4 = vadd.f32 %v6055_v48, %v7533_v63  ;;  %v1493_v3 = vadd.f32 %v6210_v9, %v1397_v24 }
 0x287   : > { %1667 = vrot.lane.b32.xlu1 %v7524_v53, %s5062_s29  ;;  %1669 = vrot.lane.b32.xlu0 %v7525_v33, %s5062_s29 }
 0x288   : > { %v1702_v56 = vadd.f32 %v6161_v11, %v1606_v40 }
 0x289   : > { %v6262_v23 = vpop.permute.xlu1 %1138  ;;  %v1738_v46 = vpop.permute.xlu0 %1737 }
 0x28a   : > { %v1795_v32 = vadd.f32 %v1738_v46, %v1699_v62  ;;  %v1398_v46 = vadd.f32 %v6063_v39, %v1189_v4 }
 0x28b   : > { %1463 = vrot.lane.b32.xlu1 %v7524_v53, %s5063_s7  ;;  %1465 = vrot.lane.b32.xlu0 %v7525_v33, %s5063_s7  ;;  %v7553_v33 = vld [vmem:[#allocation54_spill] sm:$0xff] }
 0x28c   : > { %v1831_v38 = vpack.c.bf16 %v1796_v52, %v1795_v32  ;;  %v6285_v32 = vpop.f32.mrb[36].mxu0  ;;  %v1798_v52 = vadd.f32 %v6201_v6, %v1702_v56  ;;  %v6311_v6 = vsel %vm1003_vm1, %v1064_v16, %v1065_v30  ;;  %v7540_v56 = vld [vmem:[#allocation50_spill] sm:$0xff]  ;;  %v7542_v30 = vld [vmem:[#allocation56_spill] sm:$0xff] }
 0x28d   : > { %v6272_v27 = vpop.permute.xlu1 %1347  ;;  %v1550_v50 = vpop.permute.xlu0 %1549  ;;  %7532 = vst [vmem:[#allocation40_spill] sm:$0xff] %v6285_v32  ;;  %7538 = vst [vmem:[#allocation26_spill] sm:$0xff] %v6311_v6 }
 0x28e   : > { %v1605_v43 = vadd.f32 %v1550_v50, %v7530_v61  ;;  %2075 = vmatprep.mubr.bf16.mxu1 %v1831_v38  ;;  %v6291_v11 = vpop.f32.mrb[37].mxu0  ;;  %v1494_v38 = vadd.f32 %v6190_v25, %v1398_v46  ;;  %v1062_v61 = vrot.slane %v7540_v56, 1 }
 0x28f   : > { %1767 = vrot.lane.b32.xlu1 %v6275_v57, %s5063_s7  ;;  %1665 = vrot.lane.b32.xlu0 %v7531_v60, %s5062_s29  ;;  %7534 = vst [vmem:[#allocation24_spill] sm:$0xff] %v6291_v11  ;;  %v6299_v48 = vpop.f32.mrb[38].mxu0  ;;  %v1607_v11 = vadd.f32 %v6227_v14, %v7553_v33 }
 0x290   : > { %v1701_v36 = vadd.f32 %v6182_v2, %v1605_v43  ;;  %2076 = vmatmul.mubr.bf16.gmra.mrb[12].mxu1 %v1830_v17  ;;  %7535 = vst [vmem:[#allocation35_spill] sm:$0xff] %v6299_v48  ;;  %v6305_v2 = vpop.f32.mrb[39].mxu0  ;;  %v1833_v9 = vpack.c.bf16 %v1494_v38, %v1493_v3  ;;  %v1060_v43 = vrot.slane %v7524_v53, 1 }
 0x291   : > { %v6293_v40 = vpop.permute.xlu1 %1655  ;;  %v1137_v62 = vpop.permute.xlu0 %1136  ;;  %7537 = vst [vmem:[#allocation42_spill] sm:$0xff] %v6305_v2  ;;  %v1075_v2 = vrot.slane %v5945_v58, 1 }
 0x292   : > { %v1797_v47 = vadd.f32 %v1742_v15, %v1701_v36  ;;  %v6338_v16 = vsel %vm1003_vm1, %v1060_v43, %v1062_v61  ;;  %v7546_v61 = vld [vmem:[#allocation52_spill] sm:$0xff] }
 0x293   : > { %1579 = vrot.lane.b32.xlu1 %v7536_v49, %s5061_s27  ;;  %1461 = vrot.lane.b32.xlu0 %v7531_v60, %s5063_s7  ;;  %v6317_v15 = vpop.f32.mrb[40].mxu0 }
 0x294   : > { %v1834_v50 = vpack.c.bf16 %v1798_v52, %v1797_v47  ;;  %7539 = vst [vmem:[#allocation51_spill] sm:$0xff] %v6317_v15  ;;  %v6323_v17 = vpop.f32.mrb[41].mxu0  ;;  %v1059_v52 = vrot.slane %v7531_v60, 1  ;;  %v7545_v47 = vld [vmem:[#allocation53_spill] sm:$0xff] }
 0x295   : > { %v6308_v45 = vpop.permute.xlu1 %1451  ;;  %v1346_v39 = vpop.permute.xlu0 %1345  ;;  %7541 = vst [vmem:[#allocation58_spill] sm:$0xff] %v6323_v17 }
 0x296   : > { %2083 = vmatprep.mubr.bf16.mxu1 %v1834_v50  ;;  %v6329_v63 = vpop.f32.mrb[42].mxu0  ;;  %v6356_v50 = vsel %vm1003_vm1, %v1059_v52, %v1060_v43 }
 0x297   : > { %1166 = vrot.lane.b32.xlu1 %v6275_v57, %s5061_s27  ;;  %1765 = vrot.lane.b32.xlu0 %v6311_v6, %s5063_s7  ;;  %7543 = vst [vmem:[#allocation23_spill] sm:$0xff] %v6329_v63  ;;  %v6331_v4 = vpop.f32.mrb[43].mxu0 }
 0x298   : > { %2084 = vmatmul.mubr.bf16.gmra.mrb[16].mxu1 %v1833_v9  ;;  %7544 = vst [vmem:[#allocation59_spill] sm:$0xff] %v6331_v4 }
 0x299   : > { %v1652_v0 = vpop.permute.xlu1 %1651  ;;  %v6319_v25 = vpop.permute.xlu0 %1653 }
 0x29b   : > { %1375 = vrot.lane.b32.xlu1 %v7536_v49, %s5062_s29  ;;  %1577 = vrot.lane.b32.xlu0 %v7542_v30, %s5061_s27 }
 0x29d   : > { %v6333_v24 = vpop.permute.xlu1 %1447  ;;  %v6335_v36 = vpop.permute.xlu0 %1449 }
 0x29f   : > { %1763 = vrot.lane.b32.xlu1 %v6338_v16, %s5063_s7  ;;  %1164 = vrot.lane.b32.xlu0 %v6311_v6, %s5061_s27  ;;  %v7554_v6 = vld [vmem:[#allocation30_spill] sm:$0xff] }
 0x2a0   : > { %v1191_v53 = vadd.f32 %v6262_v23, %v7554_v6 }
 0x2a1   : > { %v6344_v46 = vpop.permute.xlu1 %1751  ;;  %v1650_v3 = vpop.permute.xlu0 %1649 }
 0x2a3   : > { %1575 = vrot.lane.b32.xlu1 %v7545_v47, %s5061_s27  ;;  %1373 = vrot.lane.b32.xlu0 %v7542_v30, %s5062_s29  ;;  %v6370_v30 = vpop.f32.mrb[44].mxu0 }
 0x2a4   : > { %7547 = vst [vmem:[#allocation48_spill] sm:$0xff] %v6370_v30  ;;  %v6372_v43 = vpop.f32.mrb[45].mxu0  ;;  %v7551_v30 = vld [vmem:[#allocation28_spill] sm:$0xff] }
 0x2a5   : > { %v6351_v49 = vpop.permute.xlu1 %1563  ;;  %v6353_v38 = vpop.permute.xlu0 %1445  ;;  %7548 = vst [vmem:[#allocation25_spill] sm:$0xff] %v6372_v43  ;;  %v1190_v43 = vadd.f32 %v1137_v62, %v7551_v30 }
 0x2a6   : > { %v6378_v15 = vpop.f32.mrb[46].mxu0 }
 0x2a7   : > { %1162 = vrot.lane.b32.xlu1 %v6338_v16, %s5061_s27  ;;  %1761 = vrot.lane.b32.xlu0 %v6356_v50, %s5063_s7  ;;  %7549 = vst [vmem:[#allocation57_spill] sm:$0xff] %v6378_v15  ;;  %v1077_v15 = vrot.slane %v5977_v18, 1  ;;  %v1399_v57 = vadd.f32 %v1346_v39, %v1190_v43  ;;  %v1400_v18 = vadd.f32 %v6272_v27, %v1191_v53 }
 0x2a9   : > { %v6362_v9 = vpop.permute.xlu1 %1150  ;;  %v6364_v56 = vpop.permute.xlu0 %1749  ;;  %v1495_v14 = vadd.f32 %v6192_v1, %v1399_v57  ;;  %v1496_v53 = vadd.f32 %v6173_v21, %v1400_v18  ;;  %v1070_v1 = vrot.slane %v5967_v19, 1  ;;  %v1074_v57 = vrot.slane %v5993_v20, 1 }
 0x2ab   : > { %1371 = vrot.lane.b32.xlu1 %v7545_v47, %s5062_s29  ;;  %1573 = vrot.lane.b32.xlu0 %v7546_v61, %s5061_s27  ;;  %v6384_v47 = vpop.f32.mrb[47].mxu0  ;;  %v6443_v18 = vsel %vm1003_vm1, %v1074_v57, %v1075_v2 }
 0x2ac   : > { %7550 = vst [vmem:[#allocation50_spill] sm:$0xff] %v6384_v47  ;;  %v1608_v47 = vadd.f32 %v6208_v7, %v7552_v5  ;;  %v6411_v5 = vsel %vm1003_vm1, %v1075_v2, %v1077_v15 }
 0x2ad   : > { %v6374_v52 = vpop.permute.xlu1 %1359  ;;  %v6376_v63 = vpop.permute.xlu0 %1561 }
 0x2ae   : > { %v1704_v62 = vadd.f32 %v1652_v0, %v1608_v47 }
 0x2af   : > { %1679 = vrot.lane.b32.xlu1 %v5945_v58, %s5062_s29  ;;  %1160 = vrot.lane.b32.xlu0 %v6356_v50, %s5061_s27 }
 0x2b1   : > { %v1748_v4 = vpop.permute.xlu1 %1747  ;;  %v6386_v17 = vpop.permute.xlu0 %1148 }
 0x2b2   : > { %v1800_v33 = vadd.f32 %v1748_v4, %v1704_v62 }
 0x2b3   : > { %1675 = vrot.lane.b32.xlu1 %v5967_v19, %s5062_s29  ;;  %1369 = vrot.lane.b32.xlu0 %v7546_v61, %s5062_s29  ;;  %v1703_v61 = vadd.f32 %v1650_v3, %v1607_v11  ;;  %v1072_v11 = vrot.slane %v5942_v8, 1  ;;  %v1836_v3 = vpack.c.bf16 %v1496_v53, %v1495_v14  ;;  %v7556_v8 = vld [vmem:[#allocation29_spill] sm:$0xff] }
 0x2b4   : > { %v1193_v21 = vadd.f32 %v6219_v12, %v7556_v8 }
 0x2b5   : > { %v1560_v48 = vpop.permute.xlu1 %1559  ;;  %v6394_v32 = vpop.permute.xlu0 %1357 }
 0x2b6   : > { %v1610_v23 = vadd.f32 %v1560_v48, %v6027_v44  ;;  %v7555_v44 = vld [vmem:[#allocation27_spill] sm:$0xff]  ;;  %v1402_v62 = vadd.f32 %v6225_v29, %v1193_v21  ;;  %v1069_v29 = vrot.slane %v5955_v26, 1 }
 0x2b7   : > { %1471 = vrot.lane.b32.xlu1 %v5967_v19, %s5063_s7  ;;  %1677 = vrot.lane.b32.xlu0 %v5993_v20, %s5062_s29  ;;  %v1192_v48 = vadd.f32 %v6233_v51, %v7555_v44 }
 0x2b8   : > { %v1706_v0 = vadd.f32 %v6293_v40, %v1610_v23 }
 0x2b9   : > { %v6408_v30 = vpop.permute.xlu1 %1146  ;;  %v1746_v7 = vpop.permute.xlu0 %1745  ;;  %v1401_v43 = vadd.f32 %v6244_v42, %v1192_v48 }
 0x2ba   : > { %v1799_v39 = vadd.f32 %v1746_v7, %v1703_v61  ;;  %v1802_v12 = vadd.f32 %v6344_v46, %v1706_v0  ;;  %v1079_v0 = vrot.slane %v6091_v37, 1 }
 0x2bb   : > { %1775 = vrot.lane.b32.xlu1 %v6411_v5, %s5063_s7  ;;  %1673 = vrot.lane.b32.xlu0 %v5955_v26, %s5062_s29  ;;  %v1497_v61 = vadd.f32 %v6353_v38, %v1401_v43 }
 0x2bc   : > { %v1837_v27 = vpack.c.bf16 %v1800_v33, %v1799_v39  ;;  %v7557_v39 = vld [vmem:[#allocation65_spill] sm:$0xff] }
 0x2bd   : > { %v6421_v6 = vpop.permute.xlu1 %1355  ;;  %v1558_v15 = vpop.permute.xlu0 %1557  ;;  %v1082_v53 = vrot.slane %v7557_v39, 1  ;;  %v7564_v39 = vld [vmem:[#allocation64_spill] sm:$0xff] }
 0x2be   : > { %v1609_v4 = vadd.f32 %v1558_v15, %v6049_v35  ;;  %2091 = vmatprep.mubr.bf16.mxu1 %v1837_v27  ;;  %v6440_v35 = vsel %vm1003_vm1, %v1070_v1, %v1072_v11  ;;  %v1080_v27 = vrot.slane %v6074_v59, 1 }
 0x2bf   : > { %1587 = vrot.lane.b32.xlu1 %v6018_v10, %s5061_s27  ;;  %1469 = vrot.lane.b32.xlu0 %v5955_v26, %s5063_s7 }
 0x2c0   : > { %v1705_v47 = vadd.f32 %v6319_v25, %v1609_v4  ;;  %2092 = vmatmul.mubr.bf16.gmra.mrb[20].mxu1 %v1836_v3  ;;  %v1498_v25 = vadd.f32 %v6333_v24, %v1402_v62  ;;  %v6464_v24 = vsel %vm1003_vm1, %v1069_v29, %v1070_v1  ;;  %v6487_v1 = vsel %vm1003_vm1, %v1080_v27, %v1082_v53 }
 0x2c1   : > { %v6437_v51 = vpop.permute.xlu1 %1663  ;;  %v1145_v40 = vpop.permute.xlu0 %1144  ;;  %v1611_v53 = vadd.f32 %v6376_v63, %v7564_v39  ;;  %v1520_v63 = vrot.slane %v5915_v22, 1 }
 0x2c2   : > { %v1801_v42 = vadd.f32 %v6364_v56, %v1705_v47  ;;  %v1839_v33 = vpack.c.bf16 %v1498_v25, %v1497_v61 }
 0x2c3   : > { %1771 = vrot.lane.b32.xlu1 %v6440_v35, %s5063_s7  ;;  %1773 = vrot.lane.b32.xlu0 %v6443_v18, %s5063_s7 }
 0x2c4   : > { %v1840_v7 = vpack.c.bf16 %v1802_v12, %v1801_v42  ;;  %v7562_v12 = vld [vmem:[#allocation32_spill] sm:$0xff] }
 0x2c5   : > { %v6454_v14 = vpop.permute.xlu1 %1459  ;;  %v1354_v2 = vpop.permute.xlu0 %1353  ;;  %v1194_v42 = vadd.f32 %v1145_v40, %v7562_v12 }
 0x2c6   : > { %2099 = vmatprep.mubr.bf16.mxu1 %v1840_v7 }
 0x2c7   : > { %1583 = vrot.lane.b32.xlu1 %v5987_v31, %s5061_s27  ;;  %1585 = vrot.lane.b32.xlu0 %v6015_v13, %s5061_s27 }
 0x2c8   : > { %2100 = vmatmul.mubr.bf16.gmra.mrb[24].mxu1 %v1839_v33  ;;  %v7563_v33 = vld [vmem:[#allocation63_spill] sm:$0xff] }
 0x2c9   : > { %v1660_v46 = vpop.permute.xlu1 %1659  ;;  %v6461_v38 = vpop.permute.xlu0 %1661  ;;  %v1612_v29 = vadd.f32 %v6351_v49, %v7563_v33 }
 0x2cb   : > { %1170 = vrot.lane.b32.xlu1 %v6440_v35, %s5061_s27  ;;  %1769 = vrot.lane.b32.xlu0 %v6464_v24, %s5063_s7  ;;  %v1708_v12 = vadd.f32 %v1660_v46, %v1612_v29 }
 0x2cd   : > { %v6470_v56 = vpop.permute.xlu1 %1455  ;;  %v6472_v23 = vpop.permute.xlu0 %1457 }
 0x2cf   : > { %1379 = vrot.lane.b32.xlu1 %v5987_v31, %s5062_s29  ;;  %1581 = vrot.lane.b32.xlu0 %v5984_v54, %s5061_s27 }
 0x2d1   : > { %v6480_v11 = vpop.permute.xlu1 %1759  ;;  %v1658_v15 = vpop.permute.xlu0 %1657 }
 0x2d3   : > { %1683 = vrot.lane.b32.xlu1 %v6074_v59, %s5062_s29  ;;  %1168 = vrot.lane.b32.xlu0 %v6464_v24, %s5061_s27 }
 0x2d5   : > { %v6489_v31 = vpop.permute.xlu1 %1571  ;;  %v6491_v57 = vpop.permute.xlu0 %1453 }
 0x2d6   : > { %v6504_v4 = vpop.f32.mrb[48].mxu0 }
 0x2d7   : > { %1779 = vrot.lane.b32.xlu1 %v6487_v1, %s5063_s7  ;;  %1377 = vrot.lane.b32.xlu0 %v5984_v54, %s5062_s29  ;;  %7558 = vst [vmem:[#allocation56_spill] sm:$0xff] %v6504_v4  ;;  %v6506_v3 = vpop.f32.mrb[49].mxu0  ;;  %v6513_v54 = vsel %vm1003_vm1, %v1079_v0, %v1080_v27  ;;  %v7565_v27 = vld [vmem:[#allocation34_spill] sm:$0xff]  ;;  %v1707_v4 = vadd.f32 %v1658_v15, %v1611_v53  ;;  %v7570_v53 = vld [vmem:[#allocation33_spill] sm:$0xff] }
 0x2d8   : > { %7559 = vst [vmem:[#allocation53_spill] sm:$0xff] %v6506_v3  ;;  %v6515_v43 = vpop.f32.mrb[50].mxu0  ;;  %v1195_v0 = vadd.f32 %v6408_v30, %v7565_v27  ;;  %v7593_v3 = vld [vmem:[#allocation60_spill] sm:$0xff] }
 0x2d9   : > { %v6497_v44 = vpop.permute.xlu1 %1158  ;;  %v1758_v48 = vpop.permute.xlu0 %1757  ;;  %7560 = vst [vmem:[#allocation52_spill] sm:$0xff] %v6515_v43  ;;  %v1403_v43 = vadd.f32 %v1354_v2, %v1194_v42  ;;  %v7566_v42 = vld [vmem:[#allocation61_spill] sm:$0xff] }
 0x2da   : > { %v6521_v47 = vpop.f32.mrb[51].mxu0  ;;  %v1404_v40 = vadd.f32 %v6421_v6, %v1195_v0  ;;  %v1197_v0 = vadd.f32 %v6362_v9, %v7570_v53 }
 0x2db   : > { %1475 = vrot.lane.b32.xlu1 %v5945_v58, %s5063_s7  ;;  %1681 = vrot.lane.b32.xlu0 %v6091_v37, %s5062_s29  ;;  %7561 = vst [vmem:[#allocation28_spill] sm:$0xff] %v6521_v47  ;;  %v1522_v47 = vrot.slane %v6103_v28, 1  ;;  %v1499_v30 = vadd.f32 %v6335_v36, %v1403_v43  ;;  %v7567_v36 = vld [vmem:[#allocation31_spill] sm:$0xff] }
 0x2dc   : > { %v1500_v6 = vadd.f32 %v6308_v45, %v1404_v40  ;;  %v1196_v43 = vadd.f32 %v6386_v17, %v7567_v36  ;;  %v7569_v45 = vld [vmem:[#allocation66_spill] sm:$0xff] }
 0x2dd   : > { %v6508_v8 = vpop.permute.xlu1 %1367  ;;  %v6510_v21 = vpop.permute.xlu0 %1569  ;;  %v6557_v29 = vsel %vm1003_vm1, %v1520_v63, %v1522_v47 }
 0x2de   : > { %v1405_v47 = vadd.f32 %v6394_v32, %v1196_v43 }
 0x2df   : > { %1591 = vrot.lane.b32.xlu1 %v6131_v34, %s5061_s27  ;;  %1777 = vrot.lane.b32.xlu0 %v6513_v54, %s5063_s7 }
 0x2e1   : > { %v1756_v62 = vpop.permute.xlu1 %1755  ;;  %v6523_v61 = vpop.permute.xlu0 %1156 }
 0x2e2   : > { %v1804_v2 = vadd.f32 %v1756_v62, %v1708_v12  ;;  %v7568_v62 = vld [vmem:[#allocation62_spill] sm:$0xff]  ;;  %v1519_v12 = vrot.slane %v7569_v45, 1 }
 0x2e3   : > { %1174 = vrot.lane.b32.xlu1 %v6411_v5, %s5061_s27  ;;  %1473 = vrot.lane.b32.xlu0 %v5993_v20, %s5063_s7 }
 0x2e5   : > { %v1568_v25 = vpop.permute.xlu1 %1567  ;;  %v6530_v7 = vpop.permute.xlu0 %1365 }
 0x2e6   : > { %v1614_v39 = vadd.f32 %v1568_v25, %v7566_v42 }
 0x2e7   : > { %1687 = vrot.lane.b32.xlu1 %v5915_v22, %s5062_s29  ;;  %1589 = vrot.lane.b32.xlu0 %v6128_v41, %s5061_s27 }
 0x2e9   : > { %v6544_v49 = vpop.permute.xlu1 %1154  ;;  %v1754_v33 = vpop.permute.xlu0 %1753 }
 0x2ea   : > { %v1803_v27 = vadd.f32 %v1754_v33, %v1707_v4  ;;  %v1710_v4 = vadd.f32 %v6437_v51, %v1614_v39  ;;  %v1406_v33 = vadd.f32 %v6374_v52, %v1197_v0  ;;  %v6585_v52 = vsel %vm1003_vm1, %v1519_v12, %v1520_v63 }
 0x2eb   : > { %1383 = vrot.lane.b32.xlu1 %v6018_v10, %s5062_s29  ;;  %1172 = vrot.lane.b32.xlu0 %v6443_v18, %s5061_s27  ;;  %v1842_v10 = vpack.c.bf16 %v1500_v6, %v1499_v30  ;;  %v1501_v30 = vadd.f32 %v6491_v57, %v1405_v47  ;;  %v7572_v57 = vld [vmem:[#allocation21_spill] sm:$0xff] }
 0x2ec   : > { %v1843_v28 = vpack.c.bf16 %v1804_v2, %v1803_v27  ;;  %v1806_v2 = vadd.f32 %v6480_v11, %v1710_v4  ;;  %v1502_v32 = vadd.f32 %v6470_v56, %v1406_v33  ;;  %v7571_v11 = vld [vmem:[#allocation69_spill] sm:$0xff]  ;;  %v7575_v4 = vld [vmem:[#allocation20_spill] sm:$0xff] }
 0x2ed   : > { %v6554_v46 = vpop.permute.xlu1 %1363  ;;  %v1566_v15 = vpop.permute.xlu0 %1565  ;;  %v6629_v33 = vld [vmem:[%s7352_s5 + $0x1] ss:$0 sm:$0xff] }
 0x2ee   : > { %v1613_v25 = vadd.f32 %v1566_v15, %v7568_v62  ;;  %2107 = vmatprep.mubr.bf16.mxu1 %v1843_v28  ;;  %v1845_v27 = vpack.c.bf16 %v1502_v32, %v1501_v30  ;;  %v7574_v15 = vld [vmem:[#allocation68_spill] sm:$0xff]  ;;  %v7576_v62 = vld [vmem:[#allocation18_spill] sm:$0xff] }
 0x2ef   : > { %1783 = vrot.lane.b32.xlu1 %v6557_v29, %s5063_s7  ;;  %1685 = vrot.lane.b32.xlu0 %v7569_v45, %s5062_s29 }
 0x2f0   : > { %v1709_v40 = vadd.f32 %v6461_v38, %v1613_v25  ;;  %2108 = vmatmul.mubr.bf16.gmra.mrb[28].mxu1 %v1842_v10  ;;  %v7577_v25 = vld [vmem:[#allocation17_spill] sm:$0xff] }
 0x2f1   : > { %v6571_v17 = vpop.permute.xlu1 %1671  ;;  %v1153_v51 = vpop.permute.xlu0 %1152  ;;  %v4705_v10 = vpack.i.bf16 %v7577_v25, %v7576_v62 }
 0x2f2   : > { %v1805_v42 = vadd.f32 %v1758_v48, %v1709_v40 }
 0x2f3   : > { %1479 = vrot.lane.b32.xlu1 %v6074_v59, %s5063_s7  ;;  %1381 = vrot.lane.b32.xlu0 %v6015_v13, %s5062_s29  ;;  %v7573_v13 = vld [vmem:[#allocation22_spill] sm:$0xff] }
 0x2f4   : > { %v1846_v9 = vpack.c.bf16 %v1806_v2, %v1805_v42  ;;  %v1868_v48 = vpack.c.bf16 %v7573_v13, %v7572_v57  ;;  %v7581_v13 = vld [vmem:[#allocation19_spill] sm:$0xff] }
 0x2f5   : > { %v6582_v38 = vpop.permute.xlu1 %1467  ;;  %v1362_v39 = vpop.permute.xlu0 %1361 }
 0x2f6   : > { %2115 = vmatprep.mubr.bf16.mxu1 %v1846_v9  ;;  %4533 = vmatmul.mubr.bf16.gmra.mrb[60].mxu0 %v1868_v48  ;;  %v7582_v48 = vrot.slane %v7581_v13, 1 }
 0x2f7   : > { %1595 = vrot.lane.b32.xlu1 %v7571_v11, %s5061_s27  ;;  %1781 = vrot.lane.b32.xlu0 %v6585_v52, %s5063_s7 }
 0x2f8   : > { %2116 = vmatmul.mubr.bf16.gmra.mrb[32].mxu1 %v1845_v27 }
 0x2f9   : > { %v1668_v56 = vpop.permute.xlu1 %1667  ;;  %v6593_v6 = vpop.permute.xlu0 %1669 }
 0x2fb   : > { %1178 = vrot.lane.b32.xlu1 %v6487_v1, %s5061_s27  ;;  %1477 = vrot.lane.b32.xlu0 %v6091_v37, %s5063_s7 }
 0x2fd   : > { %v6599_v63 = vpop.permute.xlu1 %1463  ;;  %v6601_v28 = vpop.permute.xlu0 %1465 }
 0x2ff   : > { %1385 = vrot.lane.b32.xlu1 %v6128_v41, %s5062_s29  ;;  %1593 = vrot.lane.b32.xlu0 %v7574_v15, %s5061_s27  ;;  %v7583_v15 = vrot.slane %v7576_v62, 1 }
 0x301   : > { %v6607_v36 = vpop.permute.xlu1 %1767  ;;  %v1666_v43 = vpop.permute.xlu0 %1665 }
 0x303   : > { %4711 = vrot.lane.b32.xlu1 %v7575_v4, %s5063_s7  ;;  %1176 = vrot.lane.b32.xlu0 %v6513_v54, %s5061_s27  ;;  %v6647_v4 = vsel %vm1003_vm1, %v7583_v15, %v7582_v48  ;;  %v7588_v48 = vrot.slane %v7581_v13, 2  ;;  %v7589_v15 = vrot.slane %v7576_v62, 2 }
 0x304   : > { %7584 = vst [vmem:[#allocation27_spill] sm:$0xff] %v6647_v4 }
 0x305   : > { %v6615_v53 = vpop.permute.xlu1 %1579  ;;  %v1462_v0 = vpop.permute.xlu0 %1461 }
 0x307   : > { %1483 = vrot.lane.b32.xlu1 %v5915_v22, %s5063_s7  ;;  %4706 = vrot.lane.b32.xlu0 %v4705_v10, %s5062_s29  ;;  %v7586_v10 = vld [vmem:[#allocation39_spill] sm:$0xff] }
 0x308   : > { %v6624_v12 = vpop.f32.mrb[52].mxu0 }
 0x309   : > { %v6620_v41 = vpop.permute.xlu1 %1166  ;;  %v1766_v47 = vpop.permute.xlu0 %1765  ;;  %7578 = vst [vmem:[#allocation46_spill] sm:$0xff] %v6624_v12 }
 0x30a   : > { %v6631_v2 = vpop.f32.mrb[53].mxu0 }
 0x30b   : > { %v4176_v40 = vpop.f32.mrb[0].mxu1  ;;  %1387 = vrot.lane.b32.xlu0 %v6131_v34, %s5062_s29  ;;  %7579 = vst [vmem:[#allocation54_spill] sm:$0xff] %v6631_v2  ;;  %v6640_v57 = vpop.f32.mrb[54].mxu0 }
 0x30c   : > { %v4177_v30 = vpop.f32.mrb[1].mxu1  ;;  %7580 = vst [vmem:[#allocation30_spill] sm:$0xff] %v6640_v57  ;;  %v6649_v25 = vpop.f32.mrb[55].mxu0 }
 0x30d   : > { %v4178_v22 = vadd.f32 %v4177_v30, %v4176_v40  ;;  %v4179_v42 = vpop.f32.mrb[2].mxu1  ;;  %v6633_v32 = vpop.permute.xlu1 %1375  ;;  %7585 = vst [vmem:[#allocation29_spill] sm:$0xff] %v6649_v25 }
 0x30e   : > { %v6635_v9 = vpop.permute.xlu0 %1577  ;;  %v4180_v27 = vpop.f32.mrb[3].mxu1 }
 0x30f   : > { %v2054_v11 = vadd.f32 %v4178_v22, %v6629_v33  ;;  %v4181_v34 = vadd.f32 %v4180_v27, %v4179_v42  ;;  %1481 = vrot.lane.b32.xlu0 %v7569_v45, %s5063_s7  ;;  %v7587_v27 = vld [vmem:[#allocation37_spill] sm:$0xff] }
 0x310   : > { %v1198_v57 = vadd.f32 %v1153_v51, %v7587_v27  ;;  %v1615_v51 = vadd.f32 %v6510_v21, %v7593_v3 }
 0x311   : > { %v6652_v40 = vadd.f32 %v7586_v10, %v2054_v11  ;;  %v2057_v30 = vadd.f32 %v4181_v34, %v6629_v33  ;;  %v1764_v22 = vpop.permute.xlu1 %1763  ;;  %v6668_v11 = vsel %vm1212_vm2, %v7589_v15, %v7588_v48  ;;  %v7591_v34 = vld [vmem:[#allocation38_spill] sm:$0xff] }
 0x312   : > { %v6655_v42 = vpop.permute.xlu0 %1164  ;;  %7590 = vst [vmem:[#allocation65_spill] sm:$0xff] %v6668_v11  ;;  %v1199_v12 = vadd.f32 %v6544_v49, %v7591_v34  ;;  %v1407_v25 = vadd.f32 %v1362_v39, %v1198_v57  ;;  %v1711_v48 = vadd.f32 %v1666_v43, %v1615_v51 }
 0x313   : > { %v6658_v45 = vadd.f32 %v6258_v55, %v2057_v30  ;;  %2610 = vrot.lane.b32.xlu0 %v6647_v4, %s5061_s27  ;;  %v7592_v55 = vld [vmem:[#allocation67_spill] sm:$0xff] }
 0x314   : > { %v1616_v30 = vadd.f32 %v6489_v31, %v7592_v55  ;;  %v1408_v13 = vadd.f32 %v6554_v46, %v1199_v12  ;;  %v1503_v62 = vadd.f32 %v6472_v23, %v1407_v25  ;;  %v7594_v55 = vld [vmem:[#allocation43_spill] sm:$0xff]  ;;  %v7595_v25 = vld [vmem:[#allocation36_spill] sm:$0xff] }
 0x315   : > { %v1576_v10 = vpop.permute.xlu1 %1575  ;;  %v1200_v46 = vadd.f32 %v6523_v61, %v7594_v55 }
 0x316   : > { %v6672_v2 = vpop.permute.xlu0 %1373  ;;  %v1712_v27 = vadd.f32 %v1668_v56, %v1616_v30  ;;  %v1618_v57 = vadd.f32 %v1576_v10, %v6338_v16  ;;  %v1504_v31 = vadd.f32 %v6454_v14, %v1408_v13  ;;  %v1201_v16 = vadd.f32 %v6497_v44, %v7595_v25 }
 0x317   : > { %2664 = vrot.lane.b32.xlu0 %v6668_v11, %s5062_s29  ;;  %v2341_v25 = vmul.f32 0.2, %v6652_v40 }
 0x318   : > { %v1808_v39 = vadd.f32 %v1764_v22, %v1712_v27  ;;  %v1848_v43 = vpack.c.bf16 %v1504_v31, %v1503_v62  ;;  %v1714_v12 = vadd.f32 %v6571_v17, %v1618_v57  ;;  %v1409_v22 = vadd.f32 %v6530_v7, %v1200_v46 }
 0x319   : > { %v1163_v15 = vpop.permute.xlu1 %1162  ;;  %v1410_v30 = vadd.f32 %v6508_v8, %v1201_v16 }
 0x31a   : > { %v1762_v49 = vpop.permute.xlu0 %1761  ;;  %v1505_v61 = vadd.f32 %v1462_v0, %v1409_v22  ;;  %v1810_v62 = vadd.f32 %v6607_v36, %v1714_v12  ;;  %v7598_v22 = vld [vmem:[#allocation45_spill] sm:$0xff] }
 0x31b   : > { %v1807_v34 = vadd.f32 %v1762_v49, %v1711_v48  ;;  %2782 = vrot.lane.b32.xlu0 %v6647_v4, %s5063_s7 }
 0x31d   : > { %v1849_v3 = vpack.c.bf16 %v1808_v39, %v1807_v34  ;;  %v1372_v21 = vpop.permute.xlu1 %1371 }
 0x31e   : > { %v1574_v56 = vpop.permute.xlu0 %1573 }
 0x31f   : > { %v1617_v23 = vadd.f32 %v1574_v56, %v6356_v50  ;;  %2123 = vmatprep.mubr.bf16.mxu1 %v1849_v3  ;;  %v1506_v50 = vadd.f32 %v6599_v63, %v1410_v30 }
 0x320   : > { %2124 = vmatmul.mubr.bf16.gmra.mrb[36].mxu1 %v1848_v43 }
 0x321   : > { %v1713_v14 = vadd.f32 %v6593_v6, %v1617_v23  ;;  %v6694_v10 = vpop.permute.xlu1 %1679  ;;  %v1851_v48 = vpack.c.bf16 %v1506_v50, %v1505_v61  ;;  %v2342_v50 = vmul.f32 0.2, %v6658_v45 }
 0x322   : > { %v1161_v51 = vpop.permute.xlu0 %1160 }
 0x323   : > { %v1809_v17 = vadd.f32 %v1766_v47, %v1713_v14  ;;  %v1202_v16 = vadd.f32 %v1161_v51, %v7531_v60  ;;  %v7602_v60 = vld [vmem:[#allocation44_spill] sm:$0xff] }
 0x325   : > { %v1676_v13 = vpop.permute.xlu1 %1675  ;;  %v1852_v27 = vpack.c.bf16 %v1810_v62, %v1809_v17  ;;  %v7599_v62 = vld [vmem:[#allocation41_spill] sm:$0xff] }
 0x326   : > { %v1370_v44 = vpop.permute.xlu0 %1369  ;;  %v1620_v17 = vadd.f32 %v6615_v53, %v7599_v62 }
 0x327   : > { %2131 = vmatprep.mubr.bf16.mxu1 %v1852_v27  ;;  %v7600_v27 = vld [vmem:[#allocation49_spill] sm:$0xff] }
 0x328   : > { %2132 = vmatmul.mubr.bf16.gmra.mrb[40].mxu1 %v1851_v48  ;;  %v1203_v48 = vadd.f32 %v1163_v15, %v7600_v27  ;;  %v1716_v4 = vadd.f32 %v1676_v13, %v1620_v17  ;;  %v7603_v17 = vld [vmem:[#allocation24_spill] sm:$0xff] }
 0x329   : > { %v6699_v7 = vpop.permute.xlu1 %1471 }
 0x32a   : > { %v6701_v6 = vpop.permute.xlu0 %1677 }
 0x32b   : > { %v6707_v39 = vpop.f32.mrb[56].mxu0 }
 0x32c   : > { %7596 = vst [vmem:[#allocation32_spill] sm:$0xff] %v6707_v39  ;;  %v6711_v63 = vpop.f32.mrb[57].mxu0 }
 0x32d   : > { %v6703_v49 = vpop.permute.xlu1 %1775  ;;  %v6713_v57 = vpop.f32.mrb[58].mxu0 }
 0x32e   : > { %v1674_v8 = vpop.permute.xlu0 %1673  ;;  %7597 = vst [vmem:[#allocation63_spill] sm:$0xff] %v6713_v57  ;;  %v6715_v31 = vpop.f32.mrb[59].mxu0 }
 0x331   : > { %v6705_v0 = vpop.permute.xlu1 %1587 }
 0x332   : > { %v6709_v36 = vpop.permute.xlu0 %1469 }
 0x333   : > { %v4182_v47 = vpop.f32.mrb[4].mxu1 }
 0x334   : > { %v4183_v34 = vpop.f32.mrb[5].mxu1 }
 0x335   : > { %v4184_v3 = vadd.f32 %v4183_v34, %v4182_v47  ;;  %v4185_v55 = vpop.f32.mrb[6].mxu1  ;;  %v1772_v46 = vpop.permute.xlu1 %1771  ;;  %v1411_v47 = vadd.f32 %v1370_v44, %v1202_v16  ;;  %v2374_v16 = vmax.f32 %v6658_v45, %v2342_v50  ;;  %v7605_v50 = vld [vmem:[#allocation47_spill] sm:$0xff] }
 0x336   : > { %v6717_v56 = vpop.permute.xlu0 %1773  ;;  %v4186_v43 = vpop.f32.mrb[7].mxu1  ;;  %v1812_v27 = vadd.f32 %v1772_v46, %v1716_v4  ;;  %v7604_v4 = vld [vmem:[#allocation55_spill] sm:$0xff] }
 0x337   : > { %v2062_v12 = vadd.f32 %v4184_v3, %v6629_v33  ;;  %v4187_v23 = vadd.f32 %v4186_v43, %v4185_v55  ;;  %v7601_v3 = vld [vmem:[#allocation26_spill] sm:$0xff] }
 0x338   : > { %v1619_v55 = vadd.f32 %v6635_v9, %v7601_v3  ;;  %v1507_v9 = vadd.f32 %v6601_v28, %v1411_v47  ;;  %v1205_v47 = vadd.f32 %v6620_v41, %v7605_v50 }
 0x339   : > { %v2223_v14 = vadd.f32 %v7598_v22, %v2062_v12  ;;  %v2065_v30 = vadd.f32 %v4187_v23, %v6629_v33  ;;  %v1584_v61 = vpop.permute.xlu1 %1583  ;;  %v2373_v23 = vmax.f32 %v6652_v40, %v2341_v25  ;;  %v1412_v22 = vadd.f32 %v1372_v21, %v1203_v48 }
 0x33a   : > { %v6728_v34 = vpop.permute.xlu0 %1585  ;;  %v1715_v53 = vadd.f32 %v1674_v8, %v1619_v55 }
 0x33b   : > { %v2343_v43 = vmul.f32 0.2, %v2223_v14  ;;  %v2226_v51 = vadd.f32 %v7602_v60, %v2065_v30  ;;  %v4188_v12 = vpop.f32.mrb[8].mxu1  ;;  %v1622_v30 = vadd.f32 %v1584_v61, %v6440_v35  ;;  %v1508_v25 = vadd.f32 %v6582_v38, %v1412_v22 }
 0x33c   : > { %v4189_v11 = vpop.f32.mrb[9].mxu1  ;;  %v1204_v35 = vadd.f32 %v6655_v42, %v7604_v4 }
 0x33d   : > { %v2375_v62 = vmax.f32 %v2223_v14, %v2343_v43  ;;  %v2344_v57 = vmul.f32 0.2, %v2226_v51  ;;  %v4190_v39 = vadd.f32 %v4189_v11, %v4188_v12  ;;  %v4191_v15 = vpop.f32.mrb[10].mxu1  ;;  %v6734_v44 = vpop.permute.xlu1 %1170  ;;  %v7606_v43 = vld [vmem:[#allocation42_spill] sm:$0xff] }
 0x33e   : > { %v1770_v3 = vpop.permute.xlu0 %1769  ;;  %v4192_v60 = vpop.f32.mrb[11].mxu1  ;;  %v1413_v55 = vadd.f32 %v6672_v2, %v1204_v35 }
 0x33f   : > { %v2405_v40 = vmax.f32 %v2373_v23, %v2375_v62  ;;  %v2376_v21 = vmax.f32 %v2226_v51, %v2344_v57  ;;  %v2070_v13 = vadd.f32 %v4190_v39, %v6629_v33  ;;  %v1811_v8 = vadd.f32 %v1770_v3, %v1715_v53 }
 0x340   : > { %v4193_v11 = vadd.f32 %v4192_v60, %v4191_v15  ;;  %v1854_v57 = vpack.c.bf16 %v1508_v25, %v1507_v9  ;;  %v1718_v39 = vadd.f32 %v6694_v10, %v1622_v30  ;;  %v1414_v23 = vadd.f32 %v6633_v32, %v1205_v47 }
 0x341   : > { %2421 = vst [vmem:[#allocation2] sm:$0xff] %v2405_v40  ;;  %v2406_v14 = vmax.f32 %v2374_v16, %v2376_v21  ;;  %v6742_v48 = vadd.f32 %v7603_v17, %v2070_v13  ;;  %v1855_v45 = vpack.c.bf16 %v1812_v27, %v1811_v8  ;;  %v1380_v28 = vpop.permute.xlu1 %1379  ;;  %v1509_v22 = vadd.f32 %v6709_v36, %v1413_v55 }
 0x342   : > { %v2073_v46 = vadd.f32 %v4193_v11, %v6629_v33  ;;  %v1582_v61 = vpop.permute.xlu0 %1581  ;;  %v1510_v41 = vadd.f32 %v6699_v7, %v1414_v23  ;;  %v1624_v36 = vadd.f32 %v6705_v0, %v6411_v5  ;;  %v1207_v11 = vadd.f32 %v6734_v44, %v5967_v19 }
 0x343   : > { %2422 = vst [vmem:[#allocation2 + $0x8] sm:$0xff] %v2406_v14  ;;  %v1621_v38 = vadd.f32 %v1582_v61, %v6464_v24  ;;  %2139 = vmatprep.mubr.bf16.mxu1 %v1855_v45  ;;  %v1814_v24 = vadd.f32 %v6703_v49, %v1718_v39  ;;  %v1623_v49 = vadd.f32 %v6728_v34, %v6443_v18 }
 0x344   : > { %v6753_v51 = vadd.f32 %v7606_v43, %v2073_v46  ;;  %2140 = vmatmul.mubr.bf16.gmra.mrb[44].mxu1 %v1854_v57  ;;  %v1857_v15 = vpack.c.bf16 %v1510_v41, %v1509_v22  ;;  %v1416_v4 = vadd.f32 %v1380_v28, %v1207_v11 }
 0x345   : > { %v1717_v42 = vadd.f32 %v6701_v6, %v1621_v38  ;;  %v1684_v12 = vpop.permute.xlu1 %1683 }
 0x346   : > { %v1169_v10 = vpop.permute.xlu0 %1168  ;;  %v1720_v8 = vadd.f32 %v1684_v12, %v1624_v36 }
 0x347   : > { %v1813_v53 = vadd.f32 %v6717_v56, %v1717_v42  ;;  %v1206_v14 = vadd.f32 %v1169_v10, %v5955_v26 }
 0x349   : > { %v1780_v62 = vpop.permute.xlu1 %1779  ;;  %v1858_v2 = vpack.c.bf16 %v1814_v24, %v1813_v53 }
 0x34a   : > { %v1378_v16 = vpop.permute.xlu0 %1377  ;;  %v2437_v9 = vld [vmem:[#allocation2] ss:$2 sm:$0xff]  ;;  %v2453_v27 = vld [vmem:[#allocation2 + $0x1] ss:$2 sm:$0xff]  ;;  %v1816_v17 = vadd.f32 %v1780_v62, %v1720_v8 }
 0x34b   : > { %2147 = vmatprep.mubr.bf16.mxu1 %v1858_v2  ;;  %v2468_v6 = vmax.f32 %v2437_v9, %v2453_v27  ;;  %v1415_v35 = vadd.f32 %v1378_v16, %v1206_v14  ;;  %v7607_v27 = vld [vmem:[#allocation40_spill] sm:$0xff] }
 0x34c   : > { %2148 = vmatmul.mubr.bf16.gmra.mrb[48].mxu1 %v1857_v15  ;;  %v2345_v15 = vmul.f32 0.2, %v6742_v48 }
 0x34d   : > { %v1476_v30 = vpop.permute.xlu1 %1475  ;;  %v2534_v32 = vrot.slane %v2468_v6, 7 }
 0x34e   : > { %v1682_v3 = vpop.permute.xlu0 %1681  ;;  %v1512_v39 = vadd.f32 %v1476_v30, %v1416_v4  ;;  %v2377_v8 = vmax.f32 %v6742_v48, %v2345_v15 }
 0x34f   : > { %v6766_v7 = vsel %vm836_vm0, 0.0, %v2534_v32  ;;  %v2558_v56 = vsel %vm836_vm0, %v2534_v32, 0.0  ;;  %v1719_v25 = vadd.f32 %v1682_v3, %v1623_v49  ;;  %v2346_v3 = vmul.f32 0.2, %v6753_v51 }
 0x350   : > { %2688 = vrot.lane.b32.xlu0 %v6766_v7, %s5063_s7  ;;  %v2581_v60 = vrot.slane %v6766_v7, 1  ;;  %v2635_v40 = vrot.slane %v6766_v7, 2  ;;  %v2582_v21 = vrot.slane %v2558_v56, 1  ;;  %v2636_v13 = vrot.slane %v2558_v56, 2 }
 0x351   : > { %v1592_v5 = vpop.permute.xlu1 %1591 }
 0x352   : > { %v1778_v0 = vpop.permute.xlu0 %1777  ;;  %v6774_v18 = vsel %vm1003_vm1, %v2581_v60, %v2582_v21  ;;  %v2637_v34 = vsel %vm1212_vm2, %v2635_v40, %v2636_v13  ;;  %v1626_v53 = vadd.f32 %v1592_v5, %v6487_v1  ;;  %v7608_v60 = vld [vmem:[#allocation35_spill] sm:$0xff] }
 0x353   : > { %v1815_v45 = vadd.f32 %v1778_v0, %v1719_v25  ;;  %2612 = vrot.lane.b32.xlu1 %v6774_v18, %s5061_s27 }
 0x354   : > { %2722 = vrot.lane.b32.xlu0 %v2637_v34, %s5061_s27 }
 0x355   : > { %v1861_v46 = vpack.c.bf16 %v1816_v17, %v1815_v45  ;;  %v1175_v61 = vpop.permute.xlu1 %1174 }
 0x356   : > { %v1474_v57 = vpop.permute.xlu0 %1473  ;;  %v1209_v36 = vadd.f32 %v1175_v61, %v5945_v58 }
 0x357   : > { %v1511_v38 = vadd.f32 %v1474_v57, %v1415_v35  ;;  %2155 = vmatprep.mubr.bf16.mxu1 %v1861_v46  ;;  %2666 = vrot.lane.b32.xlu1 %v2637_v34, %s5062_s29 }
 0x359   : > { %v1860_v19 = vpack.c.bf16 %v1512_v39, %v1511_v38  ;;  %v1688_v44 = vpop.permute.xlu1 %1687 }
 0x35a   : > { %v1590_v26 = vpop.permute.xlu0 %1589  ;;  %v1722_v16 = vadd.f32 %v1688_v44, %v1626_v53  ;;  %v7609_v44 = vld [vmem:[#allocation58_spill] sm:$0xff] }
 0x35b   : > { %2156 = vmatmul.mubr.bf16.gmra.mrb[52].mxu1 %v1860_v19  ;;  %v1625_v41 = vadd.f32 %v1590_v26, %v6513_v54 }
 0x35d   : > { %v1384_v50 = vpop.permute.xlu1 %1383 }
 0x35e   : > { %v1173_v47 = vpop.permute.xlu0 %1172  ;;  %v1418_v25 = vadd.f32 %v1384_v50, %v1209_v36 }
 0x35f   : > { %v1208_v1 = vadd.f32 %v1173_v47, %v5993_v20  ;;  %v2378_v20 = vmax.f32 %v6753_v51, %v2346_v3 }
 0x361   : > { %v1784_v55 = vpop.permute.xlu1 %1783 }
 0x362   : > { %v1686_v43 = vpop.permute.xlu0 %1685  ;;  %v1818_v54 = vadd.f32 %v1784_v55, %v1722_v16  ;;  %v4764_v16 = vld [vmem:[#allocation9 + $0x88] sm:$0xff]  }
 0x363   : > { %v4194_v42 = vpop.f32.mrb[12].mxu1  ;;  %v1721_v9 = vadd.f32 %v1686_v43, %v1625_v41  ;;  %v7610_v43 = vld [vmem:[#allocation59_spill] sm:$0xff] }
 0x364   : > { %v4195_v12 = vpop.f32.mrb[13].mxu1 }
 0x365   : > { %v4196_v28 = vadd.f32 %v4195_v12, %v4194_v42  ;;  %v4197_v23 = vpop.f32.mrb[14].mxu1  ;;  %v1480_v22 = vpop.permute.xlu1 %1479 }
 0x366   : > { %v1382_v10 = vpop.permute.xlu0 %1381  ;;  %v4198_v24 = vpop.f32.mrb[15].mxu1  ;;  %v1514_v4 = vadd.f32 %v1480_v22, %v1418_v25 }
 0x367   : > { %v2078_v62 = vadd.f32 %v4196_v28, %v6629_v33  ;;  %v4199_v2 = vadd.f32 %v4198_v24, %v4197_v23  ;;  %v1417_v5 = vadd.f32 %v1382_v10, %v1208_v1  ;;  %v4763_v28 = vld [vmem:[#allocation9 + $0x80] sm:$0xff]  }
 0x368   : > { %4536 = vmatprep.subr.bf16.mxu1 %v4763_v28 }
 0x369   : > { %v2239_v6 = vadd.f32 %v7607_v27, %v2078_v62  ;;  %v2081_v30 = vadd.f32 %v4199_v2, %v6629_v33  ;;  %v1596_v32 = vpop.permute.xlu1 %1595  ;;  %4537 = vmatpush3.bf16.msra.mxu1 %v4763_v28 }
 0x36a   : > { %v1782_v49 = vpop.permute.xlu0 %1781  ;;  %v1628_v22 = vadd.f32 %v1596_v32, %v6557_v29  ;;  %4538 = vmatprep.subr.bf16.mxu1 %v4764_v16 }
 0x36b   : > { %v2347_v56 = vmul.f32 0.2, %v2239_v6  ;;  %v2242_v40 = vadd.f32 %v7608_v60, %v2081_v30  ;;  %v1817_v21 = vadd.f32 %v1782_v49, %v1721_v9  ;;  %v4200_v13 = vpop.f32.mrb[16].mxu1  ;;  %v4765_v49 = vld [vmem:[#allocation9 + $0x90] sm:$0xff]  }
 0x36c   : > { %v4201_v0 = vpop.f32.mrb[17].mxu1 }
 0x36d   : > { %v2379_v34 = vmax.f32 %v2239_v6, %v2347_v56  ;;  %v2348_v11 = vmul.f32 0.2, %v2242_v40  ;;  %v1864_v14 = vpack.c.bf16 %v1818_v54, %v1817_v21  ;;  %v4202_v17 = vadd.f32 %v4201_v0, %v4200_v13  ;;  %v4203_v45 = vpop.f32.mrb[18].mxu1  ;;  %v1179_v58 = vpop.permute.xlu1 %1178  ;;  %4539 = vmatpush3.bf16.msra.mxu1 %v4764_v16 }
 0x36e   : > { %v1478_v35 = vpop.permute.xlu0 %1477  ;;  %v4204_v46 = vpop.f32.mrb[19].mxu1  ;;  %v1211_v15 = vadd.f32 %v1179_v58, %v6074_v59  ;;  %4540 = vmatprep.subr.bf16.mxu1 %v4765_v49  ;;  %v4772_v58 = vld [vmem:[#allocation9 + $0x48] sm:$0xff]  }
 0x36f   : > { %v2407_v61 = vmax.f32 %v2377_v8, %v2379_v34  ;;  %v2380_v57 = vmax.f32 %v2242_v40, %v2348_v11  ;;  %v2086_v39 = vadd.f32 %v4202_v17, %v6629_v33  ;;  %v1513_v38 = vadd.f32 %v1478_v35, %v1417_v5  ;;  %2163 = vmatprep.mubr.bf16.mxu1 %v1864_v14  ;;  %v4766_v34 = vld [vmem:[#allocation9 + $0x98] sm:$0xff]   ;;  %v4767_v14 = vld [vmem:[#allocation9 + $0xa0] sm:$0xff]   ;;  %v4773_v35 = vld [vmem:[#allocation9 + $0x8] sm:$0xff]  }
 0x370   : > { %v4205_v48 = vadd.f32 %v4204_v46, %v4203_v45  ;;  %v4769_v17 = vld [vmem:[#allocation9 + $0x40] sm:$0xff]   ;;  %v4775_v46 = vld [vmem:[#allocation9 + $0x50] sm:$0xff]  }
 0x371   : > { %2423 = vst [vmem:[#allocation2 + $0x10] sm:$0xff] %v2407_v61  ;;  %v2408_v19 = vmax.f32 %v2378_v20, %v2380_v57  ;;  %v6798_v26 = vadd.f32 %v7609_v44, %v2086_v39  ;;  %v1863_v50 = vpack.c.bf16 %v1514_v4, %v1513_v38  ;;  %v1386_v51 = vpop.permute.xlu1 %1385  ;;  %4541 = vmatpush3.bf16.msra.mxu1 %v4765_v49  ;;  %v4770_v45 = vld [vmem:[#allocation9] sm:$0xff]   ;;  %v4768_v20 = vld [vmem:[#allocation9 + $0xa8] sm:$0xff]   ;;  %v4771_v4 = vld [vmem:[#allocation9 + $0xb0] sm:$0xff]  }
 0x372   : > { %v2089_v47 = vadd.f32 %v4205_v48, %v6629_v33  ;;  %v1594_v55 = vpop.permute.xlu0 %1593  ;;  %4542 = vmatprep.subr.bf16.mxu1 %v4766_v34  ;;  %4296 = vmatprep.subr.bf16.mxu0 %v4769_v17  ;;  %v4774_v61 = vld [vmem:[#allocation9 + $0xb8] sm:$0xff]   ;;  %v4776_v38 = vld [vmem:[#allocation9 + $0x10] sm:$0xff]   ;;  %v4780_v49 = vld [vmem:[#allocation9 + $0x20] sm:$0xff]  }
 0x373   : > { %2424 = vst [vmem:[#allocation2 + $0x18] sm:$0xff] %v2408_v19  ;;  %2164 = vmatmul.mubr.bf16.gmra.mrb[56].mxu1 %v1863_v50  ;;  %v1627_v10 = vadd.f32 %v1594_v55, %v6585_v52  ;;  %4297 = vmatpush3.bf16.msra.mxu0 %v4770_v45  ;;  %v2349_v55 = vmul.f32 0.2, %v6798_v26  ;;  %v4785_v17 = vld [vmem:[#allocation9 + $0x78] sm:$0xff]  }
 0x374   : > { %v6802_v42 = vadd.f32 %v7610_v43, %v2089_v47  ;;  %4298 = vmatprep.subr.bf16.mxu0 %v4772_v58  ;;  %v4786_v45 = vld [vmem:[#allocation9 + $0x38] sm:$0xff]  }
 0x375   : > { %v4712_v23 = vpop.permute.xlu1 %4711  ;;  %4543 = vmatpush3.bf16.msra.mxu1 %v4766_v34  ;;  %v2381_v16 = vmax.f32 %v6798_v26, %v2349_v55 }
 0x376   : > { %v1177_v12 = vpop.permute.xlu0 %1176  ;;  %4544 = vmatprep.subr.bf16.mxu1 %v4767_v14  ;;  %v2350_v28 = vmul.f32 0.2, %v6802_v42 }
 0x377   : > { %v1210_v9 = vadd.f32 %v1177_v12, %v6091_v37  ;;  %4299 = vmatpush3.bf16.msra.mxu0 %v4773_v35 }
 0x378   : > { %4300 = vmatprep.subr.bf16.mxu0 %v4775_v46 }
 0x379   : > { %v1484_v54 = vpop.permute.xlu1 %1483  ;;  %v1419_v56 = vadd.f32 %v1386_v51, %v1210_v9  ;;  %4545 = vmatpush3.bf16.msra.mxu1 %v4767_v14  ;;  %v7611_v51 = vld [vmem:[#allocation51_spill] sm:$0xff] }
 0x37a   : > { %v6806_v24 = vpop.permute.xlu0 %4706  ;;  %v2439_v53 = vld [vmem:[#allocation2 + $0x10] ss:$2 sm:$0xff]  ;;  %v2455_v41 = vld [vmem:[#allocation2 + $0x11] ss:$2 sm:$0xff]  ;;  %4546 = vmatprep.subr.bf16.mxu1 %v4768_v20 }
 0x37b   : > { %v4708_v62 = vunpack.i.l.bf16 %v6806_v24  ;;  %v2469_v2 = vmax.f32 %v2439_v53, %v2455_v41  ;;  %v4832_v27 = vadd.high.f32.bf16 %v1628_v22, %v6806_v24  ;;  %4301 = vmatpush3.bf16.msra.mxu0 %v4776_v38  ;;  %v7612_v22 = vld [vmem:[#allocation23_spill] sm:$0xff]  ;;  %v4777_v41 = vld [vmem:[#allocation9 + $0x58] sm:$0xff]  }
 0x37c   : > { %4302 = vmatprep.subr.bf16.mxu0 %v4777_v41  ;;  %v4793_v24 = vld [vmem:[#allocation11 + $0x58] sm:$0xff]  }
 0x37d   : > { %v1723_v29 = vadd.f32 %v4708_v62, %v1627_v10  ;;  %v2535_v52 = vrot.slane %v2469_v2, 7  ;;  %v4833_v30 = vadd.high.f32.bf16 %v4832_v27, %v4712_v23  ;;  %4547 = vmatpush3.bf16.msra.mxu1 %v4768_v20 }
 0x37e   : > { %v1388_v6 = vpop.permute.xlu0 %1387  ;;  %4548 = vmatprep.subr.bf16.mxu1 %v4771_v4 }
 0x37f   : > { %v4834_v32 = vadd.low.f32.bf16 %v1723_v29, %v4712_v23  ;;  %v1420_v3 = vadd.f32 %v1388_v6, %v1211_v15  ;;  %v6815_v36 = vsel %vm836_vm0, 0.0, %v2535_v52  ;;  %v2559_v37 = vsel %vm836_vm0, %v2535_v52, 0.0  ;;  %v4778_v15 = vld [vmem:[#allocation9 + $0x18] sm:$0xff]  }
 0x380   : > { %2746 = vrot.lane.b32.xlu0 %v6815_v36, %s5062_s29  ;;  %2690 = vrot.lane.b32.xlu1 %v6815_v36, %s5063_s7  ;;  %v2584_v59 = vrot.slane %v6815_v36, 1  ;;  %v2638_v1 = vrot.slane %v6815_v36, 2  ;;  %v2585_v40 = vrot.slane %v2559_v37, 1  ;;  %v2639_v21 = vrot.slane %v2559_v37, 2 }
 0x381   : > { %v1867_v60 = vpack.c.bf16 %v4833_v30, %v4834_v32  ;;  %v1516_v13 = vadd.f32 %v1484_v54, %v1420_v3  ;;  %4549 = vmatpush3.bf16.msra.mxu1 %v4771_v4  ;;  %v2382_v6 = vmax.f32 %v6802_v42, %v2350_v28  ;;  %4303 = vmatpush3.bf16.msra.mxu0 %v4778_v15  ;;  %v7614_v42 = vld [vmem:[#allocation50_spill] sm:$0xff] }
 0x382   : > { %v1482_v8 = vpop.permute.xlu0 %1481  ;;  %v6825_v5 = vsel %vm1003_vm1, %v2584_v59, %v2585_v40  ;;  %v6828_v0 = vsel %vm1212_vm2, %v2638_v1, %v2639_v21  ;;  %4550 = vmatprep.subr.bf16.mxu1 %v4774_v61  ;;  %v4779_v1 = vld [vmem:[#allocation9 + $0x60] sm:$0xff]   ;;  %v4781_v21 = vld [vmem:[#allocation9 + $0x68] sm:$0xff]  }
 0x383   : > { %v1515_v25 = vadd.f32 %v1482_v8, %v1419_v56  ;;  %2171 = vmatprep.mubr.bf16.mxu1 %v1867_v60  ;;  %v7613_v56 = vld [vmem:[#allocation25_spill] sm:$0xff]  ;;  %4304 = vmatprep.subr.bf16.mxu0 %v4779_v1  ;;  %v4783_v8 = vld [vmem:[#allocation9 + $0x70] sm:$0xff]  }
 0x384   : > { %2768 = vrot.lane.b32.xlu0 %v6825_v5, %s5063_s7  ;;  %2724 = vrot.lane.b32.xlu1 %v6828_v0, %s5061_s27 }
 0x385   : > { %v1866_v11 = vpack.c.bf16 %v1516_v13, %v1515_v25  ;;  %4551 = vmatpush3.bf16.msra.mxu1 %v4774_v61  ;;  %4305 = vmatpush3.bf16.msra.mxu0 %v4780_v49  ;;  %v4782_v13 = vld [vmem:[#allocation9 + $0x28] sm:$0xff]   ;;  %v4784_v25 = vld [vmem:[#allocation9 + $0x30] sm:$0xff]  }
 0x386   : > { %4306 = vmatprep.subr.bf16.mxu0 %v4781_v21 }
 0x387   : > { %2172 = vmatmul.mubr.bf16.gmra.mrb[60].mxu1 %v1866_v11 }
 0x388   : > { %2614 = vrot.lane.b32.xlu0 %v6825_v5, %s5061_s27 }
 0x389   : > { %4307 = vmatpush3.bf16.msra.mxu0 %v4782_v13 }
 0x38a   : > { %4308 = vmatprep.subr.bf16.mxu0 %v4783_v8 }
 0x38c   : > { %2668 = vrot.lane.b32.xlu0 %v6828_v0, %s5062_s29 }
 0x38d   : > { %4309 = vmatpush3.bf16.msra.mxu0 %v4784_v25 }
 0x38e   : > { %4310 = vmatprep.subr.bf16.mxu0 %v4785_v17 }
 0x391   : > { %4311 = vmatpush3.bf16.msra.mxu0 %v4786_v45 }
 0x393   : > { %v4206_v57 = vpop.f32.mrb[20].mxu1 }
 0x394   : > { %v4207_v39 = vpop.f32.mrb[21].mxu1 }
 0x395   : > { %v4208_v48 = vadd.f32 %v4207_v39, %v4206_v57  ;;  %v4209_v19 = vpop.f32.mrb[22].mxu1 }
 0x396   : > { %v4210_v44 = vpop.f32.mrb[23].mxu1 }
 0x397   : > { %v2094_v50 = vadd.f32 %v4208_v48, %v6629_v33  ;;  %v4211_v47 = vadd.f32 %v4210_v44, %v4209_v19 }
 0x399   : > { %v2255_v43 = vadd.f32 %v7611_v51, %v2094_v50  ;;  %v2097_v12 = vadd.f32 %v4211_v47, %v6629_v33 }
 0x39b   : > { %v2351_v23 = vmul.f32 0.2, %v2255_v43  ;;  %v2258_v10 = vadd.f32 %v7612_v22, %v2097_v12  ;;  %v4212_v53 = vpop.f32.mrb[24].mxu1  ;;  %v7615_v12 = vld [vmem:[#allocation48_spill] sm:$0xff] }
 0x39c   : > { %v4213_v2 = vpop.f32.mrb[25].mxu1 }
 0x39d   : > { %v2383_v9 = vmax.f32 %v2255_v43, %v2351_v23  ;;  %v2352_v27 = vmul.f32 0.2, %v2258_v10  ;;  %v4214_v29 = vadd.f32 %v4213_v2, %v4212_v53  ;;  %v4215_v52 = vpop.f32.mrb[26].mxu1  ;;  %v7616_v53 = vld [vmem:[#allocation57_spill] sm:$0xff] }
 0x39e   : > { %v4216_v30 = vpop.f32.mrb[27].mxu1 }
 0x39f   : > { %v2409_v32 = vmax.f32 %v2381_v16, %v2383_v9  ;;  %v2384_v3 = vmax.f32 %v2258_v10, %v2352_v27  ;;  %v2102_v37 = vadd.f32 %v4214_v29, %v6629_v33  ;;  %v4217_v59 = vadd.f32 %v4216_v30, %v4215_v52 }
 0x3a1   : > { %2425 = vst [vmem:[#allocation2 + $0x20] sm:$0xff] %v2409_v32  ;;  %v2410_v54 = vmax.f32 %v2382_v6, %v2384_v3  ;;  %v6848_v26 = vadd.f32 %v7613_v56, %v2102_v37  ;;  %v2105_v60 = vadd.f32 %v4217_v59, %v6629_v33 }
 0x3a3   : > { %2426 = vst [vmem:[#allocation2 + $0x28] sm:$0xff] %v2410_v54  ;;  %v6852_v40 = vadd.f32 %v7614_v42, %v2105_v60 }
 0x3a5   : > { %v2354_v22 = vmul.f32 0.2, %v6852_v40 }
 0x3a7   : > { %v2386_v30 = vmax.f32 %v6852_v40, %v2354_v22  ;;  %v7618_v40 = vld [vmem:[#allocation28_spill] sm:$0xff] }
 0x3aa   : > { %v2441_v34 = vld [vmem:[#allocation2 + $0x20] ss:$2 sm:$0xff]  ;;  %v2457_v11 = vld [vmem:[#allocation2 + $0x21] ss:$2 sm:$0xff] }
 0x3ab   : > { %v2470_v14 = vmax.f32 %v2441_v34, %v2457_v11 }
 0x3ad   : > { %v2536_v58 = vrot.slane %v2470_v14, 7 }
 0x3af   : > { %v6855_v20 = vsel %vm836_vm0, 0.0, %v2536_v58  ;;  %v2560_v4 = vsel %vm836_vm0, %v2536_v58, 0.0 }
 0x3b0   : > { %2692 = vrot.lane.b32.xlu0 %v6855_v20, %s5063_s7  ;;  %2748 = vrot.lane.b32.xlu1 %v6855_v20, %s5062_s29  ;;  %v2641_v35 = vrot.slane %v6855_v20, 2  ;;  %v2642_v46 = vrot.slane %v2560_v4, 2  ;;  %v2587_v61 = vrot.slane %v6855_v20, 1  ;;  %v2588_v57 = vrot.slane %v2560_v4, 1 }
 0x3b2   : > { %v2643_v39 = vsel %vm1212_vm2, %v2641_v35, %v2642_v46  ;;  %v6866_v38 = vsel %vm1003_vm1, %v2587_v61, %v2588_v57 }
 0x3b3   : > { %v2794_v48 = vpack.c.bf16 %v2643_v39, %v6828_v0  ;;  %v2353_v0 = vmul.f32 0.2, %v6848_v26 }
 0x3b4   : > { %2726 = vrot.lane.b32.xlu0 %v2643_v39, %s5061_s27  ;;  %2770 = vrot.lane.b32.xlu1 %v6866_v38, %s5063_s7 }
 0x3b5   : > { %4552 = vmatprep.mubr.bf16.mxu1 %v2794_v48  ;;  %v2385_v16 = vmax.f32 %v6848_v26, %v2353_v0  ;;  %v7617_v26 = vld [vmem:[#allocation53_spill] sm:$0xff] }
 0x3b8   : > { %2616 = vrot.lane.b32.xlu1 %v6866_v38, %s5061_s27 }
 0x3bc   : > { %2670 = vrot.lane.b32.xlu1 %v2643_v39, %s5062_s29 }
 0x3c3   : > { %v4218_v19 = vpop.f32.mrb[28].mxu1 }
 0x3c4   : > { %v4219_v44 = vpop.f32.mrb[29].mxu1 }
 0x3c5   : > { %v4220_v50 = vadd.f32 %v4219_v44, %v4218_v19  ;;  %v4221_v47 = vpop.f32.mrb[30].mxu1 }
 0x3c6   : > { %v4222_v55 = vpop.f32.mrb[31].mxu1 }
 0x3c7   : > { %v2110_v51 = vadd.f32 %v4220_v50, %v6629_v33  ;;  %v4223_v43 = vadd.f32 %v4222_v55, %v4221_v47 }
 0x3c9   : > { %v2271_v28 = vadd.f32 %v7615_v12, %v2110_v51  ;;  %v2113_v23 = vadd.f32 %v4223_v43, %v6629_v33  ;;  %v6882_v6 = vpop.f32.mrb[60].mxu0  ;;  %v7619_v51 = vld [vmem:[#allocation56_spill] sm:$0xff] }
 0x3ca   : > { %v6885_v3 = vpop.f32.mrb[61].mxu0 }
 0x3cb   : > { %v2355_v10 = vmul.f32 0.2, %v2271_v28  ;;  %v2274_v41 = vadd.f32 %v7616_v53, %v2113_v23  ;;  %v4224_v2 = vpop.f32.mrb[32].mxu1  ;;  %v6888_v54 = vpop.f32.mrb[62].mxu0  ;;  %v7620_v23 = vld [vmem:[#allocation52_spill] sm:$0xff] }
 0x3cc   : > { %v4225_v15 = vpop.f32.mrb[33].mxu1  ;;  %v6892_v21 = vpop.f32.mrb[63].mxu0 }
 0x3cd   : > { %v2387_v9 = vmax.f32 %v2271_v28, %v2355_v10  ;;  %v2356_v27 = vmul.f32 0.2, %v2274_v41  ;;  %v4226_v29 = vadd.f32 %v4225_v15, %v4224_v2  ;;  %v4227_v52 = vpop.f32.mrb[34].mxu1 }
 0x3ce   : > { %v4228_v32 = vpop.f32.mrb[35].mxu1 }
 0x3cf   : > { %v2411_v37 = vmax.f32 %v2385_v16, %v2387_v9  ;;  %v2388_v59 = vmax.f32 %v2274_v41, %v2356_v27  ;;  %v2118_v1 = vadd.f32 %v4226_v29, %v6629_v33  ;;  %v4229_v49 = vadd.f32 %v4228_v32, %v4227_v52 }
 0x3d1   : > { %2427 = vst [vmem:[#allocation2 + $0x30] sm:$0xff] %v2411_v37  ;;  %v2412_v56 = vmax.f32 %v2386_v30, %v2388_v59  ;;  %v2279_v60 = vadd.f32 %v7617_v26, %v2118_v1  ;;  %v2121_v42 = vadd.f32 %v4229_v49, %v6629_v33  ;;  %v7621_v1 = vld [vmem:[#allocation54_spill] sm:$0xff]  ;;  %v2611_v26 = vpop.permute.xlu0 %2610 }
 0x3d3   : > { %2428 = vst [vmem:[#allocation2 + $0x38] sm:$0xff] %v2412_v56  ;;  %v2282_v13 = vadd.f32 %v7618_v40, %v2121_v42  ;;  %v2357_v55 = vmul.f32 0.2, %v2279_v60 }
 0x3d5   : > { %v2358_v12 = vmul.f32 0.2, %v2282_v13  ;;  %v2389_v41 = vmax.f32 %v2279_v60, %v2357_v55  ;;  %v7622_v60 = vld [vmem:[#allocation29_spill] sm:$0xff]  ;;  %v2665_v40 = vpop.permute.xlu0 %2664 }
 0x3d7   : > { %v2390_v27 = vmax.f32 %v2282_v13, %v2358_v12 }
 0x3da   : > { %v2443_v8 = vld [vmem:[#allocation2 + $0x30] ss:$2 sm:$0xff]  ;;  %v2459_v25 = vld [vmem:[#allocation2 + $0x31] ss:$2 sm:$0xff] }
 0x3db   : > { %v2471_v34 = vmax.f32 %v2443_v8, %v2459_v25 }
 0x3dd   : > { %v2537_v11 = vrot.slane %v2471_v34, 7 }
 0x3df   : > { %v6896_v14 = vsel %vm836_vm0, 0.0, %v2537_v11  ;;  %v2561_v17 = vsel %vm836_vm0, %v2537_v11, 0.0  ;;  %v6925_v11 = vpop.permute.xlu0 %2782 }
 0x3e0   : > { %2750 = vrot.lane.b32.xlu0 %v6896_v14, %s5062_s29  ;;  %2694 = vrot.lane.b32.xlu1 %v6896_v14, %s5063_s7  ;;  %v2590_v45 = vrot.slane %v6896_v14, 1  ;;  %v2591_v58 = vrot.slane %v2561_v17, 1  ;;  %v2644_v4 = vrot.slane %v6896_v14, 2  ;;  %v2645_v35 = vrot.slane %v2561_v17, 2  ;;  %v2613_v17 = vpop.permute.xlu1 %2612 }
 0x3e2   : > { %v6906_v46 = vsel %vm1003_vm1, %v2590_v45, %v2591_v58  ;;  %v2646_v61 = vsel %vm1212_vm2, %v2644_v4, %v2645_v35 }
 0x3e4   : > { %2772 = vrot.lane.b32.xlu0 %v6906_v46, %s5063_s7  ;;  %2728 = vrot.lane.b32.xlu1 %v2646_v61, %s5061_s27 }
 0x3e8   : > { %2618 = vrot.lane.b32.xlu0 %v6906_v46, %s5061_s27 }
 0x3ec   : > { %2672 = vrot.lane.b32.xlu0 %v2646_v61, %s5062_s29 }
 0x3f3   : > { %v4230_v57 = vpop.f32.mrb[36].mxu1 }
 0x3f4   : > { %v4231_v39 = vpop.f32.mrb[37].mxu1 }
 0x3f5   : > { %v4232_v48 = vadd.f32 %v4231_v39, %v4230_v57  ;;  %v4233_v19 = vpop.f32.mrb[38].mxu1 }
 0x3f6   : > { %v4234_v44 = vpop.f32.mrb[39].mxu1 }
 0x3f7   : > { %v2126_v50 = vadd.f32 %v4232_v48, %v6629_v33  ;;  %v4235_v47 = vadd.f32 %v4234_v44, %v4233_v19  ;;  %v2689_v44 = vpop.permute.xlu0 %2688 }
 0x3f9   : > { %v2287_v43 = vadd.f32 %v7619_v51, %v2126_v50  ;;  %v2129_v0 = vadd.f32 %v4235_v47, %v6629_v33  ;;  %v2667_v50 = vpop.permute.xlu1 %2666 }
 0x3fb   : > { %v2359_v28 = vmul.f32 0.2, %v2287_v43  ;;  %v2290_v22 = vadd.f32 %v7620_v23, %v2129_v0  ;;  %v4236_v10 = vpop.f32.mrb[40].mxu1  ;;  %v2723_v12 = vpop.permute.xlu0 %2722 }
 0x3fc   : > { %v4237_v53 = vpop.f32.mrb[41].mxu1 }
 0x3fd   : > { %v2391_v2 = vmax.f32 %v2287_v43, %v2359_v28  ;;  %v2360_v15 = vmul.f32 0.2, %v2290_v22  ;;  %v4238_v16 = vadd.f32 %v4237_v53, %v4236_v10  ;;  %v4239_v9 = vpop.f32.mrb[42].mxu1  ;;  %v2691_v51 = vpop.permute.xlu1 %2690  ;;  %v7623_v53 = vld [vmem:[#allocation46_spill] sm:$0xff] }
 0x3fe   : > { %v4240_v29 = vpop.f32.mrb[43].mxu1 }
 0x3ff   : > { %v2413_v52 = vmax.f32 %v2389_v41, %v2391_v2  ;;  %v2392_v30 = vmax.f32 %v2290_v22, %v2360_v15  ;;  %v2134_v32 = vadd.f32 %v4238_v16, %v6629_v33  ;;  %v4241_v37 = vadd.f32 %v4240_v29, %v4239_v9  ;;  %v2747_v15 = vpop.permute.xlu0 %2746  ;;  %v7624_v29 = vld [vmem:[#allocation30_spill] sm:$0xff] }
 0x401   : > { %2429 = vst [vmem:[#allocation2 + $0x40] sm:$0xff] %v2413_v52  ;;  %v2414_v59 = vmax.f32 %v2390_v27, %v2392_v30  ;;  %v2295_v49 = vadd.f32 %v7621_v1, %v2134_v32  ;;  %v2137_v56 = vadd.f32 %v4241_v37, %v6629_v33  ;;  %v2725_v9 = vpop.permute.xlu1 %2724  ;;  %v7625_v32 = vld [vmem:[#allocation18_spill] sm:$0xff] }
 0x402   : > { %v2626_v37 = vadd.f32 %v2611_v26, %v7625_v32  ;;  %v2738_v26 = vadd.f32 %v2723_v12, %v6774_v18 }
 0x403   : > { %2430 = vst [vmem:[#allocation2 + $0x48] sm:$0xff] %v2414_v59  ;;  %v6923_v42 = vadd.f32 %v7622_v60, %v2137_v56  ;;  %v2361_v10 = vmul.f32 0.2, %v2295_v49 }
 0x405   : > { %v2362_v16 = vmul.f32 0.2, %v6923_v42  ;;  %v2393_v1 = vmax.f32 %v2295_v49, %v2361_v10  ;;  %v2739_v49 = vadd.f32 %v2725_v9, %v6825_v5 }
 0x40a   : > { %v2445_v8 = vld [vmem:[#allocation2 + $0x40] ss:$2 sm:$0xff]  ;;  %v2461_v13 = vld [vmem:[#allocation2 + $0x41] ss:$2 sm:$0xff] }
 0x40b   : > { %v2472_v25 = vmax.f32 %v2445_v8, %v2461_v13 }
 0x40d   : > { %v2538_v34 = vrot.slane %v2472_v25, 7  ;;  %v2627_v25 = vadd.f32 %v2613_v17, %v6766_v7  ;;  %v2760_v17 = vadd.f32 %v2747_v15, %v2738_v26 }
 0x40f   : > { %v6928_v45 = vsel %vm836_vm0, 0.0, %v2538_v34  ;;  %v2562_v58 = vsel %vm836_vm0, %v2538_v34, 0.0  ;;  %v2394_v34 = vmax.f32 %v6923_v42, %v2362_v16 }
 0x410   : > { %2696 = vrot.lane.b32.xlu0 %v6928_v45, %s5063_s7  ;;  %2752 = vrot.lane.b32.xlu1 %v6928_v45, %s5062_s29  ;;  %v2647_v33 = vrot.slane %v6928_v45, 2  ;;  %v2648_v4 = vrot.slane %v2562_v58, 2  ;;  %v2593_v35 = vrot.slane %v6928_v45, 1  ;;  %v2594_v57 = vrot.slane %v2562_v58, 1 }
 0x412   : > { %v2649_v39 = vsel %vm1212_vm2, %v2647_v33, %v2648_v4  ;;  %v6939_v48 = vsel %vm1003_vm1, %v2593_v35, %v2594_v57 }
 0x413   : > { %v2797_v19 = vpack.c.bf16 %v2649_v39, %v2646_v61  ;;  %v6949_v61 = vld [vmem:[%s7352_s5 + $0x1] ss:$0 sm:$0xff] }
 0x414   : > { %2730 = vrot.lane.b32.xlu0 %v2649_v39, %s5061_s27  ;;  %2774 = vrot.lane.b32.xlu1 %v6939_v48, %s5063_s7 }
 0x415   : > { %4553 = vmatmul.mubr.bf16.vlgmr.msra.gmra.mrb[64].mxu1 %v2797_v19  ;;  %v2680_v19 = vadd.f32 %v2665_v40, %v2626_v37 }
 0x417   : > { %v4242_v47 = vpop.f32.mrb[44].mxu1  ;;  %v2704_v18 = vadd.f32 %v2689_v44, %v2680_v19 }
 0x418   : > { %v4243_v55 = vpop.f32.mrb[45].mxu1  ;;  %2620 = vrot.lane.b32.xlu1 %v6939_v48, %s5061_s27 }
 0x419   : > { %v4244_v43 = vadd.f32 %v4243_v55, %v4242_v47  ;;  %v4245_v0 = vpop.f32.mrb[46].mxu1  ;;  %v2681_v47 = vadd.f32 %v2667_v50, %v2627_v25  ;;  %v2769_v55 = vpop.permute.xlu0 %2768 }
 0x41a   : > { %v4246_v28 = vpop.f32.mrb[47].mxu1  ;;  %v2784_v40 = vadd.f32 %v2769_v55, %v2760_v17 }
 0x41b   : > { %v2142_v23 = vadd.f32 %v6949_v61, %v4244_v43  ;;  %v4247_v22 = vadd.f32 %v4246_v28, %v4245_v0  ;;  %v2705_v28 = vadd.f32 %v2691_v51, %v2681_v47 }
 0x41c   : > { %2674 = vrot.lane.b32.xlu1 %v2649_v39, %s5062_s29 }
 0x41d   : > { %v2303_v41 = vadd.f32 %v7623_v53, %v2142_v23  ;;  %v2145_v2 = vadd.f32 %v6949_v61, %v4247_v22  ;;  %v2792_v5 = vpack.c.bf16 %v2705_v28, %v2704_v18 }
 0x41f   : > { %v2363_v27 = vmul.f32 0.2, %v2303_v41  ;;  %v2306_v52 = vadd.f32 %v7624_v29, %v2145_v2  ;;  %v4248_v30 = vpop.f32.mrb[48].mxu1 }
 0x420   : > { %v4249_v59 = vpop.f32.mrb[49].mxu1 }
 0x421   : > { %v2395_v56 = vmax.f32 %v2303_v41, %v2363_v27  ;;  %v2364_v60 = vmul.f32 0.2, %v2306_v52  ;;  %v4250_v8 = vadd.f32 %v4249_v59, %v4248_v30  ;;  %v4251_v13 = vpop.f32.mrb[50].mxu1  ;;  %v7626_v30 = vld [vmem:[#allocation32_spill] sm:$0xff] }
 0x422   : > { %v4252_v58 = vpop.f32.mrb[51].mxu1  ;;  %v2749_v39 = vpop.permute.xlu1 %2748 }
 0x423   : > { %v2415_v33 = vmax.f32 %v2393_v1, %v2395_v56  ;;  %v2396_v4 = vmax.f32 %v2306_v52, %v2364_v60  ;;  %v2150_v35 = vadd.f32 %v6949_v61, %v4250_v8  ;;  %v4253_v57 = vadd.f32 %v4252_v58, %v4251_v13 }
 0x424   : > { %v2761_v0 = vadd.f32 %v2749_v39, %v2739_v49 }
 0x425   : > { %2431 = vst [vmem:[#allocation2 + $0x50] sm:$0xff] %v2415_v33  ;;  %v2416_v43 = vmax.f32 %v2394_v34, %v2396_v4  ;;  %v2311_v7 = vadd.f32 %v6711_v63, %v2150_v35  ;;  %v2153_v42 = vadd.f32 %v6949_v61, %v4253_v57  ;;  %v7627_v34 = vld [vmem:[#allocation63_spill] sm:$0xff] }
 0x426   : > { %v2771_v22 = vpop.permute.xlu1 %2770 }
 0x427   : > { %2432 = vst [vmem:[#allocation2 + $0x58] sm:$0xff] %v2416_v43  ;;  %v2314_v23 = vadd.f32 %v6715_v31, %v2153_v42  ;;  %v2785_v10 = vadd.f32 %v2771_v22, %v2761_v0  ;;  %v2365_v29 = vmul.f32 0.2, %v2311_v7 }
 0x429   : > { %v2793_v12 = vpack.c.bf16 %v2785_v10, %v2784_v40  ;;  %v2366_v13 = vmul.f32 0.2, %v2314_v23  ;;  %v2397_v35 = vmax.f32 %v2311_v7, %v2365_v29 }
 0x42b   : > { %2986 = vmatprep.mubr.bf16.mxu0 %v2793_v12  ;;  %v2398_v19 = vmax.f32 %v2314_v23, %v2366_v13 }
 0x42c   : > { %2987 = vmatmul.mubr.bf16.vlgmr.msra.gmra.mrb[64].mxu0 %v2792_v5 }
 0x42e   : > { %v4254_v50 = vpop.f32.mrb[52].mxu1  ;;  %v2447_v53 = vld [vmem:[#allocation2 + $0x50] ss:$2 sm:$0xff]  ;;  %v2463_v41 = vld [vmem:[#allocation2 + $0x51] ss:$2 sm:$0xff] }
 0x42f   : > { %v4255_v63 = vpop.f32.mrb[53].mxu1  ;;  %v2473_v2 = vmax.f32 %v2447_v53, %v2463_v41 }
 0x430   : > { %v4256_v16 = vadd.f32 %v4255_v63, %v4254_v50  ;;  %v4257_v15 = vpop.f32.mrb[54].mxu1 }
 0x431   : > { %v4258_v9 = vpop.f32.mrb[55].mxu1  ;;  %v2539_v51 = vrot.slane %v2473_v2, 7 }
 0x432   : > { %v2158_v27 = vadd.f32 %v6949_v61, %v4256_v16  ;;  %v4259_v31 = vadd.f32 %v4258_v9, %v4257_v15 }
 0x433   : > { %v6968_v52 = vsel %vm836_vm0, 0.0, %v2539_v51  ;;  %v2563_v44 = vsel %vm836_vm0, %v2539_v51, 0.0 }
 0x434   : > { %v2319_v37 = vadd.f32 %v7626_v30, %v2158_v27  ;;  %v2161_v59 = vadd.f32 %v6949_v61, %v4259_v31  ;;  %2754 = vrot.lane.b32.xlu0 %v6968_v52, %s5062_s29  ;;  %2698 = vrot.lane.b32.xlu1 %v6968_v52, %s5063_s7  ;;  %v2596_v1 = vrot.slane %v6968_v52, 1  ;;  %v2597_v56 = vrot.slane %v2563_v44, 1 }
 0x435   : > { %v2650_v60 = vrot.slane %v6968_v52, 2  ;;  %v2651_v8 = vrot.slane %v2563_v44, 2 }
 0x436   : > { %v2367_v25 = vmul.f32 0.2, %v2319_v37  ;;  %v2322_v58 = vadd.f32 %v7627_v34, %v2161_v59  ;;  %v6981_v33 = vsel %vm1003_vm1, %v2596_v1, %v2597_v56 }
 0x437   : > { %v2652_v4 = vsel %vm1212_vm2, %v2650_v60, %v2651_v8 }
 0x438   : > { %v2399_v57 = vmax.f32 %v2319_v37, %v2367_v25  ;;  %v2368_v39 = vmul.f32 0.2, %v2322_v58  ;;  %2776 = vrot.lane.b32.xlu0 %v6981_v33, %s5063_s7  ;;  %2732 = vrot.lane.b32.xlu1 %v2652_v4, %s5061_s27 }
 0x43a   : > { %v2417_v26 = vmax.f32 %v2397_v35, %v2399_v57  ;;  %v2400_v49 = vmax.f32 %v2322_v58, %v2368_v39  ;;  %v2615_v39 = vpop.permute.xlu0 %2614 }
 0x43c   : > { %2433 = vst [vmem:[#allocation2 + $0x60] sm:$0xff] %v2417_v26  ;;  %v2418_v47 = vmax.f32 %v2398_v19, %v2400_v49  ;;  %2622 = vrot.lane.b32.xlu0 %v6981_v33, %s5061_s27  ;;  %2676 = vrot.lane.b32.xlu1 %v2652_v4, %s5062_s29  ;;  %v2617_v19 = vpop.permute.xlu1 %2616 }
 0x43e   : > { %2434 = vst [vmem:[#allocation2 + $0x68] sm:$0xff] %v2418_v47  ;;  %v2669_v26 = vpop.permute.xlu0 %2668 }
 0x445   : > { %v2449_v55 = vld [vmem:[#allocation2 + $0x60] ss:$2 sm:$0xff]  ;;  %v2465_v43 = vld [vmem:[#allocation2 + $0x61] ss:$2 sm:$0xff] }
 0x446   : > { %v4260_v7 = vpop.f32.mrb[56].mxu1  ;;  %v2474_v42 = vmax.f32 %v2449_v55, %v2465_v43  ;;  %v2671_v55 = vpop.permute.xlu1 %2670 }
 0x447   : > { %v4261_v17 = vpop.f32.mrb[57].mxu1 }
 0x448   : > { %v4262_v0 = vadd.f32 %v4261_v17, %v4260_v7  ;;  %v4263_v28 = vpop.f32.mrb[58].mxu1  ;;  %v2540_v22 = vrot.slane %v2474_v42, 7 }
 0x449   : > { %v4264_v40 = vpop.f32.mrb[59].mxu1 }
 0x44a   : > { %v4265_v23 = vadd.f32 %v4264_v40, %v4263_v28  ;;  %v2166_v10 = vadd.f32 %v6949_v61, %v4262_v0  ;;  %v6992_v18 = vsel %vm836_vm0, 0.0, %v2540_v22  ;;  %v2564_v12 = vsel %vm836_vm0, %v2540_v22, 0.0 }
 0x44b   : > { %2756 = vrot.lane.b32.xlu1 %v6992_v18, %s5062_s29  ;;  %v2653_v5 = vrot.slane %v6992_v18, 2  ;;  %v2654_v50 = vrot.slane %v2564_v12, 2  ;;  %v2599_v53 = vrot.slane %v6992_v18, 1  ;;  %v2600_v41 = vrot.slane %v2564_v12, 1 }
 0x44c   : > { %v2327_v63 = vadd.f32 %v6885_v3, %v2166_v10  ;;  %v2169_v2 = vadd.f32 %v6949_v61, %v4265_v23  ;;  %v7628_v10 = vld [vmem:[#allocation65_spill] sm:$0xff] }
 0x44d   : > { %v2655_v16 = vsel %vm1212_vm2, %v2653_v5, %v2654_v50  ;;  %v7003_v15 = vsel %vm1003_vm1, %v2599_v53, %v2600_v41  ;;  %v2629_v41 = vadd.f32 %v2617_v19, %v6855_v20 }
 0x44e   : > { %v2330_v9 = vadd.f32 %v6892_v21, %v2169_v2  ;;  %2734 = vrot.lane.b32.xlu0 %v2655_v16, %s5061_s27  ;;  %v2800_v51 = vpack.c.bf16 %v2655_v16, %v2652_v4  ;;  %v2369_v37 = vmul.f32 0.2, %v2327_v63 }
 0x44f   : > { %2778 = vrot.lane.b32.xlu1 %v7003_v15, %s5063_s7 }
 0x450   : > { %4556 = vmatprep.mubr.bf16.mxu1 %v2800_v51  ;;  %v2370_v56 = vmul.f32 0.2, %v2330_v9  ;;  %v2401_v13 = vmax.f32 %v2327_v63, %v2369_v37  ;;  %v2683_v51 = vadd.f32 %v2671_v55, %v2629_v41 }
 0x452   : > { %2678 = vrot.lane.b32.xlu0 %v2655_v16, %s5062_s29  ;;  %v2402_v58 = vmax.f32 %v2330_v9, %v2370_v56  ;;  %v2695_v0 = vpop.permute.xlu1 %2694  ;;  %v2628_v9 = vadd.f32 %v2615_v39, %v6815_v36 }
 0x453   : > { %2624 = vrot.lane.b32.xlu1 %v7003_v15, %s5061_s27 }
 0x456   : > { %v2729_v53 = vpop.permute.xlu1 %2728 }
 0x457   : > { %v2741_v16 = vadd.f32 %v2729_v53, %v6906_v46 }
 0x45a   : > { %v4266_v3 = vpop.f32.mrb[60].mxu1 }
 0x45b   : > { %v4267_v27 = vpop.f32.mrb[61].mxu1 }
 0x45c   : > { %v4268_v31 = vadd.f32 %v4267_v27, %v4266_v3  ;;  %v4269_v29 = vpop.f32.mrb[62].mxu1 }
 0x45d   : > { %v4270_v44 = vpop.f32.mrb[63].mxu1 }
 0x45e   : > { %v2174_v30 = vadd.f32 %v6949_v61, %v4268_v31  ;;  %v4271_v21 = vadd.f32 %v4270_v44, %v4269_v29  ;;  %v2682_v29 = vadd.f32 %v2669_v26, %v2628_v9  ;;  %v2707_v44 = vadd.f32 %v2695_v0, %v2683_v51  ;;  %v4789_v9 = vld [vmem:[#allocation11 + $0x48] sm:$0xff]  }
 0x45f   : > { %v4790_v51 = vld [vmem:[#allocation11 + $0x8] sm:$0xff]  }
 0x460   : > { %v2335_v59 = vadd.f32 %v6882_v6, %v2174_v30  ;;  %v2177_v1 = vadd.f32 %v6949_v61, %v4271_v21  ;;  %v2693_v61 = vpop.permute.xlu0 %2692  ;;  %v7629_v21 = vld [vmem:[#allocation27_spill] sm:$0xff] }
 0x462   : > { %v2371_v60 = vmul.f32 0.2, %v2335_v59  ;;  %v2338_v8 = vadd.f32 %v6888_v54, %v2177_v1 }
 0x464   : > { %v2403_v25 = vmax.f32 %v2335_v59, %v2371_v60  ;;  %v2372_v34 = vmul.f32 0.2, %v2338_v8  ;;  %v2727_v23 = vpop.permute.xlu0 %2726  ;;  %v2706_v59 = vadd.f32 %v2693_v61, %v2682_v29 }
 0x465   : > { %v2740_v2 = vadd.f32 %v2727_v23, %v6866_v38  ;;  %v4787_v23 = vld [vmem:[#allocation11 + $0x40] sm:$0xff]  }
 0x466   : > { %v2419_v4 = vmax.f32 %v2401_v13, %v2403_v25  ;;  %v2404_v35 = vmax.f32 %v2338_v8, %v2372_v34  ;;  %v2795_v56 = vpack.c.bf16 %v2707_v44, %v2706_v59  ;;  %4348 = vmatprep.subr.bf16.mxu0 %v4787_v23 }
 0x468   : > { %2435 = vst [vmem:[#allocation2 + $0x70] sm:$0xff] %v2419_v4  ;;  %v2420_v57 = vmax.f32 %v2402_v58, %v2404_v35  ;;  %v2751_v50 = vpop.permute.xlu0 %2750 }
 0x469   : > { %v2762_v27 = vadd.f32 %v2751_v50, %v2740_v2 }
 0x46a   : > { %2436 = vst [vmem:[#allocation2 + $0x78] sm:$0xff] %v2420_v57 }
 0x46c   : > { %v2773_v3 = vpop.permute.xlu0 %2772 }
 0x46d   : > { %v2786_v20 = vadd.f32 %v2773_v3, %v2762_v27 }
 0x470   : > { %v2619_v46 = vpop.permute.xlu0 %2618 }
 0x471   : > { %v2451_v49 = vld [vmem:[#allocation2 + $0x70] ss:$2 sm:$0xff]  ;;  %v2467_v6 = vld [vmem:[#allocation2 + $0x71] ss:$2 sm:$0xff]  ;;  %v2630_v26 = vadd.f32 %v2619_v46, %v6896_v14  ;;  %v4795_v46 = vld [vmem:[#allocation11 + $0x60] sm:$0xff]  }
 0x472   : > { %v2475_v47 = vmax.f32 %v2451_v49, %v2467_v6 }
 0x474   : > { %v2541_v43 = vrot.slane %v2475_v47, 7  ;;  %v2673_v60 = vpop.permute.xlu0 %2672 }
 0x475   : > { %v2684_v55 = vadd.f32 %v2673_v60, %v2630_v26  ;;  %v4798_v60 = vld [vmem:[#allocation11 + $0x28] sm:$0xff]   ;;  %v4799_v26 = vld [vmem:[#allocation11 + $0x70] sm:$0xff]  }
 0x476   : > { %v2557_v54 = vsel %vm836_vm0, 0.0, %v2541_v43  ;;  %v2565_v7 = vsel %vm836_vm0, %v2541_v43, 0.0 }
 0x477   : > { %v2718_v42 = vrot.slane %v2557_v54, 2  ;;  %2758 = vrot.lane.b32.xlu0 %v2557_v54, %s5062_s29  ;;  %v2719_v17 = vrot.slane %v2565_v7, 2  ;;  %v2714_v28 = vrot.slane %v2557_v54, 1  ;;  %v2715_v40 = vrot.slane %v2565_v7, 1 }
 0x479   : > { %v2720_v22 = vsel %vm1212_vm2, %v2718_v42, %v2719_v17  ;;  %v7024_v5 = vsel %vm1003_vm1, %v2714_v28, %v2715_v40 }
 0x47a   : > { %2736 = vrot.lane.b32.xlu1 %v2720_v22, %s5061_s27  ;;  %v2803_v12 = vpack.c.bf16 %v7628_v10, %v2720_v22  ;;  %s4135_s27 = sshll.u32 %s5123_s25, 8 }
 0x47b   : > { %2702 = vrot.lane.b32.xlu0 %v2557_v54, %s5063_s7  ;;  %s7301_s10 = scalar_lea.hbm %s7353_s6, %s4135_s27 }
 0x47c   : > { %4557 = vmatmul.mubr.bf16.gmra.mrb[68].mxu1 %v2803_v12  ;;  %v4788_v12 = vld [vmem:[#allocation11] sm:$0xff]  }
 0x47d   : > { %4349 = vmatpush3.bf16.msra.mxu0 %v4788_v12 }
 0x47e   : > { %2780 = vrot.lane.b32.xlu1 %v7024_v5, %s5063_s7  ;;  %4350 = vmatprep.subr.bf16.mxu0 %v4789_v9 }
 0x481   : > { %4351 = vmatpush3.bf16.msra.mxu0 %v4790_v51 }
 0x482   : > { %2700 = vrot.lane.b32.xlu1 %v6992_v18, %s5063_s7  ;;  %v2753_v63 = vpop.permute.xlu1 %2752  ;;  %v2697_v13 = vpop.permute.xlu0 %2696 }
 0x483   : > { %v2763_v31 = vadd.f32 %v2753_v63, %v2741_v16  ;;  %v2708_v17 = vadd.f32 %v2697_v13, %v2684_v55  ;;  %v7054_v13 = vld [vmem:[%s7352_s5 + $0x2] ss:$0 sm:$0xff] }
 0x486   : > { %v2775_v30 = vpop.permute.xlu1 %2774  ;;  %3264 = vrot.lane.b32.xlu1 %v7629_v21, %s5062_s29  ;;  %v2731_v34 = vpop.permute.xlu0 %2730 }
 0x487   : > { %v2787_v37 = vadd.f32 %v2775_v30, %v2763_v31  ;;  %v2742_v39 = vadd.f32 %v2731_v34, %v6939_v48 }
 0x489   : > { %v2796_v1 = vpack.c.bf16 %v2787_v37, %v2786_v20  ;;  %v4792_v37 = vld [vmem:[#allocation11 + $0x10] sm:$0xff]  }
 0x48a   : > { %v2621_v38 = vpop.permute.xlu1 %2620 }
 0x48b   : > { %2994 = vmatprep.mubr.bf16.mxu0 %v2796_v1  ;;  %v2631_v35 = vadd.f32 %v2621_v38, %v6928_v45 }
 0x48c   : > { %2995 = vmatmul.mubr.bf16.gmra.mrb[68].mxu0 %v2795_v56 }
 0x48e   : > { %v2675_v36 = vpop.permute.xlu1 %2674 }
 0x48f   : > { %v2685_v49 = vadd.f32 %v2675_v36, %v2631_v35  ;;  %v4797_v36 = vld [vmem:[#allocation11 + $0x68] sm:$0xff]  }
 0x4a6   : > { %v2699_v8 = vpop.permute.xlu1 %2698  ;;  %v2755_v58 = vpop.permute.xlu0 %2754 }
 0x4a7   : > { %v2764_v47 = vadd.f32 %v2755_v58, %v2742_v39  ;;  %v2709_v43 = vadd.f32 %v2699_v8, %v2685_v49  ;;  %v4800_v49 = vld [vmem:[#allocation11 + $0x30] sm:$0xff]  }
 0x4a9   : > { %v2798_v28 = vpack.c.bf16 %v2709_v43, %v2708_v17  ;;  %v4801_v43 = vld [vmem:[#allocation11 + $0x78] sm:$0xff]  }
 0x4aa   : > { %v2733_v25 = vpop.permute.xlu1 %2732  ;;  %v2777_v6 = vpop.permute.xlu0 %2776 }
 0x4ab   : > { %v2743_v19 = vadd.f32 %v2733_v25, %v6981_v33  ;;  %v2788_v7 = vadd.f32 %v2777_v6, %v2764_v47 }
 0x4ae   : > { %v2677_v4 = vpop.permute.xlu1 %2676  ;;  %v2623_v45 = vpop.permute.xlu0 %2622 }
 0x4af   : > { %v2632_v3 = vadd.f32 %v2623_v45, %v6968_v52 }
 0x4bd   : > { %v2757_v57 = vpop.permute.xlu1 %2756 }
 0x4be   : > { %v2765_v61 = vadd.f32 %v2757_v57, %v2743_v19 }
 0x4c0   : > { %v2735_v48 = vpop.permute.xlu0 %2734 }
 0x4c1   : > { %v2779_v54 = vpop.permute.xlu1 %2778  ;;  %v2744_v2 = vadd.f32 %v2735_v48, %v7003_v15  ;;  %v4791_v15 = vld [vmem:[#allocation11 + $0x50] sm:$0xff]  }
 0x4c2   : > { %v2789_v42 = vadd.f32 %v2779_v54, %v2765_v61  ;;  %4352 = vmatprep.subr.bf16.mxu0 %v4791_v15  ;;  %v4802_v54 = vld [vmem:[#allocation11 + $0x38] sm:$0xff]   ;;  %v4807_v15 = vld [vmem:[#allocation11 + $0xd0] sm:$0xff]  }
 0x4c3   : > { %4353 = vmatpush3.bf16.msra.mxu0 %v4792_v37  ;;  %v4808_v37 = vld [vmem:[#allocation11 + $0x90] sm:$0xff]  }
 0x4c4   : > { %v2799_v0 = vpack.c.bf16 %v2789_v42, %v2788_v7  ;;  %v2679_v22 = vpop.permute.xlu0 %2678  ;;  %4354 = vmatprep.subr.bf16.mxu0 %v4793_v24 }
 0x4c5   : > { %v2625_v33 = vpop.permute.xlu1 %2624 }
 0x4c6   : > { %3002 = vmatprep.mubr.bf16.mxu0 %v2799_v0  ;;  %v2633_v27 = vadd.f32 %v2625_v33, %v6992_v18 }
 0x4c7   : > { %3003 = vmatmul.mubr.bf16.gmra.mrb[72].mxu0 %v2798_v28 }
 0x4c8   : > { %v2687_v59 = vadd.f32 %v2679_v22, %v2633_v27 }
 0x4e8   : > { %v7040_v40 = vpop.f32.mrb[64].mxu1 }
 0x4e9   : > { %v3053_v14 = vpop.f32.mrb[65].mxu1  ;;  %v2759_v41 = vpop.permute.xlu0 %2758 }
 0x4ea   : > { %v7042_v50 = vpop.f32.mrb[66].mxu1  ;;  %v2766_v31 = vadd.f32 %v2759_v41, %v2744_v2 }
 0x4eb   : > { %v3056_v53 = vpop.f32.mrb[67].mxu1 }
 0x4ec   : > { %v2737_v63 = vpop.permute.xlu1 %2736 }
 0x4ed   : > { %v2745_v16 = vadd.f32 %v2737_v63, %v7024_v5  ;;  %v2703_v20 = vpop.permute.xlu0 %2702  ;;  %v2686_v5 = vadd.f32 %v2677_v4, %v2632_v3  ;;  %v4803_v3 = vld [vmem:[#allocation11 + $0xc0] sm:$0xff]  }
 0x4ee   : > { %v2711_v52 = vadd.f32 %v2703_v20, %v2687_v59  ;;  %4388 = vmatprep.subr.bf16.mxu1 %v4803_v3  ;;  %v4806_v20 = vld [vmem:[#allocation11 + $0x88] sm:$0xff]   ;;  %v4810_v59 = vld [vmem:[#allocation11 + $0x98] sm:$0xff]  }
 0x4ef   : > { %v2767_v29 = vadd.f32 %v4708_v62, %v2745_v16  ;;  %v4794_v62 = vld [vmem:[#allocation11 + $0x18] sm:$0xff]  }
 0x4f0   : > { %v2781_v44 = vpop.permute.xlu1 %2780  ;;  %4355 = vmatpush3.bf16.msra.mxu0 %v4794_v62 }
 0x4f1   : > { %v2791_v30 = vadd.f32 %v6925_v11, %v2767_v29  ;;  %v2790_v21 = vadd.f32 %v2781_v44, %v2766_v31  ;;  %v4796_v11 = vld [vmem:[#allocation11 + $0x20] sm:$0xff]   ;;  %4356 = vmatprep.subr.bf16.mxu0 %v4795_v46 }
 0x4f2   : > { %v4804_v29 = vld [vmem:[#allocation11 + $0x80] sm:$0xff]  }
 0x4f3   : > { %v2802_v1 = vpack.c.bf16 %v2791_v30, %v2790_v21  ;;  %4389 = vmatpush3.bf16.msra.mxu1 %v4804_v29  ;;  %v4805_v21 = vld [vmem:[#allocation11 + $0xc8] sm:$0xff]  }
 0x4f4   : > { %v2701_v56 = vpop.permute.xlu1 %2700  ;;  %4357 = vmatpush3.bf16.msra.mxu0 %v4796_v11  ;;  %4390 = vmatprep.subr.bf16.mxu1 %v4805_v21  ;;  %v4814_v11 = vld [vmem:[#allocation11 + $0xa8] sm:$0xff]  }
 0x4f5   : > { %v2710_v18 = vadd.f32 %v2701_v56, %v2686_v5  ;;  %3010 = vmatprep.mubr.bf16.mxu0 %v2802_v1  ;;  %4358 = vmatprep.subr.bf16.mxu0 %v4797_v36  ;;  %v4809_v5 = vld [vmem:[#allocation11 + $0xd8] sm:$0xff]   ;;  %v4811_v1 = vld [vmem:[#allocation11 + $0xe0] sm:$0xff]  }
 0x4f6   : > { %v4812_v56 = vld [vmem:[#allocation11 + $0xa0] sm:$0xff]  }
 0x4f7   : > { %v2801_v38 = vpack.c.bf16 %v2711_v52, %v2710_v18  ;;  %4391 = vmatpush3.bf16.msra.mxu1 %v4806_v20  ;;  %v4813_v18 = vld [vmem:[#allocation11 + $0xe8] sm:$0xff]  }
 0x4f8   : > { %4359 = vmatpush3.bf16.msra.mxu0 %v4798_v60  ;;  %4392 = vmatprep.subr.bf16.mxu1 %v4807_v15 }
 0x4f9   : > { %3011 = vmatmul.mubr.bf16.gmra.mrb[76].mxu0 %v2801_v38  ;;  %4360 = vmatprep.subr.bf16.mxu0 %v4799_v26  ;;  %v4818_v26 = vld [vmem:[#allocation11 + $0xb8] sm:$0xff]  }
 0x4fb   : > { %4393 = vmatpush3.bf16.msra.mxu1 %v4808_v37 }
 0x4fc   : > { %4361 = vmatpush3.bf16.msra.mxu0 %v4800_v49  ;;  %4394 = vmatprep.subr.bf16.mxu1 %v4809_v5 }
 0x4fd   : > { %4362 = vmatprep.subr.bf16.mxu0 %v4801_v43 }
 0x4ff   : > { %v4312_v8 = vpop.f32.mrb[64].mxu0  ;;  %4395 = vmatpush3.bf16.msra.mxu1 %v4810_v59 }
 0x500   : > { %v4313_v25 = vpop.f32.mrb[65].mxu0  ;;  %4363 = vmatpush3.bf16.msra.mxu0 %v4802_v54  ;;  %4396 = vmatprep.subr.bf16.mxu1 %v4811_v1 }
 0x501   : > { %v4314_v34 = vadd.f32 %v4313_v25, %v4312_v8  ;;  %v4315_v58 = vpop.f32.mrb[66].mxu0 }
 0x502   : > { %v4316_v4 = vpop.f32.mrb[67].mxu0 }
 0x503   : > { %v2989_v35 = vadd.f32 %v4314_v34, %v7054_v13  ;;  %v4317_v57 = vadd.f32 %v4316_v4, %v4315_v58  ;;  %4397 = vmatpush3.bf16.msra.mxu1 %v4812_v56  ;;  %v4815_v34 = vld [vmem:[#allocation11 + $0xf0] sm:$0xff]  }
 0x504   : > { %4398 = vmatprep.subr.bf16.mxu1 %v4813_v18  ;;  %v4816_v58 = vld [vmem:[#allocation11 + $0xb0] sm:$0xff]  }
 0x505   : > { %v3054_v39 = vadd.f32 %v3053_v14, %v2989_v35  ;;  %v2992_v19 = vadd.f32 %v4317_v57, %v7054_v13 }
 0x507   : > { %v3084_v6 = vmul.f32 0.2, %v3054_v39  ;;  %v3057_v47 = vadd.f32 %v3056_v53, %v2992_v19  ;;  %4399 = vmatpush3.bf16.msra.mxu1 %v4814_v11  ;;  %v4817_v19 = vld [vmem:[#allocation11 + $0xf8] sm:$0xff]  }
 0x508   : > { %4400 = vmatprep.subr.bf16.mxu1 %v4815_v34 }
 0x509   : > { %v3085_v61 = vmul.f32 0.2, %v3057_v47  ;;  %v3092_v55 = vmax.f32 %v3054_v39, %v3084_v6 }
 0x50b   : > { %v3190_v7 = vrot.slane %v3092_v55, 7  ;;  %v3093_v42 = vmax.f32 %v3057_v47, %v3085_v61  ;;  %4401 = vmatpush3.bf16.msra.mxu1 %v4816_v58  ;;  %v7157_v58 = vld [vmem:[#allocation11 + $0x100] sm:$0xff]  }
 0x50c   : > { %4402 = vmatprep.subr.bf16.mxu1 %v4817_v19  ;;  %4560 = vmatprep.subr.bf16.mxu0 %v7157_v58 }
 0x50d   : > { %v7059_v17 = vsel %vm836_vm0, 0.0, %v3190_v7  ;;  %v3214_v0 = vsel %vm836_vm0, %v3190_v7, 0.0  ;;  %v3191_v28 = vrot.slane %v3093_v42, 7 }
 0x50e   : > { %3316 = vrot.lane.b32.xlu1 %v7059_v17, %s5062_s29  ;;  %v3288_v45 = vrot.slane %v7059_v17, 2  ;;  %v3289_v48 = vrot.slane %v3214_v0, 2  ;;  %v3236_v22 = vrot.slane %v7059_v17, 1  ;;  %v3237_v23 = vrot.slane %v3214_v0, 1 }
 0x50f   : > { %v7067_v33 = vsel %vm836_vm0, 0.0, %v3191_v28  ;;  %v3215_v14 = vsel %vm836_vm0, %v3191_v28, 0.0  ;;  %4403 = vmatpush3.bf16.msra.mxu1 %v4818_v26 }
 0x510   : > { %3318 = vrot.lane.b32.xlu0 %v7067_v33, %s5062_s29  ;;  %v7073_v12 = vsel %vm1212_vm2, %v3288_v45, %v3289_v48  ;;  %v3239_v53 = vrot.slane %v7067_v33, 1  ;;  %v3240_v41 = vrot.slane %v3215_v14, 1  ;;  %v3291_v63 = vrot.slane %v7067_v33, 2  ;;  %4584 = vmatprep.subr.bf16.mxu1 %v7157_v58 }
 0x511   : > { %v7080_v2 = vsel %vm1003_vm1, %v3236_v22, %v3237_v23  ;;  %v3292_v16 = vrot.slane %v3215_v14, 2 }
 0x512   : > { %3350 = vrot.lane.b32.xlu1 %v7073_v12, %s5062_s29  ;;  %v7085_v9 = vsel %vm1003_vm1, %v3239_v53, %v3240_v41  ;;  %v3265_v41 = vpop.permute.xlu1 %3264 }
 0x513   : > { %v7090_v51 = vsel %vm1212_vm2, %v3291_v63, %v3292_v16  ;;  %v7145_v21 = vadd.f32 %v3265_v41, %v7625_v32 }
 0x514   : > { %3266 = vrot.lane.b32.xlu0 %v7080_v2, %s5062_s29 }
 0x516   : > { %3268 = vrot.lane.b32.xlu1 %v7085_v9, %s5062_s29 }
 0x518   : > { %3352 = vrot.lane.b32.xlu0 %v7090_v51, %s5062_s29 }
 0x54f   : > { %v7094_v27 = vpop.f32.mrb[68].mxu1 }
 0x550   : > { %v7096_v31 = vpop.f32.mrb[69].mxu1 }
 0x551   : > { %v7098_v44 = vpop.f32.mrb[70].mxu1 }
 0x552   : > { %v7100_v30 = vpop.f32.mrb[71].mxu1 }
 0x55f   : > { %v4318_v52 = vpop.f32.mrb[68].mxu0 }
 0x560   : > { %v4319_v24 = vpop.f32.mrb[69].mxu0 }
 0x561   : > { %v4320_v62 = vadd.f32 %v4319_v24, %v4318_v52  ;;  %v4321_v38 = vpop.f32.mrb[70].mxu0 }
 0x562   : > { %v4322_v46 = vpop.f32.mrb[71].mxu0 }
 0x563   : > { %v2997_v36 = vadd.f32 %v4320_v62, %v7054_v13  ;;  %v4323_v60 = vadd.f32 %v4322_v46, %v4321_v38 }
 0x565   : > { %v3062_v8 = vadd.f32 %v7040_v40, %v2997_v36  ;;  %v3000_v25 = vadd.f32 %v4323_v60, %v7054_v13 }
 0x567   : > { %v3086_v4 = vmul.f32 0.2, %v3062_v8  ;;  %v3065_v35 = vadd.f32 %v7042_v50, %v3000_v25 }
 0x569   : > { %v3087_v57 = vmul.f32 0.2, %v3065_v35  ;;  %v3094_v39 = vmax.f32 %v3062_v8, %v3086_v4  ;;  %v7159_v4 = vld [vmem:[#allocation11 + $0x108] sm:$0xff]  }
 0x56b   : > { %v3192_v49 = vrot.slane %v3094_v39, 7  ;;  %v3095_v6 = vmax.f32 %v3065_v35, %v3087_v57 }
 0x56d   : > { %v7107_v47 = vsel %vm836_vm0, 0.0, %v3192_v49  ;;  %v3216_v40 = vsel %vm836_vm0, %v3192_v49, 0.0  ;;  %v3193_v61 = vrot.slane %v3095_v6, 7 }
 0x56e   : > { %v3294_v55 = vrot.slane %v7107_v47, 2  ;;  %3320 = vrot.lane.b32.xlu1 %v7107_v47, %s5062_s29  ;;  %v3295_v50 = vrot.slane %v3216_v40, 2  ;;  %v3242_v43 = vrot.slane %v7107_v47, 1  ;;  %v3243_v42 = vrot.slane %v3216_v40, 1 }
 0x56f   : > { %v7115_v54 = vsel %vm836_vm0, 0.0, %v3193_v61  ;;  %v3217_v7 = vsel %vm836_vm0, %v3193_v61, 0.0 }
 0x570   : > { %3322 = vrot.lane.b32.xlu0 %v7115_v54, %s5062_s29  ;;  %v7121_v0 = vsel %vm1212_vm2, %v3294_v55, %v3295_v50  ;;  %v3245_v28 = vrot.slane %v7115_v54, 1  ;;  %v3246_v45 = vrot.slane %v3217_v7, 1  ;;  %v3297_v48 = vrot.slane %v7115_v54, 2 }
 0x571   : > { %v7128_v22 = vsel %vm1003_vm1, %v3242_v43, %v3243_v42  ;;  %v3298_v14 = vrot.slane %v3217_v7, 2  ;;  %v7195_v42 = vld [vmem:[#allocation11 + $0x110] sm:$0xff]  }
 0x572   : > { %3354 = vrot.lane.b32.xlu1 %v7121_v0, %s5062_s29  ;;  %v7133_v23 = vsel %vm1003_vm1, %v3245_v28, %v3246_v45 }
 0x573   : > { %v7138_v53 = vsel %vm1212_vm2, %v3297_v48, %v3298_v14 }
 0x574   : > { %3270 = vrot.lane.b32.xlu0 %v7128_v22, %s5062_s29 }
 0x576   : > { %3272 = vrot.lane.b32.xlu1 %v7133_v23, %s5062_s29 }
 0x578   : > { %3356 = vrot.lane.b32.xlu0 %v7138_v53, %s5062_s29 }
 0x580   : > { %v3317_v63 = vpop.permute.xlu1 %3316 }
 0x581   : > { %v3332_v3 = vadd.f32 %v3317_v63, %v7628_v10 }
 0x582   : > { %v3319_v16 = vpop.permute.xlu0 %3318 }
 0x583   : > { %v3333_v29 = vadd.f32 %v3319_v16, %v7073_v12 }
 0x585   : > { %v3378_v20 = vpack.c.bf16 %v3333_v29, %v3332_v3  ;;  %v7203_v3 = vld [vmem:[#allocation11 + $0x118] sm:$0xff]   ;;  %v3351_v29 = vpop.permute.xlu1 %3350 }
 0x586   : > { %v3267_v15 = vpop.permute.xlu0 %3266 }
 0x587   : > { %v3281_v37 = vadd.f32 %v3267_v15, %v7059_v17  ;;  %3672 = vmatprep.mubr.bf16.mxu0 %v3378_v20 }
 0x589   : > { %v3377_v5 = vpack.c.bf16 %v3281_v37, %v7145_v21  ;;  %v7206_v37 = vld [vmem:[#allocation11 + $0x120] sm:$0xff]  }
 0x58b   : > { %3673 = vmatmul.mubr.bf16.vlgmr.msra.gmra.mrb[80].mxu0 %v3377_v5 }
 0x58c   : > { %4561 = vmatpush3.bf16.msra.mxu0 %v7157_v58 }
 0x58d   : > { %4562 = vmatprep.subr.bf16.mxu0 %v7159_v4 }
 0x590   : > { %4563 = vmatpush3.bf16.msra.mxu0 %v7159_v4 }
 0x591   : > { %4564 = vmatprep.subr.bf16.mxu0 %v7195_v42 }
 0x594   : > { %4565 = vmatpush3.bf16.msra.mxu0 %v7195_v42 }
 0x595   : > { %4566 = vmatprep.subr.bf16.mxu0 %v7203_v3 }
 0x598   : > { %4567 = vmatpush3.bf16.msra.mxu0 %v7203_v3 }
 0x599   : > { %4568 = vmatprep.subr.bf16.mxu0 %v7206_v37 }
 0x59a   : > { %v4324_v59 = vpop.f32.mrb[72].mxu0 }
 0x59b   : > { %v4325_v1 = vpop.f32.mrb[73].mxu0 }
 0x59c   : > { %v4326_v56 = vadd.f32 %v4325_v1, %v4324_v59  ;;  %v4327_v52 = vpop.f32.mrb[74].mxu0  ;;  %4569 = vmatpush3.bf16.msra.mxu0 %v7206_v37 }
 0x59d   : > { %v4328_v18 = vpop.f32.mrb[75].mxu0 }
 0x59e   : > { %v3005_v24 = vadd.f32 %v4326_v56, %v7054_v13  ;;  %v4329_v62 = vadd.f32 %v4328_v18, %v4327_v52  ;;  %v4824_v52 = vld [vmem:[#allocation11 + $0x128] sm:$0xff]   ;;  %v3269_v18 = vpop.permute.xlu1 %3268 }
 0x59f   : > { %4570 = vmatprep.subr.bf16.mxu0 %v4824_v52 }
 0x5a0   : > { %v3070_v12 = vadd.f32 %v7096_v31, %v3005_v24  ;;  %v3008_v32 = vadd.f32 %v4329_v62, %v7054_v13  ;;  %4571 = vmatpush3.bf16.msra.mxu0 %v4824_v52 }
 0x5a2   : > { %v3088_v38 = vmul.f32 0.2, %v3070_v12  ;;  %v3073_v46 = vadd.f32 %v7100_v30, %v3008_v32 }
 0x5a4   : > { %v3089_v17 = vmul.f32 0.2, %v3073_v46  ;;  %v3096_v11 = vmax.f32 %v3070_v12, %v3088_v38 }
 0x5a6   : > { %v3194_v36 = vrot.slane %v3096_v11, 7  ;;  %v3097_v60 = vmax.f32 %v3073_v46, %v3089_v17  ;;  %v3353_v11 = vpop.permute.xlu0 %3352 }
 0x5a8   : > { %v7154_v8 = vsel %vm836_vm0, 0.0, %v3194_v36  ;;  %v3218_v25 = vsel %vm836_vm0, %v3194_v36, 0.0  ;;  %v3195_v34 = vrot.slane %v3097_v60, 7 }
 0x5a9   : > { %v3248_v31 = vrot.slane %v7154_v8, 1  ;;  %v3300_v35 = vrot.slane %v7154_v8, 2  ;;  %3324 = vrot.lane.b32.xlu1 %v7154_v8, %s5062_s29  ;;  %v3249_v30 = vrot.slane %v3218_v25, 1  ;;  %v3301_v57 = vrot.slane %v3218_v25, 2 }
 0x5aa   : > { %v7166_v39 = vsel %vm836_vm0, 0.0, %v3195_v34  ;;  %v7169_v19 = vsel %vm836_vm0, %v3195_v34, 0.0  ;;  %v4825_v34 = vld [vmem:[#allocation11 + $0x130] sm:$0xff]  }
 0x5ab   : > { %v7174_v26 = vsel %vm1003_vm1, %v3248_v31, %v3249_v30  ;;  %v7177_v49 = vsel %vm1212_vm2, %v3300_v35, %v3301_v57  ;;  %v3251_v6 = vrot.slane %v7166_v39, 1  ;;  %v3252_v40 = vrot.slane %v7169_v19, 1  ;;  %4572 = vmatprep.subr.bf16.mxu0 %v4825_v34 }
 0x5ac   : > { %3274 = vrot.lane.b32.xlu0 %v7174_v26, %s5062_s29  ;;  %v3303_v24 = vrot.slane %v7166_v39, 2  ;;  %v3304_v17 = vrot.slane %v7169_v19, 2  ;;  %4573 = vmatpush3.bf16.msra.mxu0 %v4825_v34 }
 0x5ad   : > { %3358 = vrot.lane.b32.xlu1 %v7177_v49, %s5062_s29  ;;  %v7191_v61 = vsel %vm1003_vm1, %v3251_v6, %v3252_v40 }
 0x5ae   : > { %v7237_v35 = vsel %vm1212_vm2, %v3303_v24, %v3304_v17 }
 0x5b0   : > { %3326 = vrot.lane.b32.xlu0 %v7166_v39, %s5062_s29 }
 0x5b1   : > { %3276 = vrot.lane.b32.xlu1 %v7191_v61, %s5062_s29 }
 0x5cc   : > { %v4330_v55 = vpop.f32.mrb[76].mxu0 }
 0x5cd   : > { %v4331_v50 = vpop.f32.mrb[77].mxu0 }
 0x5ce   : > { %v4332_v43 = vadd.f32 %v4331_v50, %v4330_v55  ;;  %v4333_v7 = vpop.f32.mrb[78].mxu0 }
 0x5cf   : > { %v4334_v28 = vpop.f32.mrb[79].mxu0 }
 0x5d0   : > { %v3013_v45 = vadd.f32 %v4332_v43, %v7054_v13  ;;  %v4335_v48 = vadd.f32 %v4334_v28, %v4333_v7  ;;  %v4826_v43 = vld [vmem:[#allocation11 + $0x138] sm:$0xff]   ;;  %v3367_v7 = vadd.f32 %v3353_v11, %v7085_v9 }
 0x5d1   : > { %4574 = vmatprep.subr.bf16.mxu0 %v4826_v43 }
 0x5d2   : > { %v3078_v14 = vadd.f32 %v7094_v27, %v3013_v45  ;;  %v3016_v41 = vadd.f32 %v4335_v48, %v7054_v13  ;;  %v3282_v45 = vadd.f32 %v3269_v18, %v7067_v33  ;;  %4575 = vmatpush3.bf16.msra.mxu0 %v4826_v43 }
 0x5d4   : > { %v3090_v63 = vmul.f32 0.2, %v3078_v14  ;;  %v3081_v16 = vadd.f32 %v7098_v44, %v3016_v41 }
 0x5d6   : > { %v3091_v20 = vmul.f32 0.2, %v3081_v16  ;;  %v3098_v15 = vmax.f32 %v3078_v14, %v3090_v63  ;;  %v3366_v14 = vadd.f32 %v3351_v29, %v7080_v2 }
 0x5d8   : > { %v3099_v5 = vmax.f32 %v3081_v16, %v3091_v20  ;;  %v3196_v59 = vrot.slane %v3098_v15, 7  ;;  %v3379_v16 = vpack.c.bf16 %v3367_v7, %v3366_v14 }
 0x5da   : > { %v3197_v27 = vrot.slane %v3099_v5, 7  ;;  %v7211_v13 = vsel %vm836_vm0, 0.0, %v3196_v59  ;;  %v3220_v44 = vsel %vm836_vm0, %v3196_v59, 0.0 }
 0x5db   : > { %v3254_v1 = vrot.slane %v7211_v13, 1  ;;  %3328 = vrot.lane.b32.xlu1 %v7211_v13, %s5062_s29  ;;  %v3255_v56 = vrot.slane %v3220_v44, 1  ;;  %v3306_v40 = vrot.slane %v7211_v13, 2  ;;  %v3307_v50 = vrot.slane %v3220_v44, 2 }
 0x5dc   : > { %v7219_v62 = vsel %vm836_vm0, 0.0, %v3197_v27  ;;  %v3221_v12 = vsel %vm836_vm0, %v3197_v27, 0.0 }
 0x5dd   : > { %v7224_v32 = vsel %vm1003_vm1, %v3254_v1, %v3255_v56  ;;  %v3342_v38 = vrot.slane %v7219_v62, 1  ;;  %v3343_v46 = vrot.slane %v3221_v12, 1  ;;  %v3346_v60 = vrot.slane %v7219_v62, 2 }
 0x5de   : > { %3278 = vrot.lane.b32.xlu0 %v7224_v32, %s5062_s29  ;;  %v3347_v25 = vrot.slane %v3221_v12, 2  ;;  %v7256_v63 = vsel %vm1212_vm2, %v3306_v40, %v3307_v50 }
 0x5df   : > { %v7231_v36 = vsel %vm1003_vm1, %v3342_v38, %v3343_v46 }
 0x5e0   : > { %3374 = vrot.lane.b32.xlu1 %v7231_v36, %s5062_s29  ;;  %v3321_v31 = vpop.permute.xlu1 %3320  ;;  %v7244_v6 = vsel %vm1212_vm2, %v3346_v60, %v3347_v25 }
 0x5e1   : > { %v3334_v57 = vadd.f32 %v3321_v31, %v7090_v51 }
 0x5e2   : > { %3360 = vrot.lane.b32.xlu0 %v7237_v35, %s5062_s29  ;;  %v3323_v30 = vpop.permute.xlu0 %3322 }
 0x5e3   : > { %v3335_v19 = vadd.f32 %v3323_v30, %v7121_v0 }
 0x5e4   : > { %3364 = vrot.lane.b32.xlu1 %v7244_v6, %s5062_s29  ;;  %v3355_v33 = vpop.permute.xlu1 %3354 }
 0x5e5   : > { %v3382_v55 = vpack.c.bf16 %v3335_v19, %v3334_v57  ;;  %v3389_v57 = vpack.c.bf16 %v7256_v63, %v7237_v35 }
 0x5e6   : > { %3330 = vrot.lane.b32.xlu0 %v7219_v62, %s5062_s29  ;;  %v3271_v28 = vpop.permute.xlu0 %3270 }
 0x5e7   : > { %v3283_v48 = vadd.f32 %v3271_v28, %v7107_v47  ;;  %3680 = vmatprep.mubr.bf16.mxu0 %v3382_v55 }
 0x5e8   : > { %v3273_v9 = vpop.permute.xlu1 %3272 }
 0x5e9   : > { %v3380_v41 = vpack.c.bf16 %v3283_v48, %v3282_v45 }
 0x5ea   : > { %3362 = vrot.lane.b32.xlu0 %v7256_v63, %s5062_s29  ;;  %v3357_v2 = vpop.permute.xlu0 %3356  ;;  %s327_s29 = scalar_lea.vmem [#allocation12], %s4009_s17 }
 0x5eb   : > { %3681 = vmatmul.mubr.bf16.gmra.mrb[84].mxu0 %v3380_v41  ;;  %3737 = vmatprep.mubr.bf16.mxu1 %v3380_v41  ;;  %v3369_v47 = vadd.f32 %v3357_v2, %v7133_v23  ;;  %s3882_s30 = sshll.u32 %s327_s29, 4  ;;  %s7303_s30 = int_to_ptr.vmem [resolvable:$true] %s3882_s30 }
 0x5ec   : > { %3738 = vmatmul.mubr.bf16.vlgmr.msra.gmra.mrb[72].mxu1 %v3379_v16  ;;  %s4977_s25 = scalar_lea.vmem %s7303_s30, 256  ;;  %p4984_p12 = scmp.lt.s32.totalorder %s7303_s30, %s4982_s19 }
 0x5ed   : > { %4592 = vmatpush3.bf16.msra.mxu1 %v7157_v58  ;;  %p4978_p3 = scmp.ne.s32.totalorder %s7303_s30, %s4977_s25  ;;  %p4985_p1 = scmp.lt.s32.totalorder %s4983_s14, %s4977_s25 }
 0x5ee   : > { %4585 = vmatprep.subr.bf16.mxu1 %v7159_v4 }
 0x5ef   : > { %p4979_p5 = pnand %p4978_p3, %p5273_p10  ;;  %p4986_p2 = por %p4985_p1, %p4984_p12 }
 0x5f1   : > { %4593 = vmatpush3.bf16.msra.mxu1 %v7159_v4  ;;  %v3284_v4 = vadd.f32 %v3273_v9, %v7115_v54  ;;  %p4980_p7 = pneg %p4979_p5 }
 0x5f2   : > { %4586 = vmatprep.subr.bf16.mxu1 %v7195_v42 }
 0x5f3   : > { %p4987_p13 = pnand %p4986_p2, %p4980_p7 }
 0x5f5   : > { %4594 = vmatpush3.bf16.msra.mxu1 %v7195_v42 }
 0x5f6   : > { %4587 = vmatprep.subr.bf16.mxu1 %v7203_v3 }
 0x5f9   : > { %4595 = vmatpush3.bf16.msra.mxu1 %v7203_v3  ;;  %v3368_v3 = vadd.f32 %v3355_v33, %v7128_v22 }
 0x5fa   : > { %4588 = vmatprep.subr.bf16.mxu1 %v7206_v37 }
 0x5fb   : > { %v3383_v15 = vpack.c.bf16 %v3369_v47, %v3368_v3 }
 0x5fd   : > { %4596 = vmatpush3.bf16.msra.mxu1 %v7206_v37 }
 0x5fe   : > { %4589 = vmatprep.subr.bf16.mxu1 %v4824_v52 }
 0x601   : > { %4597 = vmatpush3.bf16.msra.mxu1 %v4824_v52 }
 0x602   : > { %4590 = vmatprep.subr.bf16.mxu1 %v4825_v34 }
 0x605   : > { %4598 = vmatpush3.bf16.msra.mxu1 %v4825_v34 }
 0x606   : > { %4591 = vmatprep.subr.bf16.mxu1 %v4826_v43 }
 0x609   : > { %4599 = vmatpush3.bf16.msra.mxu1 %v4826_v43 }
 0x61b   : > { %v3325_v29 = vpop.permute.xlu1 %3324 }
 0x61c   : > { %v3336_v5 = vadd.f32 %v3325_v29, %v7138_v53 }
 0x61e   : > { %v3275_v58 = vpop.permute.xlu0 %3274 }
 0x61f   : > { %v3285_v42 = vadd.f32 %v3275_v58, %v7154_v8  ;;  %v3359_v23 = vpop.permute.xlu1 %3358 }
 0x620   : > { %v3370_v12 = vadd.f32 %v3359_v23, %v7174_v26 }
 0x621   : > { %v3384_v20 = vpack.c.bf16 %v3285_v42, %v3284_v4 }
 0x622   : > { %v3327_v37 = vpop.permute.xlu0 %3326 }
 0x623   : > { %v3337_v59 = vadd.f32 %v3327_v37, %v7177_v49  ;;  %3745 = vmatprep.mubr.bf16.mxu1 %v3384_v20  ;;  %v3277_v44 = vpop.permute.xlu1 %3276 }
 0x624   : > { %3746 = vmatmul.mubr.bf16.gmra.mrb[76].mxu1 %v3383_v15  ;;  %v3286_v8 = vadd.f32 %v3277_v44, %v7166_v39 }
 0x625   : > { %v3386_v27 = vpack.c.bf16 %v3337_v59, %v3336_v5 }
 0x627   : > { %3688 = vmatprep.mubr.bf16.mxu0 %v3386_v27 }
 0x628   : > { %3689 = vmatmul.mubr.bf16.gmra.mrb[88].mxu0 %v3384_v20 }
 0x64d   : > { %v3329_v54 = vpop.permute.xlu1 %3328 }
 0x64e   : > { %v3338_v60 = vadd.f32 %v3329_v54, %v7237_v35 }
 0x650   : > { %v3279_v1 = vpop.permute.xlu0 %3278 }
 0x651   : > { %v3287_v22 = vadd.f32 %v3279_v1, %v7211_v13 }
 0x652   : > { %v3375_v56 = vpop.permute.xlu1 %3374 }
 0x653   : > { %v3388_v52 = vpack.c.bf16 %v3287_v22, %v3286_v8  ;;  %v3376_v18 = vadd.f32 %v3375_v56, %v7219_v62 }
 0x654   : > { %v3361_v24 = vpop.permute.xlu0 %3360 }
 0x655   : > { %v3371_v38 = vadd.f32 %v3361_v24, %v7191_v61  ;;  %3753 = vmatprep.mubr.bf16.mxu1 %v3388_v52  ;;  %v3392_v17 = vpack.c.bf16 %v7145_v21, %v3376_v18  ;;  %v3381_v61 = vpack.c.bf16 %v7121_v0, %v7090_v51  ;;  %v3393_v51 = vpack.c.bf16 %v7628_v10, %v7244_v6  ;;  %v4088_v0 = vld [vmem:[%s7352_s5 + $0x3] ss:$0 sm:$0xff] }
 0x656   : > { %v3365_v13 = vpop.permute.xlu1 %3364 }
 0x657   : > { %v3387_v46 = vpack.c.bf16 %v3371_v38, %v3370_v12  ;;  %v3373_v62 = vadd.f32 %v3365_v13, %v7231_v36 }
 0x658   : > { %v3331_v11 = vpop.permute.xlu0 %3330 }
 0x659   : > { %v3339_v39 = vadd.f32 %v3331_v11, %v7256_v63  ;;  %3754 = vmatmul.mubr.bf16.gmra.mrb[80].mxu1 %v3387_v46 }
 0x65a   : > { %3761 = vmatprep.mubr.bf16.mxu1 %v3392_v17 }
 0x65b   : > { %v3390_v25 = vpack.c.bf16 %v3339_v39, %v3338_v60 }
 0x65c   : > { %v3363_v34 = vpop.permute.xlu0 %3362 }
 0x65d   : > { %v3372_v26 = vadd.f32 %v3363_v34, %v7224_v32  ;;  %3696 = vmatprep.mubr.bf16.mxu0 %v3390_v25  ;;  %v3385_v32 = vpack.c.bf16 %v7177_v49, %v7138_v53 }
 0x65e   : > { %3697 = vmatmul.mubr.bf16.gmra.mrb[92].mxu0 %v3388_v52  ;;  %v4364_v31 = vpop.f32.mrb[80].mxu0 }
 0x65f   : > { %v3391_v21 = vpack.c.bf16 %v3373_v62, %v3372_v26  ;;  %4576 = vmatprep.mubr.bf16.mxu0 %v3381_v61  ;;  %v4365_v30 = vpop.f32.mrb[81].mxu0 }
 0x660   : > { %v4366_v19 = vadd.f32 %v4365_v30, %v4364_v31  ;;  %v4367_v40 = vpop.f32.mrb[82].mxu0 }
 0x661   : > { %3762 = vmatmul.mubr.bf16.gmra.mrb[84].mxu1 %v3391_v21  ;;  %v4368_v55 = vpop.f32.mrb[83].mxu0 }
 0x662   : > { %4580 = vmatprep.mubr.bf16.mxu1 %v3389_v57  ;;  %v4369_v36 = vadd.f32 %v4368_v55, %v4367_v40  ;;  %v3675_v48 = vadd.f32 %v4366_v19, %v4088_v0 }
 0x664   : > { %v3678_v16 = vadd.f32 %v4369_v36, %v4088_v0 }
 0x666   : > { %4577 = vmatmul.mubr.bf16.vlgmr.msra.gmra.mrb[96].mxu0 %v3385_v32 }
 0x669   : > { %4581 = vmatmul.mubr.bf16.vlgmr.msra.gmra.mrb[88].mxu1 %v3393_v51 }
 0x6be   : > { %v4370_v50 = vpop.f32.mrb[84].mxu0 }
 0x6bf   : > { %v4371_v35 = vpop.f32.mrb[85].mxu0  ;;  %v4404_v43 = vpop.f32.mrb[72].mxu1 }
 0x6c0   : > { %v4372_v7 = vadd.f32 %v4371_v35, %v4370_v50  ;;  %v4373_v28 = vpop.f32.mrb[86].mxu0  ;;  %v4405_v45 = vpop.f32.mrb[73].mxu1 }
 0x6c1   : > { %v4406_v14 = vadd.f32 %v4405_v45, %v4404_v43  ;;  %v4374_v41 = vpop.f32.mrb[87].mxu0  ;;  %v4407_v63 = vpop.f32.mrb[74].mxu1 }
 0x6c2   : > { %v4375_v53 = vadd.f32 %v4374_v41, %v4373_v28  ;;  %v4408_v49 = vpop.f32.mrb[75].mxu1  ;;  %v3683_v47 = vadd.f32 %v4372_v7, %v4088_v0 }
 0x6c3   : > { %v4409_v33 = vadd.f32 %v4408_v49, %v4407_v63  ;;  %v3740_v10 = vadd.f32 %v4406_v14, %v3675_v48 }
 0x6c4   : > { %v3686_v3 = vadd.f32 %v4375_v53, %v4088_v0 }
 0x6c5   : > { %v3743_v6 = vadd.f32 %v4409_v33, %v3678_v16 }
 0x6f7   : > { %v4410_v2 = vpop.f32.mrb[76].mxu1 }
 0x6f8   : > { %v4411_v9 = vpop.f32.mrb[77].mxu1 }
 0x6f9   : > { %v4412_v58 = vadd.f32 %v4411_v9, %v4410_v2  ;;  %v4413_v4 = vpop.f32.mrb[78].mxu1 }
 0x6fa   : > { %v4414_v42 = vpop.f32.mrb[79].mxu1 }
 0x6fb   : > { %v4415_v29 = vadd.f32 %v4414_v42, %v4413_v4  ;;  %v4376_v20 = vpop.f32.mrb[88].mxu0  ;;  %v3748_v15 = vadd.f32 %v4412_v58, %v3683_v47 }
 0x6fc   : > { %v4377_v37 = vpop.f32.mrb[89].mxu0 }
 0x6fd   : > { %v4378_v5 = vadd.f32 %v4377_v37, %v4376_v20  ;;  %v4379_v59 = vpop.f32.mrb[90].mxu0  ;;  %v3751_v27 = vadd.f32 %v4415_v29, %v3686_v3 }
 0x6fe   : > { %v4380_v23 = vpop.f32.mrb[91].mxu0 }
 0x6ff   : > { %v4381_v44 = vadd.f32 %v4380_v23, %v4379_v59  ;;  %v3691_v8 = vadd.f32 %v4378_v5, %v4088_v0 }
 0x701   : > { %v3694_v18 = vadd.f32 %v4381_v44, %v4088_v0 }
 0x72c   : > { %v4416_v54 = vpop.f32.mrb[80].mxu1 }
 0x72d   : > { %v4417_v1 = vpop.f32.mrb[81].mxu1 }
 0x72e   : > { %v4418_v22 = vadd.f32 %v4417_v1, %v4416_v54  ;;  %v4419_v56 = vpop.f32.mrb[82].mxu1 }
 0x72f   : > { %v4420_v52 = vpop.f32.mrb[83].mxu1 }
 0x730   : > { %v4421_v24 = vadd.f32 %v4420_v52, %v4419_v56  ;;  %v3756_v12 = vadd.f32 %v4418_v22, %v3691_v8 }
 0x731   : > { %v4382_v38 = vpop.f32.mrb[92].mxu0 }
 0x732   : > { %v4383_v46 = vpop.f32.mrb[93].mxu0  ;;  %v3759_v17 = vadd.f32 %v4421_v24, %v3694_v18 }
 0x733   : > { %v4384_v11 = vadd.f32 %v4383_v46, %v4382_v38  ;;  %v4385_v60 = vpop.f32.mrb[94].mxu0 }
 0x734   : > { %v4386_v39 = vpop.f32.mrb[95].mxu0  ;;  %v4422_v13 = vpop.f32.mrb[84].mxu1 }
 0x735   : > { %v3699_v25 = vadd.f32 %v4384_v11, %v4088_v0  ;;  %v4387_v34 = vadd.f32 %v4386_v39, %v4385_v60  ;;  %v4423_v62 = vpop.f32.mrb[85].mxu1 }
 0x736   : > { %v4424_v26 = vadd.f32 %v4423_v62, %v4422_v13  ;;  %v4425_v61 = vpop.f32.mrb[86].mxu1 }
 0x737   : > { %v3702_v21 = vadd.f32 %v4387_v34, %v4088_v0  ;;  %v4426_v31 = vpop.f32.mrb[87].mxu1 }
 0x738   : > { %v4427_v30 = vadd.f32 %v4426_v31, %v4425_v61  ;;  %v3764_v57 = vadd.f32 %v4424_v26, %v3699_v25 }
 0x739   : > { %v4578_v19 = vpop.f32.mrb[96].mxu0 }
 0x73a   : > { %v3813_v40 = vadd.f32 %v4578_v19, %v3748_v15  ;;  %v3804_v55 = vpop.f32.mrb[97].mxu0  ;;  %v3767_v36 = vadd.f32 %v4427_v30, %v3702_v21 }
 0x73b   : > { %v3805_v32 = vadd.f32 %v3804_v55, %v3740_v10  ;;  %v4579_v51 = vpop.f32.mrb[98].mxu0 }
 0x73c   : > { %v3837_v50 = vmul.f32 0.2, %v3813_v40  ;;  %v3816_v35 = vadd.f32 %v4579_v51, %v3751_v27  ;;  %v3807_v43 = vpop.f32.mrb[99].mxu0  ;;  %v4582_v7 = vpop.f32.mrb[88].mxu1 }
 0x73d   : > { %v3835_v28 = vmul.f32 0.2, %v3805_v32  ;;  %v3808_v45 = vadd.f32 %v3807_v43, %v3743_v6  ;;  %v3829_v48 = vadd.f32 %v4582_v7, %v3764_v57  ;;  %v3820_v14 = vpop.f32.mrb[89].mxu1 }
 0x73e   : > { %v3838_v41 = vmul.f32 0.2, %v3816_v35  ;;  %v3821_v63 = vadd.f32 %v3820_v14, %v3756_v12  ;;  %v4583_v0 = vpop.f32.mrb[90].mxu1  ;;  %v3845_v2 = vmax.f32 %v3813_v40, %v3837_v50 }
 0x73f   : > { %v3836_v53 = vmul.f32 0.2, %v3808_v45  ;;  %v3841_v49 = vmul.f32 0.2, %v3829_v48  ;;  %v3832_v16 = vadd.f32 %v4583_v0, %v3767_v36  ;;  %v3823_v33 = vpop.f32.mrb[91].mxu1  ;;  %v3843_v58 = vmax.f32 %v3805_v32, %v3835_v28 }
 0x740   : > { %v3846_v9 = vmax.f32 %v3816_v35, %v3838_v41  ;;  %v3839_v47 = vmul.f32 0.2, %v3821_v63  ;;  %v3824_v10 = vadd.f32 %v3823_v33, %v3759_v17 }
 0x741   : > { %v3844_v4 = vmax.f32 %v3808_v45, %v3836_v53  ;;  %v3842_v42 = vmul.f32 0.2, %v3832_v16  ;;  %v3849_v20 = vmax.f32 %v3829_v48, %v3841_v49 }
 0x742   : > { %v3852_v3 = vmax.f32 %v3845_v2, %v3846_v9  ;;  %v3840_v6 = vmul.f32 0.2, %v3824_v10  ;;  %v3847_v37 = vmax.f32 %v3821_v63, %v3839_v47 }
 0x743   : > { %v3851_v29 = vmax.f32 %v3843_v58, %v3844_v4  ;;  %v3850_v15 = vmax.f32 %v3832_v16, %v3842_v42 }
 0x744   : > { %3856 = vst [vmem:[#allocation2 + $0x8] sm:$0xff] %v3852_v3  ;;  %v3848_v5 = vmax.f32 %v3824_v10, %v3840_v6 }
 0x745   : > { %3855 = vst [vmem:[#allocation2] sm:$0xff] %v3851_v29  ;;  %v3854_v59 = vmax.f32 %v3849_v20, %v3850_v15 }
 0x746   : > { %v3853_v27 = vmax.f32 %v3847_v37, %v3848_v5 }
 0x747   : > { %3858 = vst [vmem:[#allocation2 + $0x18] sm:$0xff] %v3854_v59 }
 0x748   : > { %3857 = vst [vmem:[#allocation2 + $0x10] sm:$0xff] %v3853_v27 }
 0x74c   : > { %v3859_v23 = vld [vmem:[#allocation2] ss:$2 sm:$0xff]  ;;  %v3862_v44 = vld [vmem:[#allocation2 + $0x1] ss:$2 sm:$0xff] }
 0x74d   : > { %v3864_v54 = vmax.f32 %v3859_v23, %v3862_v44 }
 0x74f   : > { %v3861_v1 = vld [vmem:[#allocation2 + $0x10] ss:$2 sm:$0xff]  ;;  %v3863_v8 = vld [vmem:[#allocation2 + $0x11] ss:$2 sm:$0xff]  ;;  %3866 = vst [vmem:[%s327_s29] sm:$0xff] %v3864_v54 }
 0x750   : > { %v3865_v22 = vmax.f32 %v3861_v1, %v3863_v8 }
 0x752   : > { %3867 = vst [vmem:[%s327_s29 + $0x8] sm:$0xff] %v3865_v22 }
 0x753   : > { %4990 = shalt.err (!%p4987_p13)
}
 0x754   : > { %s4991_s26 = scalar_lea.hbm %s7301_s10, 256  ;;  %s4995_s17 = scalar_lea.hbm %s7353_s6, 512 }
 0x755   : > { %p4992_p9 = scmp.ne.s32.totalorder %s7301_s10, %s4991_s26  ;;  %p4996_p4 = scmp.lt.u32.totalorder %s7301_s10, %s7353_s6 }
 0x756   : > { %p4997_p8 = scmp.lt.u32.totalorder %s4995_s17, %s4991_s26  ;;  %p4999_p3 = scmp.lt.u32.totalorder %s4991_s26, %s7301_s10 }
 0x757   : > { %p4993_p0 = pnand %p4992_p9, %p5273_p10 }
 0x758   : > { %p4998_p6 = por %p4997_p8, %p4996_p4 }
 0x759   : > { %p4994_p11 = pneg %p4993_p0 }
 0x75a   : > { %p5000_p5 = por %p4999_p3, %p4998_p6 }
 0x75c   : > { %p5001_p7 = pnand %p5000_p5, %p4994_p11 }
 0x75e   : > { %5004 = shalt.err (!%p5001_p7)
}
 0x75f   : > { %s5065_s9 = smov 128   ;;  %s5066_s7 = smov 8  }
 0x760   : > { %4618 = dma.vmem_to_hbm [thread:$0]  (%p5273_p10), %s7303_s30, 256, %s7301_s10, %s3869_s11, %s5065_s9, %s5065_s9, %s5066_s7  }
 0x761 PF: > { %s3897_s25 = sand.u32 1, %s5039_s21   ;;  %p7630_p12 = scmp.ne.s32.totalorder %s7439_s28, 0 }
 0x762   : > { %p7631_p1 = scmp.ge.s32.totalorder %s5051_s24, 2  ;;  %s3898_s8 = scalar_lea.sflag [#allocation5], %s3897_s25 }
 0x764   : > { %p4638_p2 = pnand %p7631_p1, %p7630_p12 }
 0x766   : > { %5034 = dma.done.wait (!%p4638_p2), %s3898_s8, 256  }
 0x767   : > { %5036 = vsyncadd (!%p4638_p2), %s3898_s8, 4294967040  ;;  %p21_p13 = scmp.ge.s32.totalorder %s5263_s18, 4   ;;  %s7632_s21 = smov %s5043_s22 }
 0x768   : > { %s7633_s22 = smov %s5047_s23  ;;  %s7634_s23 = smov %s5279_s16 }
 0x769   : > { %s7635_s24 = smov %s5263_s18  ;;  %23 = sbr.rel (!%p21_p13) target bundleno = 7 (0x7), region = 124 }
 0x770   :  { %3903 = vsyncpa [#allocation4], 1 }
 0x771   :  { %3905 = vsyncpa [#allocation4 + $0x1], 1 }
 0x772   :  { %3906 = vsyncpa [#allocation7], 1 }
 0x773   :  { %3907 = vsyncpa [#allocation10], 1 }
 0x774   :  { %3908 = vsyncpa [#allocation5], 1 }
 0x775   :  { %3910 = vsyncpa [#allocation5 + $0x1], 1 }

</bundles_post_ra>
